<compile_context>
chip_gen: v6e
topology: v6e:2x2x1
jax: 0.10.0
libtpu: 0.0.40
codegen_flags: <defaults>
</compile_context>

<pallas_src>
import functools
import math

import jax
import jax.numpy as jnp
from jax.experimental import pallas as pl
from jax.experimental.pallas import tpu as pltpu


def _round_up(x, m):
    return (x + m - 1) // m * m


# -----------------------------------------------------------------------------
# Per-layer conv primitives (shared by the operator packer and the reference).
# -----------------------------------------------------------------------------
def _conv_s2p1(x_nchw, w_oihw):
    """PyTorch Conv2d(kernel=3, stride=2, padding=1)."""
    return jax.lax.conv_general_dilated(
        x_nchw, w_oihw, window_strides=(2, 2), padding=((1, 1), (1, 1)),
        dimension_numbers=("NCHW", "OIHW", "NCHW"))


def _convt_s2p1op1(x_nchw, w_iohw):
    """PyTorch ConvTranspose2d(kernel=3, stride=2, padding=1, output_padding=1)."""
    w_conv = jnp.transpose(w_iohw, (1, 0, 2, 3))[:, :, ::-1, ::-1]
    return jax.lax.conv_general_dilated(
        x_nchw, w_conv, window_strides=(1, 1), padding=((1, 2), (1, 2)),
        lhs_dilation=(2, 2), dimension_numbers=("NCHW", "OIHW", "NCHW"))


LAYERS = (
    ("e1", _conv_s2p1, True),
    ("e2", _conv_s2p1, True),
    ("e3", _conv_s2p1, True),
    ("d1", _convt_s2p1op1, True),
    ("d2", _convt_s2p1op1, True),
    ("d3", _convt_s2p1op1, False),
)


# -----------------------------------------------------------------------------
# One-time parameter packing: each conv layer -> dense (D_in_pad, D_out_pad)
# matmul operator over the flattened per-image activation + flattened bias row.
# -----------------------------------------------------------------------------
def pack_params(params, in_shape=(1, 16, 16)):
    shape = in_shape
    d_in0_pad = _round_up(math.prod(in_shape), 128)
    d_prev_pad = d_in0_pad
    weights, biases, relus = [], [], []

    for name, fn, relu in LAYERS:
        w = params[name + "_w"].astype(jnp.float32)
        b = params[name + "_b"].astype(jnp.float32)
        d_in = math.prod(shape)

        def f_flat(v, fn=fn, w=w, shape=shape):
            return fn(v.reshape((1,) + shape), w)[0].reshape(-1)

        # Columns of the linear operator = layer applied to the identity basis.
        a = jax.vmap(f_flat)(jnp.eye(d_in, dtype=jnp.float32))       # (d_in, d_out)
        out_shape = tuple(fn(jnp.zeros((1,) + shape, jnp.float32), w).shape[1:])
        d_out = math.prod(out_shape)
        d_out_pad = _round_up(d_out, 128)

        a_pad = jnp.zeros((d_prev_pad, d_out_pad), jnp.float32).at[:d_in, :d_out].set(a)
        b_flat = jnp.repeat(b, out_shape[1] * out_shape[2])          # (Co*OH*OW,)
        b_pad = jnp.zeros((1, d_out_pad), jnp.float32).at[0, :d_out].set(b_flat)

        weights.append(a_pad)
        biases.append(b_pad)
        relus.append(relu)
        shape = out_shape
        d_prev_pad = d_out_pad

    return {
        "in_shape": tuple(in_shape),
        "out_shape": tuple(shape),
        "d_in_pad": d_in0_pad,
        "d_out": math.prod(shape),
        "d_out_pad": d_prev_pad,
        "weights": tuple(weights),
        "biases": tuple(biases),
        "relus": tuple(relus),
    }


# -----------------------------------------------------------------------------
# Fused Pallas kernel: 6 chained matmul + bias (+ ReLU) steps, all in VMEM.
# -----------------------------------------------------------------------------
def _fused_ae_kernel(*refs, relus):
    x_ref = refs[0]
    o_ref = refs[-1]
    h = x_ref[...]
    for layer_idx in range(len(relus)):
        w_ref = refs[1 + 2 * layer_idx]
        b_ref = refs[2 + 2 * layer_idx]
        h = jnp.dot(h, w_ref[...], preferred_element_type=jnp.float32) + b_ref[...]
        if relus[layer_idx]:
            h = jnp.maximum(h, 0.0)
    o_ref[...] = h.astype(o_ref.dtype)


def autoencoder_forward(x_nchw, packed):
    bsz = x_nchw.shape[0]
    in_shape = packed["in_shape"]
    assert tuple(x_nchw.shape[1:]) == in_shape, (x_nchw.shape, in_shape)

    d0 = math.prod(in_shape)
    d0p = packed["d_in_pad"]
    d_last = packed["d_out"]
    d_last_p = packed["d_out_pad"]
    out_shape = packed["out_shape"]

    # Batch-row tiling: 1 step for small batches (single-TC v5e/v6e), >=2
    # "parallel" steps once the padded batch reaches 16 rows (v7x dual-TC).
    mp = _round_up(bsz, 8)
    if mp >= 16:
        tile_m = _round_up(pl.cdiv(mp, 2), 8)
        mp = 2 * tile_m
        n_tiles = 2
    else:
        tile_m = mp
        n_tiles = 1

    x_flat = x_nchw.reshape(bsz, d0).astype(jnp.float32)
    xp = jnp.zeros((mp, d0p), jnp.float32).at[:bsz, :d0].set(x_flat)

    ws, bs, relus = packed["weights"], packed["biases"], packed["relus"]

    in_specs = [pl.BlockSpec((tile_m, d0p), lambda i: (i, 0))]
    operands = [xp]
    for w, b in zip(ws, bs):
        in_specs.append(pl.BlockSpec(w.shape, lambda i: (0, 0)))   # resident weights
        in_specs.append(pl.BlockSpec(b.shape, lambda i: (0, 0)))
        operands.extend([w, b])

    flops = 2 * mp * sum(int(w.shape[0]) * int(w.shape[1]) for w in ws)
    bytes_accessed = 4 * (mp * d0p + mp * d_last_p
                          + sum(int(w.size) for w in ws)
                          + sum(int(b.size) for b in bs))

    out = pl.pallas_call(
        functools.partial(_fused_ae_kernel, relus=relus),
        out_shape=jax.ShapeDtypeStruct((mp, d_last_p), jnp.float32),
        grid_spec=pl.GridSpec(
            grid=(n_tiles,),
            in_specs=in_specs,
            out_specs=pl.BlockSpec((tile_m, d_last_p), lambda i: (i, 0)),
        ),
        compiler_params=pltpu.CompilerParams(
            dimension_semantics=("parallel",),
            vmem_limit_bytes=40 * 1024 * 1024,   # f32 weights ~7.4 MiB, <=2x buffered
        ),
        cost_estimate=pl.CostEstimate(
            flops=flops, transcendentals=0, bytes_accessed=bytes_accessed),
    )(*operands)

    y = out[:bsz, :d_last].reshape((bsz,) + out_shape)
    if y.shape[-1] > x_nchw.shape[-1]:                 # matches PyTorch forward
        y = y[:, :, :, : x_nchw.shape[-1]]
    return y


# -----------------------------------------------------------------------------
# Pure-JAX reference (XLA convolutions) and parameter init.
# -----------------------------------------------------------------------------
def autoencoder_ref(x, p):
    h = x
    for name, fn, relu in LAYERS:
        h = fn(h, p[name + "_w"]) + p[name + "_b"][None, :, None, None]
        if relu:
            h = jax.nn.relu(h)
    if h.shape[-1] > x.shape[-1]:
        h = h[:, :, :, : x.shape[-1]]
    return h


def init_params(key):
    shapes = {
        "e1_w": (16, 1, 3, 3), "e1_b": (16,),
        "e2_w": (32, 16, 3, 3), "e2_b": (32,),
        "e3_w": (64, 32, 3, 3), "e3_b": (64,),
        "d1_w": (64, 32, 3, 3), "d1_b": (32,),   # ConvTranspose weights: (Cin, Cout, kH, kW)
        "d2_w": (32, 16, 3, 3), "d2_b": (16,),
        "d3_w": (16, 1, 3, 3), "d3_b": (1,),
    }
    names = sorted(shapes)
    keys = jax.random.split(key, len(names))
    return {name: 0.1 * jax.random.normal(k, shapes[name], dtype=jnp.float32)
            for name, k in zip(names, keys)}


if __name__ == "__main__":
    key = jax.random.PRNGKey(0)
    kx, kp = jax.random.split(key)
    x = jax.random.normal(kx, (2, 1, 16, 16), dtype=jnp.float32)  # (B, C, H, W)
    params = init_params(kp)

    packed = pack_params(params, in_shape=(1, 16, 16))   # one-time weight packing

    fwd = jax.jit(lambda xx: autoencoder_forward(xx, packed))
    y = fwd(x)
    y = jax.block_until_ready(y)

    y_ref = autoencoder_ref(x, params)
    assert y.shape == x.shape, f"shape mismatch: {y.shape} vs {x.shape}"
    max_err = jnp.max(jnp.abs(y - y_ref))
    assert jnp.allclose(y, y_ref, atol=2e-3, rtol=2e-3), (
        f"mismatch vs reference, max abs err = {max_err}")

    print("KERNEL_OK")
</pallas_src>

<mosaic_0001>
module attributes {stable_mosaic.version = 11 : i64} {
  func.func @_fused_ae_kernel(%arg0: i32, %arg1: memref<8x256xf32, #tpu.memory_space<vmem>>, %arg2: memref<256x1024xf32, #tpu.memory_space<vmem>>, %arg3: memref<1x1024xf32, #tpu.memory_space<vmem>>, %arg4: memref<1024x512xf32, #tpu.memory_space<vmem>>, %arg5: memref<1x512xf32, #tpu.memory_space<vmem>>, %arg6: memref<512x256xf32, #tpu.memory_space<vmem>>, %arg7: memref<1x256xf32, #tpu.memory_space<vmem>>, %arg8: memref<256x512xf32, #tpu.memory_space<vmem>>, %arg9: memref<1x512xf32, #tpu.memory_space<vmem>>, %arg10: memref<512x1024xf32, #tpu.memory_space<vmem>>, %arg11: memref<1x1024xf32, #tpu.memory_space<vmem>>, %arg12: memref<1024x256xf32, #tpu.memory_space<vmem>>, %arg13: memref<1x256xf32, #tpu.memory_space<vmem>>, %arg14: memref<8x256xf32, #tpu.memory_space<vmem>>) attributes {dimension_semantics = [#tpu.dimension_semantics<parallel>], iteration_bounds = array<i64: 1>, scalar_prefetch = 0 : i64, scratch_operands = 0 : i64, tpu.core_type = #tpu.core_type<tc>, window_params = [{transform_indices = @transform_0, window_bounds = array<i64: 8, 256>}, {pipeline_mode = #tpu.pipeline_mode<synchronous>, transform_indices = @transform_1, window_bounds = array<i64: 256, 1024>}, {pipeline_mode = #tpu.pipeline_mode<synchronous>, transform_indices = @transform_2, window_bounds = array<i64: 1, 1024>}, {pipeline_mode = #tpu.pipeline_mode<synchronous>, transform_indices = @transform_3, window_bounds = array<i64: 1024, 512>}, {pipeline_mode = #tpu.pipeline_mode<synchronous>, transform_indices = @transform_4, window_bounds = array<i64: 1, 512>}, {pipeline_mode = #tpu.pipeline_mode<synchronous>, transform_indices = @transform_5, window_bounds = array<i64: 512, 256>}, {pipeline_mode = #tpu.pipeline_mode<synchronous>, transform_indices = @transform_6, window_bounds = array<i64: 1, 256>}, {pipeline_mode = #tpu.pipeline_mode<synchronous>, transform_indices = @transform_7, window_bounds = array<i64: 256, 512>}, {pipeline_mode = #tpu.pipeline_mode<synchronous>, transform_indices = @transform_8, window_bounds = array<i64: 1, 512>}, {pipeline_mode = #tpu.pipeline_mode<synchronous>, transform_indices = @transform_9, window_bounds = array<i64: 512, 1024>}, {pipeline_mode = #tpu.pipeline_mode<synchronous>, transform_indices = @transform_10, window_bounds = array<i64: 1, 1024>}, {pipeline_mode = #tpu.pipeline_mode<synchronous>, transform_indices = @transform_11, window_bounds = array<i64: 1024, 256>}, {pipeline_mode = #tpu.pipeline_mode<synchronous>, transform_indices = @transform_12, window_bounds = array<i64: 1, 256>}, {transform_indices = @transform_13, window_bounds = array<i64: 8, 256>}]} {
    %c0 = arith.constant 0 : index
    %c0_0 = arith.constant 0 : index
    %0 = vector.load %arg1[%c0, %c0_0] : memref<8x256xf32, #tpu.memory_space<vmem>>, vector<8x256xf32>
    %c0_1 = arith.constant 0 : index
    %c0_2 = arith.constant 0 : index
    %1 = vector.load %arg2[%c0_1, %c0_2] : memref<256x1024xf32, #tpu.memory_space<vmem>>, vector<256x1024xf32>
    %cst = arith.constant dense<0.000000e+00> : vector<8x1024xf32>
    %2 = tpu.matmul %0, %1, %cst {dimension_numbers = #tpu.dot_dimension_numbers<[1], [0], [0], [1], [0, 0, 1, 1], [], []>} : vector<8x256xf32>, vector<256x1024xf32>, vector<8x1024xf32> -> vector<8x1024xf32>
    %c0_3 = arith.constant 0 : index
    %c0_4 = arith.constant 0 : index
    %3 = vector.load %arg3[%c0_3, %c0_4] : memref<1x1024xf32, #tpu.memory_space<vmem>>, vector<1x1024xf32>
    %4 = vector.broadcast %3 : vector<1x1024xf32> to vector<8x1024xf32>
    %5 = arith.addf %2, %4 : vector<8x1024xf32>
    %cst_5 = arith.constant 0.000000e+00 : f32
    %6 = vector.broadcast %cst_5 : f32 to vector<8x1024xf32>
    %7 = arith.maximumf %5, %6 : vector<8x1024xf32>
    %c0_6 = arith.constant 0 : index
    %c0_7 = arith.constant 0 : index
    %8 = vector.load %arg4[%c0_6, %c0_7] : memref<1024x512xf32, #tpu.memory_space<vmem>>, vector<1024x512xf32>
    %cst_8 = arith.constant dense<0.000000e+00> : vector<8x512xf32>
    %9 = tpu.matmul %7, %8, %cst_8 {dimension_numbers = #tpu.dot_dimension_numbers<[1], [0], [0], [1], [0, 0, 1, 1], [], []>} : vector<8x1024xf32>, vector<1024x512xf32>, vector<8x512xf32> -> vector<8x512xf32>
    %c0_9 = arith.constant 0 : index
    %c0_10 = arith.constant 0 : index
    %10 = vector.load %arg5[%c0_9, %c0_10] : memref<1x512xf32, #tpu.memory_space<vmem>>, vector<1x512xf32>
    %11 = vector.broadcast %10 : vector<1x512xf32> to vector<8x512xf32>
    %12 = arith.addf %9, %11 : vector<8x512xf32>
    %cst_11 = arith.constant 0.000000e+00 : f32
    %13 = vector.broadcast %cst_11 : f32 to vector<8x512xf32>
    %14 = arith.maximumf %12, %13 : vector<8x512xf32>
    %c0_12 = arith.constant 0 : index
    %c0_13 = arith.constant 0 : index
    %15 = vector.load %arg6[%c0_12, %c0_13] : memref<512x256xf32, #tpu.memory_space<vmem>>, vector<512x256xf32>
    %cst_14 = arith.constant dense<0.000000e+00> : vector<8x256xf32>
    %16 = tpu.matmul %14, %15, %cst_14 {dimension_numbers = #tpu.dot_dimension_numbers<[1], [0], [0], [1], [0, 0, 1, 1], [], []>} : vector<8x512xf32>, vector<512x256xf32>, vector<8x256xf32> -> vector<8x256xf32>
    %c0_15 = arith.constant 0 : index
    %c0_16 = arith.constant 0 : index
    %17 = vector.load %arg7[%c0_15, %c0_16] : memref<1x256xf32, #tpu.memory_space<vmem>>, vector<1x256xf32>
    %18 = vector.broadcast %17 : vector<1x256xf32> to vector<8x256xf32>
    %19 = arith.addf %16, %18 : vector<8x256xf32>
    %cst_17 = arith.constant 0.000000e+00 : f32
    %20 = vector.broadcast %cst_17 : f32 to vector<8x256xf32>
    %21 = arith.maximumf %19, %20 : vector<8x256xf32>
    %c0_18 = arith.constant 0 : index
    %c0_19 = arith.constant 0 : index
    %22 = vector.load %arg8[%c0_18, %c0_19] : memref<256x512xf32, #tpu.memory_space<vmem>>, vector<256x512xf32>
    %cst_20 = arith.constant dense<0.000000e+00> : vector<8x512xf32>
    %23 = tpu.matmul %21, %22, %cst_20 {dimension_numbers = #tpu.dot_dimension_numbers<[1], [0], [0], [1], [0, 0, 1, 1], [], []>} : vector<8x256xf32>, vector<256x512xf32>, vector<8x512xf32> -> vector<8x512xf32>
    %c0_21 = arith.constant 0 : index
    %c0_22 = arith.constant 0 : index
    %24 = vector.load %arg9[%c0_21, %c0_22] : memref<1x512xf32, #tpu.memory_space<vmem>>, vector<1x512xf32>
    %25 = vector.broadcast %24 : vector<1x512xf32> to vector<8x512xf32>
    %26 = arith.addf %23, %25 : vector<8x512xf32>
    %cst_23 = arith.constant 0.000000e+00 : f32
    %27 = vector.broadcast %cst_23 : f32 to vector<8x512xf32>
    %28 = arith.maximumf %26, %27 : vector<8x512xf32>
    %c0_24 = arith.constant 0 : index
    %c0_25 = arith.constant 0 : index
    %29 = vector.load %arg10[%c0_24, %c0_25] : memref<512x1024xf32, #tpu.memory_space<vmem>>, vector<512x1024xf32>
    %cst_26 = arith.constant dense<0.000000e+00> : vector<8x1024xf32>
    %30 = tpu.matmul %28, %29, %cst_26 {dimension_numbers = #tpu.dot_dimension_numbers<[1], [0], [0], [1], [0, 0, 1, 1], [], []>} : vector<8x512xf32>, vector<512x1024xf32>, vector<8x1024xf32> -> vector<8x1024xf32>
    %c0_27 = arith.constant 0 : index
    %c0_28 = arith.constant 0 : index
    %31 = vector.load %arg11[%c0_27, %c0_28] : memref<1x1024xf32, #tpu.memory_space<vmem>>, vector<1x1024xf32>
    %32 = vector.broadcast %31 : vector<1x1024xf32> to vector<8x1024xf32>
    %33 = arith.addf %30, %32 : vector<8x1024xf32>
    %cst_29 = arith.constant 0.000000e+00 : f32
    %34 = vector.broadcast %cst_29 : f32 to vector<8x1024xf32>
    %35 = arith.maximumf %33, %34 : vector<8x1024xf32>
    %c0_30 = arith.constant 0 : index
    %c0_31 = arith.constant 0 : index
    %36 = vector.load %arg12[%c0_30, %c0_31] : memref<1024x256xf32, #tpu.memory_space<vmem>>, vector<1024x256xf32>
    %cst_32 = arith.constant dense<0.000000e+00> : vector<8x256xf32>
    %37 = tpu.matmul %35, %36, %cst_32 {dimension_numbers = #tpu.dot_dimension_numbers<[1], [0], [0], [1], [0, 0, 1, 1], [], []>} : vector<8x1024xf32>, vector<1024x256xf32>, vector<8x256xf32> -> vector<8x256xf32>
    %c0_33 = arith.constant 0 : index
    %c0_34 = arith.constant 0 : index
    %38 = vector.load %arg13[%c0_33, %c0_34] : memref<1x256xf32, #tpu.memory_space<vmem>>, vector<1x256xf32>
    %39 = vector.broadcast %38 : vector<1x256xf32> to vector<8x256xf32>
    %40 = arith.addf %37, %39 : vector<8x256xf32>
    %c0_35 = arith.constant 0 : index
    %c0_36 = arith.constant 0 : index
    %41 = vector.load %arg14[%c0_35, %c0_36] : memref<8x256xf32, #tpu.memory_space<vmem>>, vector<8x256xf32>
    tpu.vector_store %arg14[%c0_35, %c0_36], %40 {strides = array<i32>} : memref<8x256xf32, #tpu.memory_space<vmem>>, vector<8x256xf32>,
    return
  }
  func.func @transform_0(%arg0: i32) -> (i32, i32) {
    %c0_i32 = arith.constant 0 : i32
    %c0_i32_0 = arith.constant 0 : i32
    return %arg0, %c0_i32 : i32, i32
  }
  func.func @transform_1(%arg0: i32) -> (i32, i32) {
    %c0_i32 = arith.constant 0 : i32
    %c0_i32_0 = arith.constant 0 : i32
    %c0_i32_1 = arith.constant 0 : i32
    return %c0_i32, %c0_i32_0 : i32, i32
  }
  func.func @transform_2(%arg0: i32) -> (i32, i32) {
    %c0_i32 = arith.constant 0 : i32
    %c0_i32_0 = arith.constant 0 : i32
    %c0_i32_1 = arith.constant 0 : i32
    return %c0_i32, %c0_i32_0 : i32, i32
  }
  func.func @transform_3(%arg0: i32) -> (i32, i32) {
    %c0_i32 = arith.constant 0 : i32
    %c0_i32_0 = arith.constant 0 : i32
    %c0_i32_1 = arith.constant 0 : i32
    return %c0_i32, %c0_i32_0 : i32, i32
  }
  func.func @transform_4(%arg0: i32) -> (i32, i32) {
    %c0_i32 = arith.constant 0 : i32
    %c0_i32_0 = arith.constant 0 : i32
    %c0_i32_1 = arith.constant 0 : i32
    return %c0_i32, %c0_i32_0 : i32, i32
  }
  func.func @transform_5(%arg0: i32) -> (i32, i32) {
    %c0_i32 = arith.constant 0 : i32
    %c0_i32_0 = arith.constant 0 : i32
    %c0_i32_1 = arith.constant 0 : i32
    return %c0_i32, %c0_i32_0 : i32, i32
  }
  func.func @transform_6(%arg0: i32) -> (i32, i32) {
    %c0_i32 = arith.constant 0 : i32
    %c0_i32_0 = arith.constant 0 : i32
    %c0_i32_1 = arith.constant 0 : i32
    return %c0_i32, %c0_i32_0 : i32, i32
  }
  func.func @transform_7(%arg0: i32) -> (i32, i32) {
    %c0_i32 = arith.constant 0 : i32
    %c0_i32_0 = arith.constant 0 : i32
    %c0_i32_1 = arith.constant 0 : i32
    return %c0_i32, %c0_i32_0 : i32, i32
  }
  func.func @transform_8(%arg0: i32) -> (i32, i32) {
    %c0_i32 = arith.constant 0 : i32
    %c0_i32_0 = arith.constant 0 : i32
    %c0_i32_1 = arith.constant 0 : i32
    return %c0_i32, %c0_i32_0 : i32, i32
  }
  func.func @transform_9(%arg0: i32) -> (i32, i32) {
    %c0_i32 = arith.constant 0 : i32
    %c0_i32_0 = arith.constant 0 : i32
    %c0_i32_1 = arith.constant 0 : i32
    return %c0_i32, %c0_i32_0 : i32, i32
  }
  func.func @transform_10(%arg0: i32) -> (i32, i32) {
    %c0_i32 = arith.constant 0 : i32
    %c0_i32_0 = arith.constant 0 : i32
    %c0_i32_1 = arith.constant 0 : i32
    return %c0_i32, %c0_i32_0 : i32, i32
  }
  func.func @transform_11(%arg0: i32) -> (i32, i32) {
    %c0_i32 = arith.constant 0 : i32
    %c0_i32_0 = arith.constant 0 : i32
    %c0_i32_1 = arith.constant 0 : i32
    return %c0_i32, %c0_i32_0 : i32, i32
  }
  func.func @transform_12(%arg0: i32) -> (i32, i32) {
    %c0_i32 = arith.constant 0 : i32
    %c0_i32_0 = arith.constant 0 : i32
    %c0_i32_1 = arith.constant 0 : i32
    return %c0_i32, %c0_i32_0 : i32, i32
  }
  func.func @transform_13(%arg0: i32) -> (i32, i32) {
    %c0_i32 = arith.constant 0 : i32
    %c0_i32_0 = arith.constant 0 : i32
    return %arg0, %c0_i32 : i32, i32
  }
}

</mosaic_0001>

<bundles_post_ra>
// kernel: _lambda_.1
= control target key start
LH: loop header
LB: loop body
LE: loop exit
PB: predicated region body
PF: predicated region fallthrough
CT: control target
= control target key end

     0   :  { %18 = vsyncpa [#allocation3], 0  ;;  %s4732_s0 = inlined_call_operand.vmem [shape: f32[8,256], index: 0, kind: input, shape index: {}]   ;;  %s4733_s1 = inlined_call_operand.hbm [shape: f32[256,1024], index: 1, kind: input, shape index: {}]   ;;  %s4734_s2 = inlined_call_operand.hbm [shape: f32[1,1024], index: 2, kind: input, shape index: {}]   ;;  %s4735_s3 = inlined_call_operand.hbm [shape: f32[1024,512], index: 3, kind: input, shape index: {}]   ;;  %s4736_s4 = inlined_call_operand.hbm [shape: f32[1,512], index: 4, kind: input, shape index: {}]   ;;  %s4737_s5 = inlined_call_operand.hbm [shape: f32[512,256], index: 5, kind: input, shape index: {}]   ;;  %s4738_s6 = inlined_call_operand.hbm [shape: f32[1,256], index: 6, kind: input, shape index: {}]   ;;  %s4739_s7 = inlined_call_operand.hbm [shape: f32[256,512], index: 7, kind: input, shape index: {}]   ;;  %s4740_s8 = inlined_call_operand.hbm [shape: f32[1,512], index: 8, kind: input, shape index: {}]   ;;  %s4741_s9 = inlined_call_operand.hbm [shape: f32[512,1024], index: 9, kind: input, shape index: {}]   ;;  %s4742_s10 = inlined_call_operand.hbm [shape: f32[1,1024], index: 10, kind: input, shape index: {}]   ;;  %s4743_s11 = inlined_call_operand.hbm [shape: f32[1024,256], index: 11, kind: input, shape index: {}]   ;;  %s4744_s12 = inlined_call_operand.vmem [shape: f32[1,256], index: 12, kind: input, shape index: {}]   ;;  %s4745_s13 = inlined_call_operand.vmem [shape: f32[8,256], index: 13, kind: output, shape index: {}]  }
   0x1   :  { %19 = vsyncpa [#allocation5], 0 }
   0x2   :  { %20 = vsyncpa [#allocation8], 0 }
   0x3   :  { %21 = vsyncpa [#allocation11], 0 }
   0x4   :  { %22 = vsyncpa [#allocation14], 0 }
   0x5   :  { %23 = vsyncpa [#allocation17], 0  ;;  %s4405_s25 = smov [#allocation4]   ;;  %s4406_s27 = smov [#allocation7]  }
   0x6   :  { %s44_s26 = sshll.u32 %s4405_s25, 4  ;;  %s66_s28 = sshll.u32 %s4406_s27, 4  ;;  %s45_s26 = int_to_ptr.vmem [resolvable:$true] %s44_s26  ;;  %s67_s28 = int_to_ptr.vmem [resolvable:$true] %s66_s28 }
   0x7   :  { %s4181_s29 = scalar_lea.vmem %s45_s26, 128  ;;  %p4186_p1 = scmp.lt.s32.totalorder %s45_s26, %s45_s26 }
   0x8   :  { %p4182_p0 = scmp.ne.s32.totalorder %s45_s26, %s4181_s29  ;;  %p4187_p2 = scmp.lt.s32.totalorder %s4181_s29, %s4181_s29 }
   0xa   :  { %p4188_p3 = por %p4187_p2, %p4186_p1 }
   0xc   :  { %p4189_p4 = pnand %p4188_p3, %p4182_p0 }
   0xe   :  { %4192 = shalt.err (!%p4189_p4)
}
   0xf   :  { %47 = dma.hbm_to_vmem [thread:$0]  %s4734_s2, 128, %s45_s26, [#allocation5]  }
  0x10   :  { %s4201_s15 = scalar_lea.vmem %s67_s28, 64  ;;  %p4206_p6 = scmp.lt.s32.totalorder %s67_s28, %s67_s28 }
  0x11   :  { %p4202_p5 = scmp.ne.s32.totalorder %s67_s28, %s4201_s15  ;;  %p4207_p7 = scmp.lt.s32.totalorder %s4201_s15, %s4201_s15 }
  0x13   :  { %p4208_p8 = por %p4207_p7, %p4206_p6 }
  0x15   :  { %p4209_p9 = pnand %p4208_p8, %p4202_p5 }
  0x17   :  { %4212 = shalt.err (!%p4209_p9)
}
  0x18   :  { %69 = dma.hbm_to_vmem [thread:$0]  %s4736_s4, 64, %s67_s28, [#allocation8]  }
  0x19   :  { %s4407_s18 = smov [#allocation10]   ;;  %s4408_s20 = smov [#allocation13]  }
  0x1a   :  { %s88_s19 = sshll.u32 %s4407_s18, 4  ;;  %s110_s21 = sshll.u32 %s4408_s20, 4  ;;  %s89_s19 = int_to_ptr.vmem [resolvable:$true] %s88_s19  ;;  %s111_s21 = int_to_ptr.vmem [resolvable:$true] %s110_s21 }
  0x1b   :  { %s4221_s22 = scalar_lea.vmem %s89_s19, 32  ;;  %p4226_p11 = scmp.lt.s32.totalorder %s89_s19, %s89_s19 }
  0x1c   :  { %p4222_p10 = scmp.ne.s32.totalorder %s89_s19, %s4221_s22  ;;  %p4227_p12 = scmp.lt.s32.totalorder %s4221_s22, %s4221_s22 }
  0x1e   :  { %p4228_p13 = por %p4227_p12, %p4226_p11 }
  0x20   :  { %p4229_p0 = pnand %p4228_p13, %p4222_p10 }
  0x22   :  { %4232 = shalt.err (!%p4229_p0)
}
  0x23   :  { %91 = dma.hbm_to_vmem [thread:$0]  %s4738_s6, 32, %s89_s19, [#allocation11]  }
  0x24   :  { %s4241_s24 = scalar_lea.vmem %s111_s21, 64  ;;  %p4246_p2 = scmp.lt.s32.totalorder %s111_s21, %s111_s21 }
  0x25   :  { %p4242_p1 = scmp.ne.s32.totalorder %s111_s21, %s4241_s24  ;;  %p4247_p3 = scmp.lt.s32.totalorder %s4241_s24, %s4241_s24 }
  0x27   :  { %p4248_p4 = por %p4247_p3, %p4246_p2 }
  0x29   :  { %p4249_p5 = pnand %p4248_p4, %p4242_p1 }
  0x2b   :  { %4252 = shalt.err (!%p4249_p5)
}
  0x2c   :  { %113 = dma.hbm_to_vmem [thread:$0]  %s4740_s8, 64, %s111_s21, [#allocation14]  }
  0x2d   :  { %s4409_s26 = smov [#allocation16]   ;;  %s4410_s28 = smov [#allocation2]  }
  0x2e   :  { %s132_s27 = sshll.u32 %s4409_s26, 4  ;;  %s31_s29 = sshll.u32 %s4410_s28, 4  ;;  %s133_s27 = int_to_ptr.vmem [resolvable:$true] %s132_s27  ;;  %s32_s29 = int_to_ptr.vmem [resolvable:$true] %s31_s29 }
  0x2f   :  { %s4261_s30 = scalar_lea.vmem %s133_s27, 128  ;;  %p4266_p7 = scmp.lt.s32.totalorder %s133_s27, %s133_s27 }
  0x30   :  { %p4262_p6 = scmp.ne.s32.totalorder %s133_s27, %s4261_s30  ;;  %p4267_p8 = scmp.lt.s32.totalorder %s4261_s30, %s4261_s30 }
  0x32   :  { %p4268_p9 = por %p4267_p8, %p4266_p7 }
  0x34   :  { %p4269_p10 = pnand %p4268_p9, %p4262_p6 }
  0x36   :  { %4272 = shalt.err (!%p4269_p10)
}
  0x37   :  { %135 = dma.hbm_to_vmem [thread:$0]  %s4742_s10, 128, %s133_s27, [#allocation17]  }
  0x38   :  { %s4281_s15 = scalar_lea.vmem %s32_s29, 32768  ;;  %p4286_p12 = scmp.lt.s32.totalorder %s32_s29, %s32_s29 }
  0x39   :  { %p4282_p11 = scmp.ne.s32.totalorder %s32_s29, %s4281_s15  ;;  %p4287_p13 = scmp.lt.s32.totalorder %s4281_s15, %s4281_s15 }
  0x3b   :  { %p4288_p0 = por %p4287_p13, %p4286_p12 }
  0x3d   :  { %p4289_p1 = pnand %p4288_p0, %p4282_p11 }
  0x3f   :  { %4292 = shalt.err (!%p4289_p1)
}
  0x40   :  { %s4411_s8 = smov 1024   ;;  %s4412_s16 = smov 64  }
  0x41   :  { %37 = dma.hbm_to_vmem [thread:$0]  %s4733_s1, 32768, %s32_s29, [#allocation3], %s4411_s8, %s4411_s8, %s4412_s16  }
  0x42   :  { %s4413_s19 = smov [#allocation6]  }
  0x43   :  { %s53_s20 = sshll.u32 %s4413_s19, 4  ;;  %s54_s20 = int_to_ptr.vmem [resolvable:$true] %s53_s20 }
  0x44   :  { %s4301_s10 = scalar_lea.vmem %s54_s20, 65536  ;;  %p4306_p3 = scmp.lt.s32.totalorder %s54_s20, %s54_s20 }
  0x45   :  { %p4302_p2 = scmp.ne.s32.totalorder %s54_s20, %s4301_s10  ;;  %p4307_p4 = scmp.lt.s32.totalorder %s4301_s10, %s4301_s10 }
  0x47   :  { %p4308_p5 = por %p4307_p4, %p4306_p3 }
  0x49   :  { %p4309_p6 = pnand %p4308_p5, %p4302_p2 }
  0x4b   :  { %4312 = shalt.err (!%p4309_p6)
}
  0x4c   :  { %s4414_s21 = smov 512   ;;  %s4415_s22 = smov 32  }
  0x4d   :  { %59 = dma.hbm_to_vmem [thread:$0]  %s4735_s3, 65536, %s54_s20, [#allocation5], %s4414_s21, %s4414_s21, %s4415_s22  }
  0x4e   :  { %s4416_s1 = smov [#allocation9]  }
  0x4f   :  { %s75_s24 = sshll.u32 %s4416_s1, 4  ;;  %s76_s24 = int_to_ptr.vmem [resolvable:$true] %s75_s24 }
  0x50   :  { %s4321_s4 = scalar_lea.vmem %s76_s24, 16384  ;;  %p4326_p8 = scmp.lt.s32.totalorder %s76_s24, %s76_s24 }
  0x51   :  { %p4322_p7 = scmp.ne.s32.totalorder %s76_s24, %s4321_s4  ;;  %p4327_p9 = scmp.lt.s32.totalorder %s4321_s4, %s4321_s4 }
  0x53   :  { %p4328_p10 = por %p4327_p9, %p4326_p8 }
  0x55   :  { %p4329_p11 = pnand %p4328_p10, %p4322_p7 }
  0x57   :  { %4332 = shalt.err (!%p4329_p11)
}
  0x58   :  { %s4417_s25 = smov 256   ;;  %s4418_s26 = smov 16  }
  0x59   :  { %81 = dma.hbm_to_vmem [thread:$0]  %s4737_s5, 16384, %s76_s24, [#allocation8], %s4417_s25, %s4417_s25, %s4418_s26  }
  0x5a   :  { %s4419_s3 = smov [#allocation12]   ;;  %s4420_s30 = smov [#allocation15]  }
  0x5b   :  { %s97_s29 = sshll.u32 %s4419_s3, 4  ;;  %s119_s6 = sshll.u32 %s4420_s30, 4  ;;  %s98_s29 = int_to_ptr.vmem [resolvable:$true] %s97_s29  ;;  %s120_s6 = int_to_ptr.vmem [resolvable:$true] %s119_s6 }
  0x5c   :  { %s4341_s14 = scalar_lea.vmem %s98_s29, 16384  ;;  %p4346_p13 = scmp.lt.s32.totalorder %s98_s29, %s98_s29 }
  0x5d   :  { %p4342_p12 = scmp.ne.s32.totalorder %s98_s29, %s4341_s14  ;;  %p4347_p0 = scmp.lt.s32.totalorder %s4341_s14, %s4341_s14 }
  0x5f   :  { %p4348_p1 = por %p4347_p0, %p4346_p13 }
  0x61   :  { %p4349_p2 = pnand %p4348_p1, %p4342_p12 }
  0x63   :  { %4352 = shalt.err (!%p4349_p2)
}
  0x64   :  { %103 = dma.hbm_to_vmem [thread:$0]  %s4739_s7, 16384, %s98_s29, [#allocation11], %s4414_s21, %s4414_s21, %s4415_s22  }
  0x65   :  { %s4361_s5 = scalar_lea.vmem %s120_s6, 65536  ;;  %p4366_p4 = scmp.lt.s32.totalorder %s120_s6, %s120_s6 }
  0x66   :  { %p4362_p3 = scmp.ne.s32.totalorder %s120_s6, %s4361_s5  ;;  %p4367_p5 = scmp.lt.s32.totalorder %s4361_s5, %s4361_s5 }
  0x68   :  { %p4368_p6 = por %p4367_p5, %p4366_p4 }
  0x6a   :  { %p4369_p7 = pnand %p4368_p6, %p4362_p3 }
  0x6c   :  { %4372 = shalt.err (!%p4369_p7)
}
  0x6d   :  { %125 = dma.hbm_to_vmem [thread:$0]  %s4741_s9, 65536, %s120_s6, [#allocation14], %s4411_s8, %s4411_s8, %s4412_s16  }
  0x6e   :  { %s4421_s20 = smov [#allocation18]  }
  0x6f   :  { %s141_s10 = sshll.u32 %s4421_s20, 4  ;;  %s142_s10 = int_to_ptr.vmem [resolvable:$true] %s141_s10 }
  0x70   :  { %s4381_s2 = scalar_lea.vmem %s142_s10, 32768  ;;  %p4386_p9 = scmp.lt.s32.totalorder %s142_s10, %s142_s10 }
  0x71   :  { %p4382_p8 = scmp.ne.s32.totalorder %s142_s10, %s4381_s2  ;;  %p4387_p10 = scmp.lt.s32.totalorder %s4381_s2, %s4381_s2 }
  0x73   :  { %p4388_p11 = por %p4387_p10, %p4386_p9 }
  0x75   :  { %p4389_p12 = pnand %p4388_p11, %p4382_p8 }
  0x77   :  { %4392 = shalt.err (!%p4389_p12)
}
  0x78   :  { %147 = dma.hbm_to_vmem [thread:$0]  %s4743_s11, 32768, %s142_s10, [#allocation17], %s4417_s25, %s4417_s25, %s4418_s26  }
  0x79   :  { %4393 = dma.done.wait [#allocation3], 32768  }
  0x7a   :  { %4394 = vsyncadd [#allocation3], 4294934528 }
  0x7b   :  { %4395 = dma.done.wait [#allocation5], 65664  }
  0x7c   :  { %4396 = vsyncadd [#allocation5], 4294901632 }
  0x7d   :  { %4397 = dma.done.wait [#allocation8], 16448  }
  0x7e   :  { %4398 = vsyncadd [#allocation8], 4294950848 }
  0x7f   :  { %4399 = dma.done.wait [#allocation11], 16416  }
  0x80   :  { %4400 = vsyncadd [#allocation11], 4294950880 }
  0x81   :  { %4401 = dma.done.wait [#allocation14], 65600  }
  0x82   :  { %4402 = vsyncadd [#allocation14], 4294901696 }
  0x83   :  { %4403 = dma.done.wait [#allocation17], 32896  }
  0x84   :  { %4404 = vsyncadd [#allocation17], 4294934400  ;;  %v306_v0 = vld [vmem:[#allocation2 + $0x3c8] sm:$0xff]  ;;  %v308_v1 = vld [vmem:[#allocation2 + $0x3d8] sm:$0xff] }
  0x85   :  { %v305_v2 = vld [vmem:[#allocation2 + $0x3c0] sm:$0xff]  ;;  %483 = vmatprep.subr.mxu0 %v306_v0  ;;  %554 = vmatprep.subr.mxu1 %v308_v1  ;;  %v307_v3 = vld [vmem:[#allocation2 + $0x3d0] sm:$0xff]  ;;  %v298_v4 = vld [vmem:[#allocation2 + $0x388] sm:$0xff] }
  0x86   :  { %v300_v5 = vld [vmem:[#allocation2 + $0x398] sm:$0xff]  ;;  %484 = vmatpush1.msra.mxu0 %v305_v2  ;;  %555 = vmatpush1.msra.mxu1 %v307_v3  ;;  %v297_v6 = vld [vmem:[#allocation2 + $0x380] sm:$0xff]  ;;  %v299_v7 = vld [vmem:[#allocation2 + $0x390] sm:$0xff] }
  0x87   :  { %v290_v8 = vld [vmem:[#allocation2 + $0x348] sm:$0xff]  ;;  %485 = vmatprep.subr.mxu0 %v298_v4  ;;  %556 = vmatprep.subr.mxu1 %v300_v5  ;;  %v292_v9 = vld [vmem:[#allocation2 + $0x358] sm:$0xff]  ;;  %v289_v10 = vld [vmem:[#allocation2 + $0x340] sm:$0xff] }
  0x88   :  { %v291_v11 = vld [vmem:[#allocation2 + $0x350] sm:$0xff]  ;;  %486 = vmatpush1.msra.mxu0 %v297_v6  ;;  %557 = vmatpush1.msra.mxu1 %v299_v7  ;;  %v282_v12 = vld [vmem:[#allocation2 + $0x308] sm:$0xff]  ;;  %v284_v13 = vld [vmem:[#allocation2 + $0x318] sm:$0xff] }
  0x89   :  { %487 = vmatprep.subr.mxu0 %v290_v8  ;;  %558 = vmatprep.subr.mxu1 %v292_v9  ;;  %v281_v14 = vld [vmem:[#allocation2 + $0x300] sm:$0xff]  ;;  %v283_v15 = vld [vmem:[#allocation2 + $0x310] sm:$0xff]  ;;  %v274_v16 = vld [vmem:[#allocation2 + $0x2c8] sm:$0xff] }
  0x8a   :  { %488 = vmatpush1.msra.mxu0 %v289_v10  ;;  %559 = vmatpush1.msra.mxu1 %v291_v11  ;;  %v276_v17 = vld [vmem:[#allocation2 + $0x2d8] sm:$0xff]  ;;  %v273_v18 = vld [vmem:[#allocation2 + $0x2c0] sm:$0xff]  ;;  %v275_v19 = vld [vmem:[#allocation2 + $0x2d0] sm:$0xff] }
  0x8b   :  { %489 = vmatprep.subr.mxu0 %v282_v12  ;;  %560 = vmatprep.subr.mxu1 %v284_v13  ;;  %v266_v20 = vld [vmem:[#allocation2 + $0x288] sm:$0xff]  ;;  %v268_v21 = vld [vmem:[#allocation2 + $0x298] sm:$0xff]  ;;  %v265_v22 = vld [vmem:[#allocation2 + $0x280] sm:$0xff] }
  0x8c   :  { %490 = vmatpush1.msra.mxu0 %v281_v14  ;;  %561 = vmatpush1.msra.mxu1 %v283_v15  ;;  %v267_v23 = vld [vmem:[#allocation2 + $0x290] sm:$0xff]  ;;  %v258_v24 = vld [vmem:[#allocation2 + $0x248] sm:$0xff]  ;;  %v260_v25 = vld [vmem:[#allocation2 + $0x258] sm:$0xff] }
  0x8d   :  { %491 = vmatprep.subr.mxu0 %v274_v16  ;;  %562 = vmatprep.subr.mxu1 %v276_v17  ;;  %v257_v26 = vld [vmem:[#allocation2 + $0x240] sm:$0xff]  ;;  %v259_v27 = vld [vmem:[#allocation2 + $0x250] sm:$0xff]  ;;  %v250_v28 = vld [vmem:[#allocation2 + $0x208] sm:$0xff] }
  0x8e   :  { %492 = vmatpush1.msra.mxu0 %v273_v18  ;;  %563 = vmatpush1.msra.mxu1 %v275_v19  ;;  %v252_v29 = vld [vmem:[#allocation2 + $0x218] sm:$0xff]  ;;  %v249_v30 = vld [vmem:[#allocation2 + $0x200] sm:$0xff]  ;;  %v251_v31 = vld [vmem:[#allocation2 + $0x210] sm:$0xff] }
  0x8f   :  { %493 = vmatprep.subr.mxu0 %v266_v20  ;;  %564 = vmatprep.subr.mxu1 %v268_v21  ;;  %v242_v32 = vld [vmem:[#allocation2 + $0x1c8] sm:$0xff]  ;;  %v244_v33 = vld [vmem:[#allocation2 + $0x1d8] sm:$0xff]  ;;  %v241_v34 = vld [vmem:[#allocation2 + $0x1c0] sm:$0xff] }
  0x90   :  { %494 = vmatpush1.msra.mxu0 %v265_v22  ;;  %565 = vmatpush1.msra.mxu1 %v267_v23  ;;  %v243_v35 = vld [vmem:[#allocation2 + $0x1d0] sm:$0xff]  ;;  %v234_v36 = vld [vmem:[#allocation2 + $0x188] sm:$0xff]  ;;  %v236_v37 = vld [vmem:[#allocation2 + $0x198] sm:$0xff] }
  0x91   :  { %495 = vmatprep.subr.mxu0 %v258_v24  ;;  %566 = vmatprep.subr.mxu1 %v260_v25  ;;  %v233_v38 = vld [vmem:[#allocation2 + $0x180] sm:$0xff]  ;;  %v235_v39 = vld [vmem:[#allocation2 + $0x190] sm:$0xff]  ;;  %v226_v40 = vld [vmem:[#allocation2 + $0x148] sm:$0xff] }
  0x92   :  { %496 = vmatpush1.msra.mxu0 %v257_v26  ;;  %567 = vmatpush1.msra.mxu1 %v259_v27  ;;  %v228_v41 = vld [vmem:[#allocation2 + $0x158] sm:$0xff]  ;;  %v225_v42 = vld [vmem:[#allocation2 + $0x140] sm:$0xff]  ;;  %v227_v43 = vld [vmem:[#allocation2 + $0x150] sm:$0xff] }
  0x93   :  { %497 = vmatprep.subr.mxu0 %v250_v28  ;;  %568 = vmatprep.subr.mxu1 %v252_v29  ;;  %v218_v44 = vld [vmem:[#allocation2 + $0x108] sm:$0xff]  ;;  %v220_v45 = vld [vmem:[#allocation2 + $0x118] sm:$0xff]  ;;  %v217_v46 = vld [vmem:[#allocation2 + $0x100] sm:$0xff] }
  0x94   :  { %498 = vmatpush1.msra.mxu0 %v249_v30  ;;  %569 = vmatpush1.msra.mxu1 %v251_v31  ;;  %v219_v47 = vld [vmem:[#allocation2 + $0x110] sm:$0xff]  ;;  %v210_v48 = vld [vmem:[#allocation2 + $0xc8] sm:$0xff]  ;;  %v212_v49 = vld [vmem:[#allocation2 + $0xd8] sm:$0xff] }
  0x95   :  { %499 = vmatprep.subr.mxu0 %v242_v32  ;;  %570 = vmatprep.subr.mxu1 %v244_v33  ;;  %v209_v50 = vld [vmem:[#allocation2 + $0xc0] sm:$0xff]  ;;  %v211_v51 = vld [vmem:[#allocation2 + $0xd0] sm:$0xff]  ;;  %v202_v52 = vld [vmem:[#allocation2 + $0x88] sm:$0xff] }
  0x96   :  { %500 = vmatpush1.msra.mxu0 %v241_v34  ;;  %571 = vmatpush1.msra.mxu1 %v243_v35  ;;  %v204_v53 = vld [vmem:[#allocation2 + $0x98] sm:$0xff]  ;;  %v201_v54 = vld [vmem:[#allocation2 + $0x80] sm:$0xff]  ;;  %v203_v55 = vld [vmem:[#allocation2 + $0x90] sm:$0xff] }
  0x97   :  { %501 = vmatprep.subr.mxu0 %v234_v36  ;;  %572 = vmatprep.subr.mxu1 %v236_v37  ;;  %v194_v56 = vld [vmem:[#allocation2 + $0x48] sm:$0xff]  ;;  %v196_v57 = vld [vmem:[#allocation2 + $0x58] sm:$0xff]  ;;  %v193_v58 = vld [vmem:[#allocation2 + $0x40] sm:$0xff] }
  0x98   :  { %502 = vmatpush1.msra.mxu0 %v233_v38  ;;  %573 = vmatpush1.msra.mxu1 %v235_v39  ;;  %v195_v59 = vld [vmem:[#allocation2 + $0x50] sm:$0xff]  ;;  %v186_v60 = vld [vmem:[#allocation2 + $0x8] sm:$0xff]  ;;  %v188_v61 = vld [vmem:[#allocation2 + $0x18] sm:$0xff] }
  0x99   :  { %503 = vmatprep.subr.mxu0 %v226_v40  ;;  %574 = vmatprep.subr.mxu1 %v228_v41  ;;  %v185_v62 = vld [vmem:[#allocation2] sm:$0xff]  ;;  %v187_v63 = vld [vmem:[#allocation2 + $0x10] sm:$0xff]  ;;  %v434_v0 = vld [vmem:[#allocation2 + $0x7c8] sm:$0xff] }
  0x9a   :  { %504 = vmatpush1.msra.mxu0 %v225_v42  ;;  %575 = vmatpush1.msra.mxu1 %v227_v43  ;;  %v436_v1 = vld [vmem:[#allocation2 + $0x7d8] sm:$0xff]  ;;  %v433_v2 = vld [vmem:[#allocation2 + $0x7c0] sm:$0xff]  ;;  %v435_v3 = vld [vmem:[#allocation2 + $0x7d0] sm:$0xff] }
  0x9b   :  { %505 = vmatprep.subr.mxu0 %v218_v44  ;;  %576 = vmatprep.subr.mxu1 %v220_v45  ;;  %v426_v4 = vld [vmem:[#allocation2 + $0x788] sm:$0xff]  ;;  %v428_v5 = vld [vmem:[#allocation2 + $0x798] sm:$0xff]  ;;  %v425_v6 = vld [vmem:[#allocation2 + $0x780] sm:$0xff] }
  0x9c   :  { %506 = vmatpush1.msra.mxu0 %v217_v46  ;;  %577 = vmatpush1.msra.mxu1 %v219_v47  ;;  %v427_v7 = vld [vmem:[#allocation2 + $0x790] sm:$0xff]  ;;  %v418_v8 = vld [vmem:[#allocation2 + $0x748] sm:$0xff]  ;;  %v420_v9 = vld [vmem:[#allocation2 + $0x758] sm:$0xff] }
  0x9d   :  { %507 = vmatprep.subr.mxu0 %v210_v48  ;;  %578 = vmatprep.subr.mxu1 %v212_v49  ;;  %v417_v10 = vld [vmem:[#allocation2 + $0x740] sm:$0xff]  ;;  %v419_v11 = vld [vmem:[#allocation2 + $0x750] sm:$0xff]  ;;  %v410_v12 = vld [vmem:[#allocation2 + $0x708] sm:$0xff] }
  0x9e   :  { %508 = vmatpush1.msra.mxu0 %v209_v50  ;;  %579 = vmatpush1.msra.mxu1 %v211_v51  ;;  %v412_v13 = vld [vmem:[#allocation2 + $0x718] sm:$0xff]  ;;  %v409_v14 = vld [vmem:[#allocation2 + $0x700] sm:$0xff]  ;;  %v411_v15 = vld [vmem:[#allocation2 + $0x710] sm:$0xff] }
  0x9f   :  { %509 = vmatprep.subr.mxu0 %v202_v52  ;;  %580 = vmatprep.subr.mxu1 %v204_v53  ;;  %v402_v16 = vld [vmem:[#allocation2 + $0x6c8] sm:$0xff]  ;;  %v404_v17 = vld [vmem:[#allocation2 + $0x6d8] sm:$0xff]  ;;  %v401_v18 = vld [vmem:[#allocation2 + $0x6c0] sm:$0xff] }
  0xa0   :  { %510 = vmatpush1.msra.mxu0 %v201_v54  ;;  %581 = vmatpush1.msra.mxu1 %v203_v55  ;;  %v403_v19 = vld [vmem:[#allocation2 + $0x6d0] sm:$0xff]  ;;  %v394_v20 = vld [vmem:[#allocation2 + $0x688] sm:$0xff]  ;;  %v396_v21 = vld [vmem:[#allocation2 + $0x698] sm:$0xff] }
  0xa1   :  { %511 = vmatprep.subr.mxu0 %v194_v56  ;;  %582 = vmatprep.subr.mxu1 %v196_v57  ;;  %v393_v22 = vld [vmem:[#allocation2 + $0x680] sm:$0xff]  ;;  %v395_v23 = vld [vmem:[#allocation2 + $0x690] sm:$0xff]  ;;  %v386_v24 = vld [vmem:[#allocation2 + $0x648] sm:$0xff] }
  0xa2   :  { %512 = vmatpush1.msra.mxu0 %v193_v58  ;;  %583 = vmatpush1.msra.mxu1 %v195_v59  ;;  %v388_v25 = vld [vmem:[#allocation2 + $0x658] sm:$0xff]  ;;  %v385_v26 = vld [vmem:[#allocation2 + $0x640] sm:$0xff]  ;;  %v387_v27 = vld [vmem:[#allocation2 + $0x650] sm:$0xff] }
  0xa3   :  { %513 = vmatprep.subr.mxu0 %v186_v60  ;;  %584 = vmatprep.subr.mxu1 %v188_v61  ;;  %v378_v28 = vld [vmem:[#allocation2 + $0x608] sm:$0xff]  ;;  %v380_v29 = vld [vmem:[#allocation2 + $0x618] sm:$0xff]  ;;  %v377_v30 = vld [vmem:[#allocation2 + $0x600] sm:$0xff] }
  0xa4   :  { %514 = vmatpush1.msra.mxu0 %v185_v62  ;;  %585 = vmatpush1.msra.mxu1 %v187_v63  ;;  %v379_v31 = vld [vmem:[#allocation2 + $0x610] sm:$0xff]  ;;  %v370_v32 = vld [vmem:[#allocation2 + $0x5c8] sm:$0xff]  ;;  %v372_v33 = vld [vmem:[#allocation2 + $0x5d8] sm:$0xff] }
  0xa5   :  { %515 = vmatprep.subr.mxu0 %v434_v0  ;;  %586 = vmatprep.subr.mxu1 %v436_v1  ;;  %v369_v34 = vld [vmem:[#allocation2 + $0x5c0] sm:$0xff]  ;;  %v371_v35 = vld [vmem:[#allocation2 + $0x5d0] sm:$0xff]  ;;  %v362_v36 = vld [vmem:[#allocation2 + $0x588] sm:$0xff] }
  0xa6   :  { %516 = vmatpush2.msra.mxu0 %v433_v2  ;;  %587 = vmatpush2.msra.mxu1 %v435_v3  ;;  %v364_v37 = vld [vmem:[#allocation2 + $0x598] sm:$0xff]  ;;  %v361_v38 = vld [vmem:[#allocation2 + $0x580] sm:$0xff]  ;;  %v363_v39 = vld [vmem:[#allocation2 + $0x590] sm:$0xff] }
  0xa7   :  { %517 = vmatprep.subr.mxu0 %v426_v4  ;;  %588 = vmatprep.subr.mxu1 %v428_v5  ;;  %v354_v40 = vld [vmem:[#allocation2 + $0x548] sm:$0xff]  ;;  %v356_v41 = vld [vmem:[#allocation2 + $0x558] sm:$0xff]  ;;  %v353_v42 = vld [vmem:[#allocation2 + $0x540] sm:$0xff] }
  0xa8   :  { %518 = vmatpush2.msra.mxu0 %v425_v6  ;;  %589 = vmatpush2.msra.mxu1 %v427_v7  ;;  %v355_v43 = vld [vmem:[#allocation2 + $0x550] sm:$0xff]  ;;  %v346_v44 = vld [vmem:[#allocation2 + $0x508] sm:$0xff]  ;;  %v348_v45 = vld [vmem:[#allocation2 + $0x518] sm:$0xff] }
  0xa9   :  { %519 = vmatprep.subr.mxu0 %v418_v8  ;;  %590 = vmatprep.subr.mxu1 %v420_v9  ;;  %v345_v46 = vld [vmem:[#allocation2 + $0x500] sm:$0xff]  ;;  %v347_v47 = vld [vmem:[#allocation2 + $0x510] sm:$0xff]  ;;  %v338_v48 = vld [vmem:[#allocation2 + $0x4c8] sm:$0xff] }
  0xaa   :  { %520 = vmatpush2.msra.mxu0 %v417_v10  ;;  %591 = vmatpush2.msra.mxu1 %v419_v11  ;;  %v340_v49 = vld [vmem:[#allocation2 + $0x4d8] sm:$0xff]  ;;  %v337_v50 = vld [vmem:[#allocation2 + $0x4c0] sm:$0xff]  ;;  %v339_v51 = vld [vmem:[#allocation2 + $0x4d0] sm:$0xff] }
  0xab   :  { %521 = vmatprep.subr.mxu0 %v410_v12  ;;  %592 = vmatprep.subr.mxu1 %v412_v13  ;;  %v330_v52 = vld [vmem:[#allocation2 + $0x488] sm:$0xff]  ;;  %v332_v53 = vld [vmem:[#allocation2 + $0x498] sm:$0xff]  ;;  %v329_v54 = vld [vmem:[#allocation2 + $0x480] sm:$0xff] }
  0xac   :  { %522 = vmatpush2.msra.mxu0 %v409_v14  ;;  %593 = vmatpush2.msra.mxu1 %v411_v15  ;;  %v331_v55 = vld [vmem:[#allocation2 + $0x490] sm:$0xff]  ;;  %v322_v56 = vld [vmem:[#allocation2 + $0x448] sm:$0xff]  ;;  %v324_v57 = vld [vmem:[#allocation2 + $0x458] sm:$0xff] }
  0xad   :  { %523 = vmatprep.subr.mxu0 %v402_v16  ;;  %594 = vmatprep.subr.mxu1 %v404_v17  ;;  %v321_v58 = vld [vmem:[#allocation2 + $0x440] sm:$0xff]  ;;  %v323_v59 = vld [vmem:[#allocation2 + $0x450] sm:$0xff]  ;;  %v314_v60 = vld [vmem:[#allocation2 + $0x408] sm:$0xff] }
  0xae   :  { %524 = vmatpush2.msra.mxu0 %v401_v18  ;;  %595 = vmatpush2.msra.mxu1 %v403_v19  ;;  %v316_v61 = vld [vmem:[#allocation2 + $0x418] sm:$0xff]  ;;  %v313_v62 = vld [vmem:[#allocation2 + $0x400] sm:$0xff]  ;;  %v4546_v63 = vld [vmem:[%s4732_s0 + $0x8] sm:$0xff] }
  0xaf   :  { %525 = vmatprep.subr.mxu0 %v394_v20  ;;  %596 = vmatprep.subr.mxu1 %v396_v21  ;;  %v315_v0 = vld [vmem:[#allocation2 + $0x410] sm:$0xff]  ;;  %v4551_v1 = vld [vmem:[%s4732_s0] sm:$0xff]  ;;  %v310_v2 = vld [vmem:[#allocation2 + $0x3e8] sm:$0xff] }
  0xb0   :  { %526 = vmatpush2.msra.mxu0 %v393_v22  ;;  %597 = vmatpush2.msra.mxu1 %v395_v23  ;;  %v312_v3 = vld [vmem:[#allocation2 + $0x3f8] sm:$0xff]  ;;  %v309_v4 = vld [vmem:[#allocation2 + $0x3e0] sm:$0xff]  ;;  %v311_v5 = vld [vmem:[#allocation2 + $0x3f0] sm:$0xff] }
  0xb1   :  { %527 = vmatprep.subr.mxu0 %v386_v24  ;;  %598 = vmatprep.subr.mxu1 %v388_v25  ;;  %v302_v6 = vld [vmem:[#allocation2 + $0x3a8] sm:$0xff]  ;;  %v304_v7 = vld [vmem:[#allocation2 + $0x3b8] sm:$0xff]  ;;  %v301_v8 = vld [vmem:[#allocation2 + $0x3a0] sm:$0xff] }
  0xb2   :  { %528 = vmatpush2.msra.mxu0 %v385_v26  ;;  %599 = vmatpush2.msra.mxu1 %v387_v27  ;;  %v303_v9 = vld [vmem:[#allocation2 + $0x3b0] sm:$0xff]  ;;  %v294_v10 = vld [vmem:[#allocation2 + $0x368] sm:$0xff]  ;;  %v296_v11 = vld [vmem:[#allocation2 + $0x378] sm:$0xff] }
  0xb3   :  { %529 = vmatprep.subr.mxu0 %v378_v28  ;;  %600 = vmatprep.subr.mxu1 %v380_v29  ;;  %v293_v12 = vld [vmem:[#allocation2 + $0x360] sm:$0xff]  ;;  %v295_v13 = vld [vmem:[#allocation2 + $0x370] sm:$0xff]  ;;  %v286_v14 = vld [vmem:[#allocation2 + $0x328] sm:$0xff] }
  0xb4   :  { %530 = vmatpush2.msra.mxu0 %v377_v30  ;;  %601 = vmatpush2.msra.mxu1 %v379_v31  ;;  %v288_v15 = vld [vmem:[#allocation2 + $0x338] sm:$0xff]  ;;  %v285_v16 = vld [vmem:[#allocation2 + $0x320] sm:$0xff]  ;;  %v287_v17 = vld [vmem:[#allocation2 + $0x330] sm:$0xff] }
  0xb5   :  { %531 = vmatprep.subr.mxu0 %v370_v32  ;;  %602 = vmatprep.subr.mxu1 %v372_v33  ;;  %v278_v18 = vld [vmem:[#allocation2 + $0x2e8] sm:$0xff]  ;;  %v280_v19 = vld [vmem:[#allocation2 + $0x2f8] sm:$0xff]  ;;  %v277_v20 = vld [vmem:[#allocation2 + $0x2e0] sm:$0xff] }
  0xb6   :  { %532 = vmatpush2.msra.mxu0 %v369_v34  ;;  %603 = vmatpush2.msra.mxu1 %v371_v35  ;;  %v279_v21 = vld [vmem:[#allocation2 + $0x2f0] sm:$0xff]  ;;  %v270_v22 = vld [vmem:[#allocation2 + $0x2a8] sm:$0xff]  ;;  %v272_v23 = vld [vmem:[#allocation2 + $0x2b8] sm:$0xff] }
  0xb7   :  { %533 = vmatprep.subr.mxu0 %v362_v36  ;;  %604 = vmatprep.subr.mxu1 %v364_v37  ;;  %v269_v24 = vld [vmem:[#allocation2 + $0x2a0] sm:$0xff]  ;;  %v271_v25 = vld [vmem:[#allocation2 + $0x2b0] sm:$0xff]  ;;  %v262_v26 = vld [vmem:[#allocation2 + $0x268] sm:$0xff] }
  0xb8   :  { %534 = vmatpush2.msra.mxu0 %v361_v38  ;;  %605 = vmatpush2.msra.mxu1 %v363_v39  ;;  %v264_v27 = vld [vmem:[#allocation2 + $0x278] sm:$0xff]  ;;  %v261_v28 = vld [vmem:[#allocation2 + $0x260] sm:$0xff]  ;;  %v263_v29 = vld [vmem:[#allocation2 + $0x270] sm:$0xff] }
  0xb9   :  { %535 = vmatprep.subr.mxu0 %v354_v40  ;;  %606 = vmatprep.subr.mxu1 %v356_v41  ;;  %v254_v30 = vld [vmem:[#allocation2 + $0x228] sm:$0xff]  ;;  %v256_v31 = vld [vmem:[#allocation2 + $0x238] sm:$0xff]  ;;  %v253_v32 = vld [vmem:[#allocation2 + $0x220] sm:$0xff] }
  0xba   :  { %536 = vmatpush2.msra.mxu0 %v353_v42  ;;  %607 = vmatpush2.msra.mxu1 %v355_v43  ;;  %v255_v33 = vld [vmem:[#allocation2 + $0x230] sm:$0xff]  ;;  %v246_v34 = vld [vmem:[#allocation2 + $0x1e8] sm:$0xff]  ;;  %v248_v35 = vld [vmem:[#allocation2 + $0x1f8] sm:$0xff] }
  0xbb   :  { %537 = vmatprep.subr.mxu0 %v346_v44  ;;  %608 = vmatprep.subr.mxu1 %v348_v45  ;;  %v245_v36 = vld [vmem:[#allocation2 + $0x1e0] sm:$0xff]  ;;  %v247_v37 = vld [vmem:[#allocation2 + $0x1f0] sm:$0xff]  ;;  %v238_v38 = vld [vmem:[#allocation2 + $0x1a8] sm:$0xff] }
  0xbc   :  { %538 = vmatpush2.msra.mxu0 %v345_v46  ;;  %609 = vmatpush2.msra.mxu1 %v347_v47  ;;  %v240_v39 = vld [vmem:[#allocation2 + $0x1b8] sm:$0xff]  ;;  %v237_v40 = vld [vmem:[#allocation2 + $0x1a0] sm:$0xff]  ;;  %v239_v41 = vld [vmem:[#allocation2 + $0x1b0] sm:$0xff] }
  0xbd   :  { %539 = vmatprep.subr.mxu0 %v338_v48  ;;  %610 = vmatprep.subr.mxu1 %v340_v49  ;;  %v230_v42 = vld [vmem:[#allocation2 + $0x168] sm:$0xff]  ;;  %v232_v43 = vld [vmem:[#allocation2 + $0x178] sm:$0xff]  ;;  %v229_v44 = vld [vmem:[#allocation2 + $0x160] sm:$0xff] }
  0xbe   :  { %540 = vmatpush2.msra.mxu0 %v337_v50  ;;  %611 = vmatpush2.msra.mxu1 %v339_v51  ;;  %v231_v45 = vld [vmem:[#allocation2 + $0x170] sm:$0xff]  ;;  %v222_v46 = vld [vmem:[#allocation2 + $0x128] sm:$0xff]  ;;  %v224_v47 = vld [vmem:[#allocation2 + $0x138] sm:$0xff] }
  0xbf   :  { %541 = vmatprep.subr.mxu0 %v330_v52  ;;  %612 = vmatprep.subr.mxu1 %v332_v53  ;;  %v221_v48 = vld [vmem:[#allocation2 + $0x120] sm:$0xff]  ;;  %v223_v49 = vld [vmem:[#allocation2 + $0x130] sm:$0xff]  ;;  %v214_v50 = vld [vmem:[#allocation2 + $0xe8] sm:$0xff] }
  0xc0   :  { %542 = vmatpush2.msra.mxu0 %v329_v54  ;;  %613 = vmatpush2.msra.mxu1 %v331_v55  ;;  %v216_v51 = vld [vmem:[#allocation2 + $0xf8] sm:$0xff]  ;;  %v213_v52 = vld [vmem:[#allocation2 + $0xe0] sm:$0xff]  ;;  %v215_v53 = vld [vmem:[#allocation2 + $0xf0] sm:$0xff] }
  0xc1   :  { %543 = vmatprep.subr.mxu0 %v322_v56  ;;  %614 = vmatprep.subr.mxu1 %v324_v57  ;;  %v206_v54 = vld [vmem:[#allocation2 + $0xa8] sm:$0xff]  ;;  %v208_v55 = vld [vmem:[#allocation2 + $0xb8] sm:$0xff]  ;;  %v205_v56 = vld [vmem:[#allocation2 + $0xa0] sm:$0xff] }
  0xc2   :  { %544 = vmatpush2.msra.mxu0 %v321_v58  ;;  %615 = vmatpush2.msra.mxu1 %v323_v59  ;;  %v207_v57 = vld [vmem:[#allocation2 + $0xb0] sm:$0xff]  ;;  %v198_v58 = vld [vmem:[#allocation2 + $0x68] sm:$0xff]  ;;  %v200_v59 = vld [vmem:[#allocation2 + $0x78] sm:$0xff] }
  0xc3   :  { %545 = vmatprep.subr.mxu0 %v314_v60  ;;  %616 = vmatprep.subr.mxu1 %v316_v61  ;;  %v197_v60 = vld [vmem:[#allocation2 + $0x60] sm:$0xff]  ;;  %v199_v61 = vld [vmem:[#allocation2 + $0x70] sm:$0xff] }
  0xc4   :  { %546 = vmatpush2.msra.mxu0 %v313_v62  ;;  %547 = vmatprep.mubr.f32.mxu0 %v4546_v63  ;;  %v190_v62 = vld [vmem:[#allocation2 + $0x28] sm:$0xff] }
  0xc5   :  { %617 = vmatpush2.msra.mxu1 %v315_v0  ;;  %618 = vmatprep.mubr.f32.mxu1 %v4546_v63  ;;  %v192_v0 = vld [vmem:[#allocation2 + $0x38] sm:$0xff] }
  0xc6   :  { %548 = vmatmul.mubr.f32.vlgmr.msra.gmra.mxu0 %v4551_v1  ;;  %619 = vmatmul.mubr.f32.vlgmr.msra.gmra.mxu1 %v4551_v1 }
  0xc7   :  { %625 = vmatprep.subr.mxu0 %v310_v2  ;;  %696 = vmatprep.subr.mxu1 %v312_v3  ;;  %v189_v2 = vld [vmem:[#allocation2 + $0x20] sm:$0xff]  ;;  %v191_v3 = vld [vmem:[#allocation2 + $0x30] sm:$0xff] }
  0xc8   :  { %626 = vmatpush1.msra.mxu0 %v309_v4  ;;  %697 = vmatpush1.msra.mxu1 %v311_v5  ;;  %v438_v4 = vld [vmem:[#allocation2 + $0x7e8] sm:$0xff]  ;;  %v440_v5 = vld [vmem:[#allocation2 + $0x7f8] sm:$0xff] }
  0xc9   :  { %627 = vmatprep.subr.mxu0 %v302_v6  ;;  %698 = vmatprep.subr.mxu1 %v304_v7  ;;  %v437_v6 = vld [vmem:[#allocation2 + $0x7e0] sm:$0xff]  ;;  %v439_v7 = vld [vmem:[#allocation2 + $0x7f0] sm:$0xff] }
  0xca   :  { %628 = vmatpush1.msra.mxu0 %v301_v8  ;;  %699 = vmatpush1.msra.mxu1 %v303_v9  ;;  %v430_v8 = vld [vmem:[#allocation2 + $0x7a8] sm:$0xff]  ;;  %v432_v9 = vld [vmem:[#allocation2 + $0x7b8] sm:$0xff] }
  0xcb   :  { %629 = vmatprep.subr.mxu0 %v294_v10  ;;  %700 = vmatprep.subr.mxu1 %v296_v11  ;;  %v429_v10 = vld [vmem:[#allocation2 + $0x7a0] sm:$0xff]  ;;  %v431_v11 = vld [vmem:[#allocation2 + $0x7b0] sm:$0xff] }
  0xcc   :  { %630 = vmatpush1.msra.mxu0 %v293_v12  ;;  %701 = vmatpush1.msra.mxu1 %v295_v13  ;;  %v422_v12 = vld [vmem:[#allocation2 + $0x768] sm:$0xff]  ;;  %v424_v13 = vld [vmem:[#allocation2 + $0x778] sm:$0xff] }
  0xcd   :  { %631 = vmatprep.subr.mxu0 %v286_v14  ;;  %702 = vmatprep.subr.mxu1 %v288_v15  ;;  %v421_v14 = vld [vmem:[#allocation2 + $0x760] sm:$0xff]  ;;  %v423_v15 = vld [vmem:[#allocation2 + $0x770] sm:$0xff] }
  0xce   :  { %632 = vmatpush1.msra.mxu0 %v285_v16  ;;  %703 = vmatpush1.msra.mxu1 %v287_v17  ;;  %v414_v16 = vld [vmem:[#allocation2 + $0x728] sm:$0xff]  ;;  %v416_v17 = vld [vmem:[#allocation2 + $0x738] sm:$0xff] }
  0xcf   :  { %633 = vmatprep.subr.mxu0 %v278_v18  ;;  %704 = vmatprep.subr.mxu1 %v280_v19  ;;  %v413_v18 = vld [vmem:[#allocation2 + $0x720] sm:$0xff]  ;;  %v415_v19 = vld [vmem:[#allocation2 + $0x730] sm:$0xff] }
  0xd0   :  { %634 = vmatpush1.msra.mxu0 %v277_v20  ;;  %705 = vmatpush1.msra.mxu1 %v279_v21  ;;  %v406_v20 = vld [vmem:[#allocation2 + $0x6e8] sm:$0xff]  ;;  %v408_v21 = vld [vmem:[#allocation2 + $0x6f8] sm:$0xff] }
  0xd1   :  { %635 = vmatprep.subr.mxu0 %v270_v22  ;;  %706 = vmatprep.subr.mxu1 %v272_v23  ;;  %v405_v22 = vld [vmem:[#allocation2 + $0x6e0] sm:$0xff]  ;;  %v407_v23 = vld [vmem:[#allocation2 + $0x6f0] sm:$0xff] }
  0xd2   :  { %636 = vmatpush1.msra.mxu0 %v269_v24  ;;  %707 = vmatpush1.msra.mxu1 %v271_v25  ;;  %v398_v24 = vld [vmem:[#allocation2 + $0x6a8] sm:$0xff]  ;;  %v400_v25 = vld [vmem:[#allocation2 + $0x6b8] sm:$0xff] }
  0xd3   :  { %637 = vmatprep.subr.mxu0 %v262_v26  ;;  %708 = vmatprep.subr.mxu1 %v264_v27  ;;  %v397_v26 = vld [vmem:[#allocation2 + $0x6a0] sm:$0xff]  ;;  %v399_v27 = vld [vmem:[#allocation2 + $0x6b0] sm:$0xff] }
  0xd4   :  { %638 = vmatpush1.msra.mxu0 %v261_v28  ;;  %709 = vmatpush1.msra.mxu1 %v263_v29  ;;  %v390_v28 = vld [vmem:[#allocation2 + $0x668] sm:$0xff]  ;;  %v392_v29 = vld [vmem:[#allocation2 + $0x678] sm:$0xff] }
  0xd5   :  { %639 = vmatprep.subr.mxu0 %v254_v30  ;;  %710 = vmatprep.subr.mxu1 %v256_v31  ;;  %v389_v30 = vld [vmem:[#allocation2 + $0x660] sm:$0xff]  ;;  %v391_v31 = vld [vmem:[#allocation2 + $0x670] sm:$0xff] }
  0xd6   :  { %640 = vmatpush1.msra.mxu0 %v253_v32  ;;  %711 = vmatpush1.msra.mxu1 %v255_v33  ;;  %v382_v32 = vld [vmem:[#allocation2 + $0x628] sm:$0xff]  ;;  %v384_v33 = vld [vmem:[#allocation2 + $0x638] sm:$0xff] }
  0xd7   :  { %641 = vmatprep.subr.mxu0 %v246_v34  ;;  %712 = vmatprep.subr.mxu1 %v248_v35  ;;  %v381_v34 = vld [vmem:[#allocation2 + $0x620] sm:$0xff]  ;;  %v383_v35 = vld [vmem:[#allocation2 + $0x630] sm:$0xff] }
  0xd8   :  { %642 = vmatpush1.msra.mxu0 %v245_v36  ;;  %713 = vmatpush1.msra.mxu1 %v247_v37  ;;  %v374_v36 = vld [vmem:[#allocation2 + $0x5e8] sm:$0xff]  ;;  %v376_v37 = vld [vmem:[#allocation2 + $0x5f8] sm:$0xff] }
  0xd9   :  { %643 = vmatprep.subr.mxu0 %v238_v38  ;;  %714 = vmatprep.subr.mxu1 %v240_v39  ;;  %v373_v38 = vld [vmem:[#allocation2 + $0x5e0] sm:$0xff]  ;;  %v375_v39 = vld [vmem:[#allocation2 + $0x5f0] sm:$0xff] }
  0xda   :  { %644 = vmatpush1.msra.mxu0 %v237_v40  ;;  %715 = vmatpush1.msra.mxu1 %v239_v41  ;;  %v366_v40 = vld [vmem:[#allocation2 + $0x5a8] sm:$0xff]  ;;  %v368_v41 = vld [vmem:[#allocation2 + $0x5b8] sm:$0xff] }
  0xdb   :  { %645 = vmatprep.subr.mxu0 %v230_v42  ;;  %716 = vmatprep.subr.mxu1 %v232_v43  ;;  %v365_v42 = vld [vmem:[#allocation2 + $0x5a0] sm:$0xff]  ;;  %v367_v43 = vld [vmem:[#allocation2 + $0x5b0] sm:$0xff] }
  0xdc   :  { %646 = vmatpush1.msra.mxu0 %v229_v44  ;;  %717 = vmatpush1.msra.mxu1 %v231_v45  ;;  %v358_v44 = vld [vmem:[#allocation2 + $0x568] sm:$0xff]  ;;  %v360_v45 = vld [vmem:[#allocation2 + $0x578] sm:$0xff] }
  0xdd   :  { %647 = vmatprep.subr.mxu0 %v222_v46  ;;  %718 = vmatprep.subr.mxu1 %v224_v47  ;;  %v357_v46 = vld [vmem:[#allocation2 + $0x560] sm:$0xff]  ;;  %v359_v47 = vld [vmem:[#allocation2 + $0x570] sm:$0xff] }
  0xde   :  { %648 = vmatpush1.msra.mxu0 %v221_v48  ;;  %719 = vmatpush1.msra.mxu1 %v223_v49  ;;  %v350_v48 = vld [vmem:[#allocation2 + $0x528] sm:$0xff]  ;;  %v352_v49 = vld [vmem:[#allocation2 + $0x538] sm:$0xff] }
  0xdf   :  { %649 = vmatprep.subr.mxu0 %v214_v50  ;;  %720 = vmatprep.subr.mxu1 %v216_v51  ;;  %v349_v50 = vld [vmem:[#allocation2 + $0x520] sm:$0xff]  ;;  %v351_v51 = vld [vmem:[#allocation2 + $0x530] sm:$0xff] }
  0xe0   :  { %650 = vmatpush1.msra.mxu0 %v213_v52  ;;  %721 = vmatpush1.msra.mxu1 %v215_v53  ;;  %v342_v52 = vld [vmem:[#allocation2 + $0x4e8] sm:$0xff]  ;;  %v344_v53 = vld [vmem:[#allocation2 + $0x4f8] sm:$0xff] }
  0xe1   :  { %651 = vmatprep.subr.mxu0 %v206_v54  ;;  %722 = vmatprep.subr.mxu1 %v208_v55  ;;  %v341_v54 = vld [vmem:[#allocation2 + $0x4e0] sm:$0xff]  ;;  %v343_v55 = vld [vmem:[#allocation2 + $0x4f0] sm:$0xff] }
  0xe2   :  { %652 = vmatpush1.msra.mxu0 %v205_v56  ;;  %723 = vmatpush1.msra.mxu1 %v207_v57  ;;  %v334_v56 = vld [vmem:[#allocation2 + $0x4a8] sm:$0xff]  ;;  %v336_v57 = vld [vmem:[#allocation2 + $0x4b8] sm:$0xff] }
  0xe3   :  { %653 = vmatprep.subr.mxu0 %v198_v58  ;;  %724 = vmatprep.subr.mxu1 %v200_v59  ;;  %v333_v58 = vld [vmem:[#allocation2 + $0x4a0] sm:$0xff]  ;;  %v335_v59 = vld [vmem:[#allocation2 + $0x4b0] sm:$0xff] }
  0xe4   :  { %654 = vmatpush1.msra.mxu0 %v197_v60  ;;  %725 = vmatpush1.msra.mxu1 %v199_v61  ;;  %v326_v60 = vld [vmem:[#allocation2 + $0x468] sm:$0xff]  ;;  %v328_v61 = vld [vmem:[#allocation2 + $0x478] sm:$0xff] }
  0xe5   :  { %655 = vmatprep.subr.mxu0 %v190_v62  ;;  %726 = vmatprep.subr.mxu1 %v192_v0  ;;  %v325_v62 = vld [vmem:[#allocation2 + $0x460] sm:$0xff]  ;;  %v327_v0 = vld [vmem:[#allocation2 + $0x470] sm:$0xff] }
  0xe6   :  { %656 = vmatpush1.msra.mxu0 %v189_v2  ;;  %727 = vmatpush1.msra.mxu1 %v191_v3  ;;  %v318_v2 = vld [vmem:[#allocation2 + $0x428] sm:$0xff]  ;;  %v320_v3 = vld [vmem:[#allocation2 + $0x438] sm:$0xff] }
  0xe7   :  { %657 = vmatprep.subr.mxu0 %v438_v4  ;;  %728 = vmatprep.subr.mxu1 %v440_v5  ;;  %v317_v4 = vld [vmem:[#allocation2 + $0x420] sm:$0xff]  ;;  %v319_v5 = vld [vmem:[#allocation2 + $0x430] sm:$0xff] }
  0xe8   :  { %658 = vmatpush2.msra.mxu0 %v437_v6  ;;  %729 = vmatpush2.msra.mxu1 %v439_v7  ;;  %v836_v6 = vld [vmem:[#allocation6 + $0x1e8] sm:$0xff] }
  0xe9   :  { %659 = vmatprep.subr.mxu0 %v430_v8  ;;  %730 = vmatprep.subr.mxu1 %v432_v9  ;;  %v964_v7 = vld [vmem:[#allocation6 + $0x5e8] sm:$0xff]  ;;  %v835_v8 = vld [vmem:[#allocation6 + $0x1e0] sm:$0xff] }
  0xea   :  { %660 = vmatpush2.msra.mxu0 %v429_v10  ;;  %731 = vmatpush2.msra.mxu1 %v431_v11  ;;  %v963_v9 = vld [vmem:[#allocation6 + $0x5e0] sm:$0xff]  ;;  %v832_v10 = vld [vmem:[#allocation6 + $0x1c8] sm:$0xff] }
  0xeb   :  { %661 = vmatprep.subr.mxu0 %v422_v12  ;;  %732 = vmatprep.subr.mxu1 %v424_v13  ;;  %v960_v11 = vld [vmem:[#allocation6 + $0x5c8] sm:$0xff]  ;;  %v831_v12 = vld [vmem:[#allocation6 + $0x1c0] sm:$0xff] }
  0xec   :  { %662 = vmatpush2.msra.mxu0 %v421_v14  ;;  %733 = vmatpush2.msra.mxu1 %v423_v15  ;;  %v959_v13 = vld [vmem:[#allocation6 + $0x5c0] sm:$0xff]  ;;  %v828_v14 = vld [vmem:[#allocation6 + $0x1a8] sm:$0xff] }
  0xed   :  { %663 = vmatprep.subr.mxu0 %v414_v16  ;;  %734 = vmatprep.subr.mxu1 %v416_v17  ;;  %v956_v15 = vld [vmem:[#allocation6 + $0x5a8] sm:$0xff]  ;;  %v827_v16 = vld [vmem:[#allocation6 + $0x1a0] sm:$0xff] }
  0xee   :  { %664 = vmatpush2.msra.mxu0 %v413_v18  ;;  %735 = vmatpush2.msra.mxu1 %v415_v19  ;;  %v824_v17 = vld [vmem:[#allocation6 + $0x188] sm:$0xff]  ;;  %v951_v19 = vld [vmem:[#allocation6 + $0x580] sm:$0xff] }
  0xef   :  { %665 = vmatprep.subr.mxu0 %v406_v20  ;;  %736 = vmatprep.subr.mxu1 %v408_v21  ;;  %v952_v18 = vld [vmem:[#allocation6 + $0x588] sm:$0xff] }
  0xf0   :  { %666 = vmatpush2.msra.mxu0 %v405_v22  ;;  %737 = vmatpush2.msra.mxu1 %v407_v23  ;;  %v820_v20 = vld [vmem:[#allocation6 + $0x168] sm:$0xff]  ;;  %v819_v22 = vld [vmem:[#allocation6 + $0x160] sm:$0xff] }
  0xf1   :  { %667 = vmatprep.subr.mxu0 %v398_v24  ;;  %738 = vmatprep.subr.mxu1 %v400_v25  ;;  %v948_v21 = vld [vmem:[#allocation6 + $0x568] sm:$0xff]  ;;  %v947_v23 = vld [vmem:[#allocation6 + $0x560] sm:$0xff] }
  0xf2   :  { %668 = vmatpush2.msra.mxu0 %v397_v26  ;;  %739 = vmatpush2.msra.mxu1 %v399_v27  ;;  %v816_v24 = vld [vmem:[#allocation6 + $0x148] sm:$0xff]  ;;  %v815_v26 = vld [vmem:[#allocation6 + $0x140] sm:$0xff] }
  0xf3   :  { %669 = vmatprep.subr.mxu0 %v390_v28  ;;  %740 = vmatprep.subr.mxu1 %v392_v29  ;;  %v944_v25 = vld [vmem:[#allocation6 + $0x548] sm:$0xff]  ;;  %v943_v27 = vld [vmem:[#allocation6 + $0x540] sm:$0xff] }
  0xf4   :  { %670 = vmatpush2.msra.mxu0 %v389_v30  ;;  %741 = vmatpush2.msra.mxu1 %v391_v31  ;;  %v812_v28 = vld [vmem:[#allocation6 + $0x128] sm:$0xff]  ;;  %v811_v30 = vld [vmem:[#allocation6 + $0x120] sm:$0xff] }
  0xf5   :  { %671 = vmatprep.subr.mxu0 %v382_v32  ;;  %742 = vmatprep.subr.mxu1 %v384_v33  ;;  %v940_v29 = vld [vmem:[#allocation6 + $0x528] sm:$0xff]  ;;  %v939_v31 = vld [vmem:[#allocation6 + $0x520] sm:$0xff] }
  0xf6   :  { %672 = vmatpush2.msra.mxu0 %v381_v34  ;;  %743 = vmatpush2.msra.mxu1 %v383_v35  ;;  %v808_v32 = vld [vmem:[#allocation6 + $0x108] sm:$0xff]  ;;  %v807_v34 = vld [vmem:[#allocation6 + $0x100] sm:$0xff] }
  0xf7   :  { %673 = vmatprep.subr.mxu0 %v374_v36  ;;  %744 = vmatprep.subr.mxu1 %v376_v37  ;;  %v936_v33 = vld [vmem:[#allocation6 + $0x508] sm:$0xff]  ;;  %v935_v35 = vld [vmem:[#allocation6 + $0x500] sm:$0xff] }
  0xf8   :  { %674 = vmatpush2.msra.mxu0 %v373_v38  ;;  %745 = vmatpush2.msra.mxu1 %v375_v39  ;;  %v804_v36 = vld [vmem:[#allocation6 + $0xe8] sm:$0xff]  ;;  %v803_v38 = vld [vmem:[#allocation6 + $0xe0] sm:$0xff] }
  0xf9   :  { %675 = vmatprep.subr.mxu0 %v366_v40  ;;  %746 = vmatprep.subr.mxu1 %v368_v41  ;;  %v932_v37 = vld [vmem:[#allocation6 + $0x4e8] sm:$0xff]  ;;  %v931_v39 = vld [vmem:[#allocation6 + $0x4e0] sm:$0xff] }
  0xfa   :  { %676 = vmatpush2.msra.mxu0 %v365_v42  ;;  %747 = vmatpush2.msra.mxu1 %v367_v43  ;;  %v800_v40 = vld [vmem:[#allocation6 + $0xc8] sm:$0xff]  ;;  %v799_v42 = vld [vmem:[#allocation6 + $0xc0] sm:$0xff] }
  0xfb   :  { %677 = vmatprep.subr.mxu0 %v358_v44  ;;  %748 = vmatprep.subr.mxu1 %v360_v45  ;;  %v928_v41 = vld [vmem:[#allocation6 + $0x4c8] sm:$0xff]  ;;  %v927_v43 = vld [vmem:[#allocation6 + $0x4c0] sm:$0xff] }
  0xfc   :  { %678 = vmatpush2.msra.mxu0 %v357_v46  ;;  %749 = vmatpush2.msra.mxu1 %v359_v47  ;;  %v796_v44 = vld [vmem:[#allocation6 + $0xa8] sm:$0xff]  ;;  %v795_v46 = vld [vmem:[#allocation6 + $0xa0] sm:$0xff] }
  0xfd   :  { %679 = vmatprep.subr.mxu0 %v350_v48  ;;  %750 = vmatprep.subr.mxu1 %v352_v49  ;;  %v924_v45 = vld [vmem:[#allocation6 + $0x4a8] sm:$0xff]  ;;  %v923_v47 = vld [vmem:[#allocation6 + $0x4a0] sm:$0xff] }
  0xfe   :  { %680 = vmatpush2.msra.mxu0 %v349_v50  ;;  %751 = vmatpush2.msra.mxu1 %v351_v51  ;;  %v792_v48 = vld [vmem:[#allocation6 + $0x88] sm:$0xff]  ;;  %v791_v50 = vld [vmem:[#allocation6 + $0x80] sm:$0xff] }
  0xff   :  { %681 = vmatprep.subr.mxu0 %v342_v52  ;;  %752 = vmatprep.subr.mxu1 %v344_v53  ;;  %v920_v49 = vld [vmem:[#allocation6 + $0x488] sm:$0xff]  ;;  %v919_v51 = vld [vmem:[#allocation6 + $0x480] sm:$0xff] }
 0x100   :  { %682 = vmatpush2.msra.mxu0 %v341_v54  ;;  %753 = vmatpush2.msra.mxu1 %v343_v55  ;;  %v788_v52 = vld [vmem:[#allocation6 + $0x68] sm:$0xff]  ;;  %v787_v54 = vld [vmem:[#allocation6 + $0x60] sm:$0xff] }
 0x101   :  { %683 = vmatprep.subr.mxu0 %v334_v56  ;;  %754 = vmatprep.subr.mxu1 %v336_v57  ;;  %v916_v53 = vld [vmem:[#allocation6 + $0x468] sm:$0xff]  ;;  %v915_v55 = vld [vmem:[#allocation6 + $0x460] sm:$0xff] }
 0x102   :  { %684 = vmatpush2.msra.mxu0 %v333_v58  ;;  %755 = vmatpush2.msra.mxu1 %v335_v59  ;;  %v784_v56 = vld [vmem:[#allocation6 + $0x48] sm:$0xff]  ;;  %v783_v58 = vld [vmem:[#allocation6 + $0x40] sm:$0xff] }
 0x103   :  { %685 = vmatprep.subr.mxu0 %v326_v60  ;;  %756 = vmatprep.subr.mxu1 %v328_v61  ;;  %v912_v57 = vld [vmem:[#allocation6 + $0x448] sm:$0xff]  ;;  %v911_v59 = vld [vmem:[#allocation6 + $0x440] sm:$0xff] }
 0x104   :  { %686 = vmatpush2.msra.mxu0 %v325_v62  ;;  %757 = vmatpush2.msra.mxu1 %v327_v0  ;;  %v780_v60 = vld [vmem:[#allocation6 + $0x28] sm:$0xff]  ;;  %v779_v62 = vld [vmem:[#allocation6 + $0x20] sm:$0xff] }
 0x105   :  { %687 = vmatprep.subr.mxu0 %v318_v2  ;;  %758 = vmatprep.subr.mxu1 %v320_v3  ;;  %v908_v61 = vld [vmem:[#allocation6 + $0x428] sm:$0xff]  ;;  %v907_v0 = vld [vmem:[#allocation6 + $0x420] sm:$0xff] }
 0x106   :  { %688 = vmatpush2.msra.mxu0 %v317_v4  ;;  %689 = vmatprep.mubr.f32.mxu0 %v4546_v63  ;;  %v776_v2 = vld [vmem:[#allocation6 + $0x8] sm:$0xff]  ;;  %v775_v4 = vld [vmem:[#allocation6] sm:$0xff] }
 0x107   :  { %759 = vmatpush2.msra.mxu1 %v319_v5  ;;  %760 = vmatprep.mubr.f32.mxu1 %v4546_v63  ;;  %v955_v63 = vld [vmem:[#allocation6 + $0x5a0] sm:$0xff]  ;;  %v904_v3 = vld [vmem:[#allocation6 + $0x408] sm:$0xff] }
 0x108   :  { %690 = vmatmul.mubr.f32.vlgmr.msra.gmra.mxu0 %v4551_v1  ;;  %761 = vmatmul.mubr.f32.vlgmr.msra.gmra.mxu1 %v4551_v1  ;;  %v823_v1 = vld [vmem:[#allocation6 + $0x180] sm:$0xff] }
 0x109   :  { %1309 = vmatprep.subr.mxu0 %v836_v6  ;;  %1380 = vmatprep.subr.mxu1 %v964_v7  ;;  %v903_v5 = vld [vmem:[#allocation6 + $0x400] sm:$0xff]  ;;  %v900_v6 = vld [vmem:[#allocation6 + $0x3e8] sm:$0xff] }
 0x10a   :  { %1310 = vmatpush1.msra.mxu0 %v835_v8  ;;  %1381 = vmatpush1.msra.mxu1 %v963_v9  ;;  %v1028_v7 = vld [vmem:[#allocation6 + $0x7e8] sm:$0xff]  ;;  %v899_v8 = vld [vmem:[#allocation6 + $0x3e0] sm:$0xff] }
 0x10b   :  { %1311 = vmatprep.subr.mxu0 %v832_v10  ;;  %1382 = vmatprep.subr.mxu1 %v960_v11  ;;  %v1027_v9 = vld [vmem:[#allocation6 + $0x7e0] sm:$0xff]  ;;  %v896_v10 = vld [vmem:[#allocation6 + $0x3c8] sm:$0xff] }
 0x10c   :  { %1312 = vmatpush1.msra.mxu0 %v831_v12  ;;  %1383 = vmatpush1.msra.mxu1 %v959_v13  ;;  %v1024_v11 = vld [vmem:[#allocation6 + $0x7c8] sm:$0xff]  ;;  %v895_v12 = vld [vmem:[#allocation6 + $0x3c0] sm:$0xff] }
 0x10d   :  { %1313 = vmatprep.subr.mxu0 %v828_v14  ;;  %1384 = vmatprep.subr.mxu1 %v956_v15  ;;  %v1023_v13 = vld [vmem:[#allocation6 + $0x7c0] sm:$0xff]  ;;  %v892_v14 = vld [vmem:[#allocation6 + $0x3a8] sm:$0xff] }
 0x10e   :  { %1314 = vmatpush1.msra.mxu0 %v827_v16  ;;  %1385 = vmatpush1.msra.mxu1 %v955_v63  ;;  %v1020_v15 = vld [vmem:[#allocation6 + $0x7a8] sm:$0xff]  ;;  %v891_v16 = vld [vmem:[#allocation6 + $0x3a0] sm:$0xff] }
 0x10f   :  { %1315 = vmatprep.subr.mxu0 %v824_v17  ;;  %1386 = vmatprep.subr.mxu1 %v952_v18  ;;  %v1019_v63 = vld [vmem:[#allocation6 + $0x7a0] sm:$0xff]  ;;  %v888_v17 = vld [vmem:[#allocation6 + $0x388] sm:$0xff] }
 0x110   :  { %1316 = vmatpush1.msra.mxu0 %v823_v1  ;;  %1387 = vmatpush1.msra.mxu1 %v951_v19  ;;  %v1016_v18 = vld [vmem:[#allocation6 + $0x788] sm:$0xff]  ;;  %v887_v1 = vld [vmem:[#allocation6 + $0x380] sm:$0xff] }
 0x111   :  { %1317 = vmatprep.subr.mxu0 %v820_v20  ;;  %1388 = vmatprep.subr.mxu1 %v948_v21  ;;  %v1015_v19 = vld [vmem:[#allocation6 + $0x780] sm:$0xff]  ;;  %v884_v20 = vld [vmem:[#allocation6 + $0x368] sm:$0xff] }
 0x112   :  { %1318 = vmatpush1.msra.mxu0 %v819_v22  ;;  %1389 = vmatpush1.msra.mxu1 %v947_v23  ;;  %v1012_v21 = vld [vmem:[#allocation6 + $0x768] sm:$0xff]  ;;  %v883_v22 = vld [vmem:[#allocation6 + $0x360] sm:$0xff] }
 0x113   :  { %1319 = vmatprep.subr.mxu0 %v816_v24  ;;  %1390 = vmatprep.subr.mxu1 %v944_v25  ;;  %v1011_v23 = vld [vmem:[#allocation6 + $0x760] sm:$0xff]  ;;  %v880_v24 = vld [vmem:[#allocation6 + $0x348] sm:$0xff] }
 0x114   :  { %1320 = vmatpush1.msra.mxu0 %v815_v26  ;;  %1391 = vmatpush1.msra.mxu1 %v943_v27  ;;  %v1008_v25 = vld [vmem:[#allocation6 + $0x748] sm:$0xff]  ;;  %v879_v26 = vld [vmem:[#allocation6 + $0x340] sm:$0xff] }
 0x115   :  { %1321 = vmatprep.subr.mxu0 %v812_v28  ;;  %1392 = vmatprep.subr.mxu1 %v940_v29  ;;  %v1007_v27 = vld [vmem:[#allocation6 + $0x740] sm:$0xff]  ;;  %v876_v28 = vld [vmem:[#allocation6 + $0x328] sm:$0xff] }
 0x116   :  { %1322 = vmatpush1.msra.mxu0 %v811_v30  ;;  %1393 = vmatpush1.msra.mxu1 %v939_v31  ;;  %v1004_v29 = vld [vmem:[#allocation6 + $0x728] sm:$0xff]  ;;  %v875_v30 = vld [vmem:[#allocation6 + $0x320] sm:$0xff] }
 0x117   :  { %1323 = vmatprep.subr.mxu0 %v808_v32  ;;  %1394 = vmatprep.subr.mxu1 %v936_v33  ;;  %v1003_v31 = vld [vmem:[#allocation6 + $0x720] sm:$0xff]  ;;  %v872_v32 = vld [vmem:[#allocation6 + $0x308] sm:$0xff] }
 0x118   :  { %1324 = vmatpush1.msra.mxu0 %v807_v34  ;;  %1395 = vmatpush1.msra.mxu1 %v935_v35  ;;  %v1000_v33 = vld [vmem:[#allocation6 + $0x708] sm:$0xff]  ;;  %v871_v34 = vld [vmem:[#allocation6 + $0x300] sm:$0xff] }
 0x119   :  { %1325 = vmatprep.subr.mxu0 %v804_v36  ;;  %1396 = vmatprep.subr.mxu1 %v932_v37  ;;  %v999_v35 = vld [vmem:[#allocation6 + $0x700] sm:$0xff]  ;;  %v868_v36 = vld [vmem:[#allocation6 + $0x2e8] sm:$0xff] }
 0x11a   :  { %1326 = vmatpush1.msra.mxu0 %v803_v38  ;;  %1397 = vmatpush1.msra.mxu1 %v931_v39  ;;  %v996_v37 = vld [vmem:[#allocation6 + $0x6e8] sm:$0xff]  ;;  %v867_v38 = vld [vmem:[#allocation6 + $0x2e0] sm:$0xff] }
 0x11b   :  { %1327 = vmatprep.subr.mxu0 %v800_v40  ;;  %1398 = vmatprep.subr.mxu1 %v928_v41  ;;  %v995_v39 = vld [vmem:[#allocation6 + $0x6e0] sm:$0xff]  ;;  %v864_v40 = vld [vmem:[#allocation6 + $0x2c8] sm:$0xff] }
 0x11c   :  { %1328 = vmatpush1.msra.mxu0 %v799_v42  ;;  %1399 = vmatpush1.msra.mxu1 %v927_v43  ;;  %v992_v41 = vld [vmem:[#allocation6 + $0x6c8] sm:$0xff]  ;;  %v863_v42 = vld [vmem:[#allocation6 + $0x2c0] sm:$0xff] }
 0x11d   :  { %1329 = vmatprep.subr.mxu0 %v796_v44  ;;  %1400 = vmatprep.subr.mxu1 %v924_v45  ;;  %v991_v43 = vld [vmem:[#allocation6 + $0x6c0] sm:$0xff]  ;;  %v860_v44 = vld [vmem:[#allocation6 + $0x2a8] sm:$0xff] }
 0x11e   :  { %1330 = vmatpush1.msra.mxu0 %v795_v46  ;;  %1401 = vmatpush1.msra.mxu1 %v923_v47  ;;  %v988_v45 = vld [vmem:[#allocation6 + $0x6a8] sm:$0xff]  ;;  %v859_v46 = vld [vmem:[#allocation6 + $0x2a0] sm:$0xff] }
 0x11f   :  { %1331 = vmatprep.subr.mxu0 %v792_v48  ;;  %1402 = vmatprep.subr.mxu1 %v920_v49  ;;  %v987_v47 = vld [vmem:[#allocation6 + $0x6a0] sm:$0xff]  ;;  %v856_v48 = vld [vmem:[#allocation6 + $0x288] sm:$0xff] }
 0x120   :  { %1332 = vmatpush1.msra.mxu0 %v791_v50  ;;  %1403 = vmatpush1.msra.mxu1 %v919_v51  ;;  %v984_v49 = vld [vmem:[#allocation6 + $0x688] sm:$0xff]  ;;  %v855_v50 = vld [vmem:[#allocation6 + $0x280] sm:$0xff] }
 0x121   :  { %1333 = vmatprep.subr.mxu0 %v788_v52  ;;  %1404 = vmatprep.subr.mxu1 %v916_v53  ;;  %v983_v51 = vld [vmem:[#allocation6 + $0x680] sm:$0xff]  ;;  %v852_v52 = vld [vmem:[#allocation6 + $0x268] sm:$0xff] }
 0x122   :  { %1334 = vmatpush1.msra.mxu0 %v787_v54  ;;  %1405 = vmatpush1.msra.mxu1 %v915_v55  ;;  %v980_v53 = vld [vmem:[#allocation6 + $0x668] sm:$0xff]  ;;  %v851_v54 = vld [vmem:[#allocation6 + $0x260] sm:$0xff] }
 0x123   :  { %1335 = vmatprep.subr.mxu0 %v784_v56  ;;  %1406 = vmatprep.subr.mxu1 %v912_v57  ;;  %v979_v55 = vld [vmem:[#allocation6 + $0x660] sm:$0xff]  ;;  %v848_v56 = vld [vmem:[#allocation6 + $0x248] sm:$0xff] }
 0x124   :  { %1336 = vmatpush1.msra.mxu0 %v783_v58  ;;  %1407 = vmatpush1.msra.mxu1 %v911_v59  ;;  %v976_v57 = vld [vmem:[#allocation6 + $0x648] sm:$0xff]  ;;  %v847_v58 = vld [vmem:[#allocation6 + $0x240] sm:$0xff] }
 0x125   :  { %1337 = vmatprep.subr.mxu0 %v780_v60  ;;  %1408 = vmatprep.subr.mxu1 %v908_v61  ;;  %v975_v59 = vld [vmem:[#allocation6 + $0x640] sm:$0xff]  ;;  %v844_v60 = vld [vmem:[#allocation6 + $0x228] sm:$0xff] }
 0x126   :  { %1338 = vmatpush1.msra.mxu0 %v779_v62  ;;  %1409 = vmatpush1.msra.mxu1 %v907_v0  ;;  %v972_v61 = vld [vmem:[#allocation6 + $0x628] sm:$0xff]  ;;  %v843_v62 = vld [vmem:[#allocation6 + $0x220] sm:$0xff] }
 0x127   :  { %1339 = vmatprep.subr.mxu0 %v776_v2  ;;  %1410 = vmatprep.subr.mxu1 %v904_v3  ;;  %v971_v0 = vld [vmem:[#allocation6 + $0x620] sm:$0xff]  ;;  %v840_v2 = vld [vmem:[#allocation6 + $0x208] sm:$0xff] }
 0x128   :  { %1340 = vmatpush1.msra.mxu0 %v775_v4  ;;  %1411 = vmatpush1.msra.mxu1 %v903_v5  ;;  %v968_v3 = vld [vmem:[#allocation6 + $0x608] sm:$0xff]  ;;  %v839_v4 = vld [vmem:[#allocation6 + $0x200] sm:$0xff] }
 0x129   :  { %1341 = vmatprep.subr.mxu0 %v900_v6  ;;  %1412 = vmatprep.subr.mxu1 %v1028_v7  ;;  %v967_v5 = vld [vmem:[#allocation6 + $0x600] sm:$0xff]  ;;  %v1092_v6 = vld [vmem:[#allocation6 + $0x9e8] sm:$0xff] }
 0x12a   :  { %1342 = vmatpush2.msra.mxu0 %v899_v8  ;;  %1413 = vmatpush2.msra.mxu1 %v1027_v9  ;;  %v1220_v7 = vld [vmem:[#allocation6 + $0xde8] sm:$0xff]  ;;  %v443_v8 = vlaneseq }
 0x12b   :  { %1343 = vmatprep.subr.mxu0 %v896_v10  ;;  %1414 = vmatprep.subr.mxu1 %v1024_v11 }
 0x12c   :  { %1344 = vmatpush2.msra.mxu0 %v895_v12  ;;  %1415 = vmatpush2.msra.mxu1 %v1023_v13  ;;  %v4561_v9 = vshrl.u32 %v443_v8, 7  ;;  %v4569_v12 = vld [vmem:[#allocation4] sm:$0xff]  ;;  %v1179_v8 = vld [vmem:[#allocation6 + $0xca0] sm:$0xff] }
 0x12d   :  { %1345 = vmatprep.subr.mxu0 %v892_v14  ;;  %1416 = vmatprep.subr.mxu1 %v1020_v15 }
 0x12e   :  { %1346 = vmatpush2.msra.mxu0 %v891_v16  ;;  %1417 = vmatpush2.msra.mxu1 %v1019_v63  ;;  %v4564_v10 = vsub.s32 2, %v4561_v9  ;;  %v4567_v11 = vsub.s32 0, %v4561_v9  ;;  %v4572_v13 = vsub.s32 1, %v4561_v9  ;;  %v4575_v14 = vsub.s32 3, %v4561_v9 }
 0x12f   :  { %1347 = vmatprep.subr.mxu0 %v888_v17  ;;  %1418 = vmatprep.subr.mxu1 %v1016_v18 }
 0x130   :  { %1348 = vmatpush2.msra.mxu0 %v887_v1  ;;  %1419 = vmatpush2.msra.mxu1 %v1015_v19  ;;  %v454_v15 = vrot.slane %v4569_v12, %v4564_v10  ;;  %v446_v16 = vrot.slane %v4569_v12, %v4567_v11  ;;  %v450_v63 = vrot.slane %v4569_v12, %v4572_v13 }
 0x131   :  { %1349 = vmatprep.subr.mxu0 %v884_v20  ;;  %1420 = vmatprep.subr.mxu1 %v1012_v21  ;;  %v458_v17 = vrot.slane %v4569_v12, %v4575_v14 }
 0x132   :  { %1350 = vmatpush2.msra.mxu0 %v883_v22  ;;  %1421 = vmatpush2.msra.mxu1 %v1011_v23 }
 0x133   :  { %1351 = vmatprep.subr.mxu0 %v880_v24  ;;  %1422 = vmatprep.subr.mxu1 %v1008_v25 }
 0x134   :  { %1352 = vmatpush2.msra.mxu0 %v879_v26  ;;  %1423 = vmatpush2.msra.mxu1 %v1007_v27 }
 0x135   :  { %1353 = vmatprep.subr.mxu0 %v876_v28  ;;  %1424 = vmatprep.subr.mxu1 %v1004_v29  ;;  %v1091_v29 = vld [vmem:[#allocation6 + $0x9e0] sm:$0xff] }
 0x136   :  { %1354 = vmatpush2.msra.mxu0 %v875_v30  ;;  %1425 = vmatpush2.msra.mxu1 %v1003_v31  ;;  %v1219_v30 = vld [vmem:[#allocation6 + $0xde0] sm:$0xff]  ;;  %v1088_v31 = vld [vmem:[#allocation6 + $0x9c8] sm:$0xff] }
 0x137   :  { %1355 = vmatprep.subr.mxu0 %v872_v32  ;;  %1426 = vmatprep.subr.mxu1 %v1000_v33  ;;  %v1216_v32 = vld [vmem:[#allocation6 + $0xdc8] sm:$0xff]  ;;  %v1087_v33 = vld [vmem:[#allocation6 + $0x9c0] sm:$0xff] }
 0x138   :  { %1356 = vmatpush2.msra.mxu0 %v871_v34  ;;  %1427 = vmatpush2.msra.mxu1 %v999_v35  ;;  %v1215_v34 = vld [vmem:[#allocation6 + $0xdc0] sm:$0xff]  ;;  %v1084_v35 = vld [vmem:[#allocation6 + $0x9a8] sm:$0xff] }
 0x139   :  { %1357 = vmatprep.subr.mxu0 %v868_v36  ;;  %1428 = vmatprep.subr.mxu1 %v996_v37  ;;  %v1212_v36 = vld [vmem:[#allocation6 + $0xda8] sm:$0xff]  ;;  %v1083_v37 = vld [vmem:[#allocation6 + $0x9a0] sm:$0xff] }
 0x13a   :  { %1358 = vmatpush2.msra.mxu0 %v867_v38  ;;  %1429 = vmatpush2.msra.mxu1 %v995_v39  ;;  %v1211_v38 = vld [vmem:[#allocation6 + $0xda0] sm:$0xff]  ;;  %v1080_v39 = vld [vmem:[#allocation6 + $0x988] sm:$0xff] }
 0x13b   :  { %1359 = vmatprep.subr.mxu0 %v864_v40  ;;  %1430 = vmatprep.subr.mxu1 %v992_v41  ;;  %v1208_v40 = vld [vmem:[#allocation6 + $0xd88] sm:$0xff]  ;;  %v1079_v41 = vld [vmem:[#allocation6 + $0x980] sm:$0xff] }
 0x13c   :  { %1360 = vmatpush2.msra.mxu0 %v863_v42  ;;  %1431 = vmatpush2.msra.mxu1 %v991_v43  ;;  %v1207_v42 = vld [vmem:[#allocation6 + $0xd80] sm:$0xff]  ;;  %v1076_v43 = vld [vmem:[#allocation6 + $0x968] sm:$0xff] }
 0x13d   :  { %1361 = vmatprep.subr.mxu0 %v860_v44  ;;  %1432 = vmatprep.subr.mxu1 %v988_v45  ;;  %v1204_v44 = vld [vmem:[#allocation6 + $0xd68] sm:$0xff]  ;;  %v1075_v45 = vld [vmem:[#allocation6 + $0x960] sm:$0xff] }
 0x13e   :  { %1362 = vmatpush2.msra.mxu0 %v859_v46  ;;  %1433 = vmatpush2.msra.mxu1 %v987_v47  ;;  %v1203_v46 = vld [vmem:[#allocation6 + $0xd60] sm:$0xff]  ;;  %v1072_v47 = vld [vmem:[#allocation6 + $0x948] sm:$0xff] }
 0x13f   :  { %1363 = vmatprep.subr.mxu0 %v856_v48  ;;  %1434 = vmatprep.subr.mxu1 %v984_v49  ;;  %v1200_v48 = vld [vmem:[#allocation6 + $0xd48] sm:$0xff]  ;;  %v1071_v49 = vld [vmem:[#allocation6 + $0x940] sm:$0xff] }
 0x140   :  { %1364 = vmatpush2.msra.mxu0 %v855_v50  ;;  %1435 = vmatpush2.msra.mxu1 %v983_v51  ;;  %v1199_v50 = vld [vmem:[#allocation6 + $0xd40] sm:$0xff]  ;;  %v1068_v51 = vld [vmem:[#allocation6 + $0x928] sm:$0xff] }
 0x141   :  { %1365 = vmatprep.subr.mxu0 %v852_v52  ;;  %1436 = vmatprep.subr.mxu1 %v980_v53  ;;  %v1196_v52 = vld [vmem:[#allocation6 + $0xd28] sm:$0xff]  ;;  %v1067_v53 = vld [vmem:[#allocation6 + $0x920] sm:$0xff] }
 0x142   :  { %1366 = vmatpush2.msra.mxu0 %v851_v54  ;;  %1437 = vmatpush2.msra.mxu1 %v979_v55  ;;  %v1195_v54 = vld [vmem:[#allocation6 + $0xd20] sm:$0xff]  ;;  %v1064_v55 = vld [vmem:[#allocation6 + $0x908] sm:$0xff] }
 0x143   :  { %1367 = vmatprep.subr.mxu0 %v848_v56  ;;  %1438 = vmatprep.subr.mxu1 %v976_v57  ;;  %v1192_v56 = vld [vmem:[#allocation6 + $0xd08] sm:$0xff]  ;;  %v1063_v57 = vld [vmem:[#allocation6 + $0x900] sm:$0xff] }
 0x144   :  { %1368 = vmatpush2.msra.mxu0 %v847_v58  ;;  %1439 = vmatpush2.msra.mxu1 %v975_v59  ;;  %v1191_v58 = vld [vmem:[#allocation6 + $0xd00] sm:$0xff]  ;;  %v1060_v59 = vld [vmem:[#allocation6 + $0x8e8] sm:$0xff] }
 0x145   :  { %1369 = vmatprep.subr.mxu0 %v844_v60  ;;  %1440 = vmatprep.subr.mxu1 %v972_v61  ;;  %v1188_v60 = vld [vmem:[#allocation6 + $0xce8] sm:$0xff]  ;;  %v1059_v61 = vld [vmem:[#allocation6 + $0x8e0] sm:$0xff] }
 0x146   :  { %1370 = vmatpush2.msra.mxu0 %v843_v62  ;;  %1441 = vmatpush2.msra.mxu1 %v971_v0  ;;  %v1187_v62 = vld [vmem:[#allocation6 + $0xce0] sm:$0xff]  ;;  %v1056_v0 = vld [vmem:[#allocation6 + $0x8c8] sm:$0xff] }
 0x147   :  { %1371 = vmatprep.subr.mxu0 %v840_v2  ;;  %1442 = vmatprep.subr.mxu1 %v968_v3  ;;  %v1184_v2 = vld [vmem:[#allocation6 + $0xcc8] sm:$0xff]  ;;  %v1055_v3 = vld [vmem:[#allocation6 + $0x8c0] sm:$0xff] }
 0x148   :  { %1372 = vmatpush2.msra.mxu0 %v839_v4  ;;  %1443 = vmatpush2.msra.mxu1 %v967_v5  ;;  %v1183_v4 = vld [vmem:[#allocation6 + $0xcc0] sm:$0xff]  ;;  %v1052_v5 = vld [vmem:[#allocation6 + $0x8a8] sm:$0xff] }
 0x149   :  { %1451 = vmatprep.subr.mxu0 %v1092_v6  ;;  %1522 = vmatprep.subr.mxu1 %v1220_v7  ;;  %v1180_v6 = vld [vmem:[#allocation6 + $0xca8] sm:$0xff]  ;;  %v1051_v7 = vld [vmem:[#allocation6 + $0x8a0] sm:$0xff] }
 0x186   :  { %v549_v18 = vpop.f32.mrf.mxu0  ;;  %v620_v1 = vpop.f32.mrf.mxu1 }
 0x187   :  { %v4585_v19 = vadd.f32 %v620_v1, %v454_v15  ;;  %v4587_v20 = vadd.f32 %v549_v18, %v446_v16  ;;  %v1048_v15 = vld [vmem:[#allocation6 + $0x888] sm:$0xff] }
 0x188   :  { %v551_v21 = vpop.f32.mrf.mxu0  ;;  %v622_v22 = vpop.f32.mrf.mxu1  ;;  %v1176_v16 = vld [vmem:[#allocation6 + $0xc88] sm:$0xff] }
 0x189   :  { %v4589_v23 = vadd.f32 %v551_v21, %v450_v63  ;;  %v4591_v24 = vadd.f32 %v622_v22, %v458_v17  ;;  %v769_v25 = vmax.f32 %v4585_v19, 0.0  ;;  %v767_v28 = vmax.f32 %v4587_v20, 0.0  ;;  %v1047_v63 = vld [vmem:[#allocation6 + $0x880] sm:$0xff]  ;;  %v1044_v18 = vld [vmem:[#allocation6 + $0x868] sm:$0xff]  ;;  %v1086_v20 = vld [vmem:[#allocation6 + $0x9b8] sm:$0xff] }
 0x18a   :  { %v1175_v17 = vld [vmem:[#allocation6 + $0xc80] sm:$0xff]  ;;  %v1172_v1 = vld [vmem:[#allocation6 + $0xc68] sm:$0xff]  ;;  %v1085_v19 = vld [vmem:[#allocation6 + $0x9b0] sm:$0xff] }
 0x18b   :  { %v768_v26 = vmax.f32 %v4589_v23, 0.0  ;;  %v770_v27 = vmax.f32 %v4591_v24, 0.0  ;;  %v1043_v21 = vld [vmem:[#allocation6 + $0x860] sm:$0xff]  ;;  %v822_v23 = vld [vmem:[#allocation6 + $0x178] sm:$0xff] }
 0x18c   :  { %v1171_v22 = vld [vmem:[#allocation6 + $0xc60] sm:$0xff]  ;;  %v818_v24 = vld [vmem:[#allocation6 + $0x158] sm:$0xff] }
 0x18d   :  { %1373 = vmatprep.mubr.f32.mxu0 %v768_v26  ;;  %1444 = vmatprep.mubr.f32.mxu1 %v770_v27 }
 0x18e   :  { %1374 = vmatmul.mubr.f32.vlgmr.msra.gmra.mxu0 %v767_v28  ;;  %1445 = vmatmul.mubr.f32.vlgmr.msra.gmra.mxu1 %v769_v25 }
 0x18f   :  { %1452 = vmatpush1.msra.mxu0 %v1091_v29  ;;  %1523 = vmatpush1.msra.mxu1 %v1219_v30  ;;  %v1040_v29 = vld [vmem:[#allocation6 + $0x848] sm:$0xff] }
 0x190   :  { %1453 = vmatprep.subr.mxu0 %v1088_v31  ;;  %1524 = vmatprep.subr.mxu1 %v1216_v32  ;;  %v1168_v30 = vld [vmem:[#allocation6 + $0xc48] sm:$0xff]  ;;  %v1039_v31 = vld [vmem:[#allocation6 + $0x840] sm:$0xff] }
 0x191   :  { %1454 = vmatpush1.msra.mxu0 %v1087_v33  ;;  %1525 = vmatpush1.msra.mxu1 %v1215_v34  ;;  %v1167_v32 = vld [vmem:[#allocation6 + $0xc40] sm:$0xff]  ;;  %v1036_v33 = vld [vmem:[#allocation6 + $0x828] sm:$0xff] }
 0x192   :  { %1455 = vmatprep.subr.mxu0 %v1084_v35  ;;  %1526 = vmatprep.subr.mxu1 %v1212_v36  ;;  %v1164_v34 = vld [vmem:[#allocation6 + $0xc28] sm:$0xff]  ;;  %v1035_v35 = vld [vmem:[#allocation6 + $0x820] sm:$0xff] }
 0x193   :  { %1456 = vmatpush1.msra.mxu0 %v1083_v37  ;;  %1527 = vmatpush1.msra.mxu1 %v1211_v38  ;;  %v1163_v36 = vld [vmem:[#allocation6 + $0xc20] sm:$0xff]  ;;  %v1032_v37 = vld [vmem:[#allocation6 + $0x808] sm:$0xff] }
 0x194   :  { %1457 = vmatprep.subr.mxu0 %v1080_v39  ;;  %1528 = vmatprep.subr.mxu1 %v1208_v40  ;;  %v1160_v38 = vld [vmem:[#allocation6 + $0xc08] sm:$0xff]  ;;  %v1031_v39 = vld [vmem:[#allocation6 + $0x800] sm:$0xff] }
 0x195   :  { %1458 = vmatpush1.msra.mxu0 %v1079_v41  ;;  %1529 = vmatpush1.msra.mxu1 %v1207_v42  ;;  %v1159_v40 = vld [vmem:[#allocation6 + $0xc00] sm:$0xff]  ;;  %v1156_v41 = vld [vmem:[#allocation6 + $0xbe8] sm:$0xff] }
 0x196   :  { %1459 = vmatprep.subr.mxu0 %v1076_v43  ;;  %1530 = vmatprep.subr.mxu1 %v1204_v44  ;;  %v1284_v42 = vld [vmem:[#allocation6 + $0xfe8] sm:$0xff]  ;;  %v1155_v43 = vld [vmem:[#allocation6 + $0xbe0] sm:$0xff] }
 0x197   :  { %1460 = vmatpush1.msra.mxu0 %v1075_v45  ;;  %1531 = vmatpush1.msra.mxu1 %v1203_v46  ;;  %v1283_v44 = vld [vmem:[#allocation6 + $0xfe0] sm:$0xff]  ;;  %v1152_v45 = vld [vmem:[#allocation6 + $0xbc8] sm:$0xff] }
 0x198   :  { %1461 = vmatprep.subr.mxu0 %v1072_v47  ;;  %1532 = vmatprep.subr.mxu1 %v1200_v48  ;;  %v1280_v46 = vld [vmem:[#allocation6 + $0xfc8] sm:$0xff]  ;;  %v1151_v47 = vld [vmem:[#allocation6 + $0xbc0] sm:$0xff] }
 0x199   :  { %1462 = vmatpush1.msra.mxu0 %v1071_v49  ;;  %1533 = vmatpush1.msra.mxu1 %v1199_v50  ;;  %v1279_v48 = vld [vmem:[#allocation6 + $0xfc0] sm:$0xff]  ;;  %v1148_v49 = vld [vmem:[#allocation6 + $0xba8] sm:$0xff] }
 0x19a   :  { %1463 = vmatprep.subr.mxu0 %v1068_v51  ;;  %1534 = vmatprep.subr.mxu1 %v1196_v52  ;;  %v1276_v50 = vld [vmem:[#allocation6 + $0xfa8] sm:$0xff]  ;;  %v1147_v51 = vld [vmem:[#allocation6 + $0xba0] sm:$0xff] }
 0x19b   :  { %1464 = vmatpush1.msra.mxu0 %v1067_v53  ;;  %1535 = vmatpush1.msra.mxu1 %v1195_v54  ;;  %v1275_v52 = vld [vmem:[#allocation6 + $0xfa0] sm:$0xff]  ;;  %v1144_v53 = vld [vmem:[#allocation6 + $0xb88] sm:$0xff] }
 0x19c   :  { %1465 = vmatprep.subr.mxu0 %v1064_v55  ;;  %1536 = vmatprep.subr.mxu1 %v1192_v56  ;;  %v1272_v54 = vld [vmem:[#allocation6 + $0xf88] sm:$0xff]  ;;  %v1143_v55 = vld [vmem:[#allocation6 + $0xb80] sm:$0xff] }
 0x19d   :  { %1466 = vmatpush1.msra.mxu0 %v1063_v57  ;;  %1537 = vmatpush1.msra.mxu1 %v1191_v58  ;;  %v1271_v56 = vld [vmem:[#allocation6 + $0xf80] sm:$0xff]  ;;  %v1140_v57 = vld [vmem:[#allocation6 + $0xb68] sm:$0xff] }
 0x19e   :  { %1467 = vmatprep.subr.mxu0 %v1060_v59  ;;  %1538 = vmatprep.subr.mxu1 %v1188_v60  ;;  %v1268_v58 = vld [vmem:[#allocation6 + $0xf68] sm:$0xff]  ;;  %v1139_v59 = vld [vmem:[#allocation6 + $0xb60] sm:$0xff] }
 0x19f   :  { %1468 = vmatpush1.msra.mxu0 %v1059_v61  ;;  %1539 = vmatpush1.msra.mxu1 %v1187_v62  ;;  %v1267_v60 = vld [vmem:[#allocation6 + $0xf60] sm:$0xff]  ;;  %v1136_v61 = vld [vmem:[#allocation6 + $0xb48] sm:$0xff] }
 0x1a0   :  { %1469 = vmatprep.subr.mxu0 %v1056_v0  ;;  %1540 = vmatprep.subr.mxu1 %v1184_v2  ;;  %v1264_v62 = vld [vmem:[#allocation6 + $0xf48] sm:$0xff]  ;;  %v1135_v0 = vld [vmem:[#allocation6 + $0xb40] sm:$0xff] }
 0x1a1   :  { %1470 = vmatpush1.msra.mxu0 %v1055_v3  ;;  %1541 = vmatpush1.msra.mxu1 %v1183_v4  ;;  %v1263_v2 = vld [vmem:[#allocation6 + $0xf40] sm:$0xff]  ;;  %v1132_v3 = vld [vmem:[#allocation6 + $0xb28] sm:$0xff] }
 0x1a2   :  { %1471 = vmatprep.subr.mxu0 %v1052_v5  ;;  %1542 = vmatprep.subr.mxu1 %v1180_v6  ;;  %v1260_v4 = vld [vmem:[#allocation6 + $0xf28] sm:$0xff]  ;;  %v1131_v5 = vld [vmem:[#allocation6 + $0xb20] sm:$0xff] }
 0x1a3   :  { %1472 = vmatpush1.msra.mxu0 %v1051_v7  ;;  %1543 = vmatpush1.msra.mxu1 %v1179_v8  ;;  %v1259_v6 = vld [vmem:[#allocation6 + $0xf20] sm:$0xff]  ;;  %v1128_v7 = vld [vmem:[#allocation6 + $0xb08] sm:$0xff] }
 0x1a4   :  { %1473 = vmatprep.subr.mxu0 %v1048_v15  ;;  %1544 = vmatprep.subr.mxu1 %v1176_v16  ;;  %v1256_v8 = vld [vmem:[#allocation6 + $0xf08] sm:$0xff]  ;;  %v1127_v15 = vld [vmem:[#allocation6 + $0xb00] sm:$0xff] }
 0x1a5   :  { %1474 = vmatpush1.msra.mxu0 %v1047_v63  ;;  %1545 = vmatpush1.msra.mxu1 %v1175_v17  ;;  %v1255_v16 = vld [vmem:[#allocation6 + $0xf00] sm:$0xff]  ;;  %v1124_v63 = vld [vmem:[#allocation6 + $0xae8] sm:$0xff] }
 0x1a6   :  { %1475 = vmatprep.subr.mxu0 %v1044_v18  ;;  %1546 = vmatprep.subr.mxu1 %v1172_v1  ;;  %v1252_v17 = vld [vmem:[#allocation6 + $0xee8] sm:$0xff]  ;;  %v1123_v18 = vld [vmem:[#allocation6 + $0xae0] sm:$0xff] }
 0x1a7   :  { %1476 = vmatpush1.msra.mxu0 %v1043_v21  ;;  %1547 = vmatpush1.msra.mxu1 %v1171_v22  ;;  %v1251_v1 = vld [vmem:[#allocation6 + $0xee0] sm:$0xff]  ;;  %v1120_v21 = vld [vmem:[#allocation6 + $0xac8] sm:$0xff] }
 0x1a8   :  { %1477 = vmatprep.subr.mxu0 %v1040_v29  ;;  %1548 = vmatprep.subr.mxu1 %v1168_v30  ;;  %v1248_v22 = vld [vmem:[#allocation6 + $0xec8] sm:$0xff]  ;;  %v1119_v29 = vld [vmem:[#allocation6 + $0xac0] sm:$0xff] }
 0x1a9   :  { %1478 = vmatpush1.msra.mxu0 %v1039_v31  ;;  %1549 = vmatpush1.msra.mxu1 %v1167_v32  ;;  %v1247_v30 = vld [vmem:[#allocation6 + $0xec0] sm:$0xff]  ;;  %v1116_v31 = vld [vmem:[#allocation6 + $0xaa8] sm:$0xff] }
 0x1aa   :  { %1479 = vmatprep.subr.mxu0 %v1036_v33  ;;  %1550 = vmatprep.subr.mxu1 %v1164_v34  ;;  %v1244_v32 = vld [vmem:[#allocation6 + $0xea8] sm:$0xff]  ;;  %v1115_v33 = vld [vmem:[#allocation6 + $0xaa0] sm:$0xff] }
 0x1ab   :  { %1480 = vmatpush1.msra.mxu0 %v1035_v35  ;;  %1551 = vmatpush1.msra.mxu1 %v1163_v36  ;;  %v1243_v34 = vld [vmem:[#allocation6 + $0xea0] sm:$0xff]  ;;  %v1112_v35 = vld [vmem:[#allocation6 + $0xa88] sm:$0xff] }
 0x1ac   :  { %1481 = vmatprep.subr.mxu0 %v1032_v37  ;;  %1552 = vmatprep.subr.mxu1 %v1160_v38  ;;  %v1240_v36 = vld [vmem:[#allocation6 + $0xe88] sm:$0xff]  ;;  %v469_v37 = vsub.s32 6, %v4561_v9  ;;  %v1111_v38 = vld [vmem:[#allocation6 + $0xa80] sm:$0xff] }
 0x1ad   :  { %1482 = vmatpush1.msra.mxu0 %v1031_v39  ;;  %1553 = vmatpush1.msra.mxu1 %v1159_v40  ;;  %v1239_v39 = vld [vmem:[#allocation6 + $0xe80] sm:$0xff]  ;;  %v461_v40 = vsub.s32 4, %v4561_v9 }
 0x1ae   :  { %1483 = vmatprep.subr.mxu0 %v1156_v41  ;;  %1554 = vmatprep.subr.mxu1 %v1284_v42  ;;  %v1108_v41 = vld [vmem:[#allocation6 + $0xa68] sm:$0xff] }
 0x1af   :  { %1484 = vmatpush2.msra.mxu0 %v1155_v43  ;;  %1555 = vmatpush2.msra.mxu1 %v1283_v44  ;;  %v1236_v42 = vld [vmem:[#allocation6 + $0xe68] sm:$0xff]  ;;  %v465_v43 = vsub.s32 5, %v4561_v9  ;;  %v473_v44 = vsub.s32 7, %v4561_v9 }
 0x1b0   :  { %1485 = vmatprep.subr.mxu0 %v1152_v45  ;;  %1556 = vmatprep.subr.mxu1 %v1280_v46  ;;  %v1107_v45 = vld [vmem:[#allocation6 + $0xa60] sm:$0xff] }
 0x1b1   :  { %1486 = vmatpush2.msra.mxu0 %v1151_v47  ;;  %1557 = vmatpush2.msra.mxu1 %v1279_v48  ;;  %v1235_v46 = vld [vmem:[#allocation6 + $0xe60] sm:$0xff]  ;;  %v470_v47 = vrot.slane %v4569_v12, %v469_v37  ;;  %v1104_v48 = vld [vmem:[#allocation6 + $0xa48] sm:$0xff] }
 0x1b2   :  { %1487 = vmatprep.subr.mxu0 %v1148_v49  ;;  %1558 = vmatprep.subr.mxu1 %v1276_v50  ;;  %v1232_v49 = vld [vmem:[#allocation6 + $0xe48] sm:$0xff]  ;;  %v462_v50 = vrot.slane %v4569_v12, %v461_v40 }
 0x1b3   :  { %1488 = vmatpush2.msra.mxu0 %v1147_v51  ;;  %1559 = vmatpush2.msra.mxu1 %v1275_v52  ;;  %v1103_v51 = vld [vmem:[#allocation6 + $0xa40] sm:$0xff] }
 0x1b4   :  { %1489 = vmatprep.subr.mxu0 %v1144_v53  ;;  %1560 = vmatprep.subr.mxu1 %v1272_v54  ;;  %v1231_v52 = vld [vmem:[#allocation6 + $0xe40] sm:$0xff]  ;;  %v466_v53 = vrot.slane %v4569_v12, %v465_v43  ;;  %v474_v54 = vrot.slane %v4569_v12, %v473_v44 }
 0x1b5   :  { %1490 = vmatpush2.msra.mxu0 %v1143_v55  ;;  %1561 = vmatpush2.msra.mxu1 %v1271_v56  ;;  %v1100_v55 = vld [vmem:[#allocation6 + $0xa28] sm:$0xff]  ;;  %v1095_v12 = vld [vmem:[#allocation6 + $0xa00] sm:$0xff] }
 0x1b6   :  { %1491 = vmatprep.subr.mxu0 %v1140_v57  ;;  %1562 = vmatprep.subr.mxu1 %v1268_v58  ;;  %v1228_v56 = vld [vmem:[#allocation6 + $0xe28] sm:$0xff] }
 0x1b7   :  { %1492 = vmatpush2.msra.mxu0 %v1139_v59  ;;  %1563 = vmatpush2.msra.mxu1 %v1267_v60  ;;  %v1099_v59 = vld [vmem:[#allocation6 + $0xa20] sm:$0xff] }
 0x1b8   :  { %1493 = vmatprep.subr.mxu0 %v1136_v61  ;;  %1564 = vmatprep.subr.mxu1 %v1264_v62  ;;  %v1227_v60 = vld [vmem:[#allocation6 + $0xe20] sm:$0xff]  ;;  %v1096_v62 = vld [vmem:[#allocation6 + $0xa08] sm:$0xff] }
 0x1b9   :  { %1494 = vmatpush2.msra.mxu0 %v1135_v0  ;;  %1565 = vmatpush2.msra.mxu1 %v1263_v2  ;;  %v1224_v0 = vld [vmem:[#allocation6 + $0xe08] sm:$0xff] }
 0x1ba   :  { %1495 = vmatprep.subr.mxu0 %v1132_v3  ;;  %1566 = vmatprep.subr.mxu1 %v1260_v4 }
 0x1bb   :  { %1496 = vmatpush2.msra.mxu0 %v1131_v5  ;;  %1567 = vmatpush2.msra.mxu1 %v1259_v6  ;;  %v1223_v5 = vld [vmem:[#allocation6 + $0xe00] sm:$0xff] }
 0x1bc   :  { %1497 = vmatprep.subr.mxu0 %v1128_v7  ;;  %1568 = vmatprep.subr.mxu1 %v1256_v8  ;;  %v838_v8 = vld [vmem:[#allocation6 + $0x1f8] sm:$0xff] }
 0x1bd   :  { %1498 = vmatpush2.msra.mxu0 %v1127_v15  ;;  %1569 = vmatpush2.msra.mxu1 %v1255_v16  ;;  %v966_v15 = vld [vmem:[#allocation6 + $0x5f8] sm:$0xff] }
 0x1be   :  { %1499 = vmatprep.subr.mxu0 %v1124_v63  ;;  %1570 = vmatprep.subr.mxu1 %v1252_v17 }
 0x1bf   :  { %1500 = vmatpush2.msra.mxu0 %v1123_v18  ;;  %1571 = vmatpush2.msra.mxu1 %v1251_v1  ;;  %v837_v1 = vld [vmem:[#allocation6 + $0x1f0] sm:$0xff] }
 0x1c0   :  { %1501 = vmatprep.subr.mxu0 %v1120_v21  ;;  %1572 = vmatprep.subr.mxu1 %v1248_v22  ;;  %v965_v21 = vld [vmem:[#allocation6 + $0x5f0] sm:$0xff]  ;;  %v834_v22 = vld [vmem:[#allocation6 + $0x1d8] sm:$0xff] }
 0x1c1   :  { %1502 = vmatpush2.msra.mxu0 %v1119_v29  ;;  %1573 = vmatpush2.msra.mxu1 %v1247_v30  ;;  %v962_v29 = vld [vmem:[#allocation6 + $0x5d8] sm:$0xff]  ;;  %v833_v30 = vld [vmem:[#allocation6 + $0x1d0] sm:$0xff] }
 0x1c2   :  { %1503 = vmatprep.subr.mxu0 %v1116_v31  ;;  %1574 = vmatprep.subr.mxu1 %v1244_v32  ;;  %v961_v31 = vld [vmem:[#allocation6 + $0x5d0] sm:$0xff]  ;;  %v830_v32 = vld [vmem:[#allocation6 + $0x1b8] sm:$0xff] }
 0x1c3   :  { %1504 = vmatpush2.msra.mxu0 %v1115_v33  ;;  %1575 = vmatpush2.msra.mxu1 %v1243_v34  ;;  %v958_v33 = vld [vmem:[#allocation6 + $0x5b8] sm:$0xff]  ;;  %v829_v34 = vld [vmem:[#allocation6 + $0x1b0] sm:$0xff] }
 0x1c4   :  { %1505 = vmatprep.subr.mxu0 %v1112_v35  ;;  %1576 = vmatprep.subr.mxu1 %v1240_v36  ;;  %v957_v35 = vld [vmem:[#allocation6 + $0x5b0] sm:$0xff]  ;;  %v826_v36 = vld [vmem:[#allocation6 + $0x198] sm:$0xff] }
 0x1c5   :  { %1506 = vmatpush2.msra.mxu0 %v1111_v38  ;;  %1577 = vmatpush2.msra.mxu1 %v1239_v39  ;;  %v954_v38 = vld [vmem:[#allocation6 + $0x598] sm:$0xff]  ;;  %v825_v39 = vld [vmem:[#allocation6 + $0x190] sm:$0xff] }
 0x1c6   :  { %1507 = vmatprep.subr.mxu0 %v1108_v41  ;;  %1578 = vmatprep.subr.mxu1 %v1236_v42  ;;  %v953_v41 = vld [vmem:[#allocation6 + $0x590] sm:$0xff] }
 0x1c7   :  { %1508 = vmatpush2.msra.mxu0 %v1107_v45  ;;  %1579 = vmatpush2.msra.mxu1 %v1235_v46  ;;  %v821_v42 = vld [vmem:[#allocation6 + $0x170] sm:$0xff] }
 0x1c8   :  { %v691_v57 = vpop.f32.mrf.mxu0  ;;  %v762_v58 = vpop.f32.mrf.mxu1  ;;  %1509 = vmatprep.subr.mxu0 %v1104_v48  ;;  %1580 = vmatprep.subr.mxu1 %v1232_v49  ;;  %v949_v45 = vld [vmem:[#allocation6 + $0x570] sm:$0xff]  ;;  %v814_v48 = vld [vmem:[#allocation6 + $0x138] sm:$0xff] }
 0x1c9   :  { %v4621_v61 = vadd.f32 %v762_v58, %v470_v47  ;;  %1510 = vmatpush2.msra.mxu0 %v1103_v51  ;;  %1581 = vmatpush2.msra.mxu1 %v1231_v52  ;;  %v4623_v2 = vadd.f32 %v691_v57, %v462_v50  ;;  %v817_v46 = vld [vmem:[#allocation6 + $0x150] sm:$0xff]  ;;  %v942_v49 = vld [vmem:[#allocation6 + $0x538] sm:$0xff] }
 0x1ca   :  { %v693_v3 = vpop.f32.mrf.mxu0  ;;  %v764_v4 = vpop.f32.mrf.mxu1  ;;  %1511 = vmatprep.subr.mxu0 %v1100_v55  ;;  %1582 = vmatprep.subr.mxu1 %v1228_v56  ;;  %v945_v47 = vld [vmem:[#allocation6 + $0x550] sm:$0xff]  ;;  %v810_v52 = vld [vmem:[#allocation6 + $0x118] sm:$0xff] }
 0x1cb   :  { %v4625_v6 = vadd.f32 %v693_v3, %v466_v53  ;;  %v4627_v7 = vadd.f32 %v764_v4, %v474_v54  ;;  %1512 = vmatpush2.msra.mxu0 %v1099_v59  ;;  %1583 = vmatpush2.msra.mxu1 %v1227_v60  ;;  %v773_v16 = vmax.f32 %v4621_v61, 0.0  ;;  %v771_v18 = vmax.f32 %v4623_v2, 0.0  ;;  %v813_v50 = vld [vmem:[#allocation6 + $0x130] sm:$0xff]  ;;  %v938_v53 = vld [vmem:[#allocation6 + $0x518] sm:$0xff]  ;;  %v1905_v2 = vld [vmem:[#allocation9 + $0xc0] sm:$0xff] }
 0x1cc   :  { %1513 = vmatprep.subr.mxu0 %v1096_v62  ;;  %1584 = vmatprep.subr.mxu1 %v1224_v0  ;;  %v941_v51 = vld [vmem:[#allocation6 + $0x530] sm:$0xff]  ;;  %v806_v56 = vld [vmem:[#allocation6 + $0xf8] sm:$0xff] }
 0x1cd   :  { %v772_v63 = vmax.f32 %v4625_v6, 0.0  ;;  %v774_v17 = vmax.f32 %v4627_v7, 0.0  ;;  %1514 = vmatpush2.msra.mxu0 %v1095_v12  ;;  %1585 = vmatpush2.msra.mxu1 %v1223_v5  ;;  %v809_v54 = vld [vmem:[#allocation6 + $0x110] sm:$0xff]  ;;  %v934_v57 = vld [vmem:[#allocation6 + $0x4f8] sm:$0xff] }
 0x1ce   :  { %1593 = vmatprep.subr.mxu0 %v838_v8  ;;  %1664 = vmatprep.subr.mxu1 %v966_v15  ;;  %v937_v55 = vld [vmem:[#allocation6 + $0x510] sm:$0xff]  ;;  %v802_v60 = vld [vmem:[#allocation6 + $0xd8] sm:$0xff] }
 0x1cf   :  { %1515 = vmatprep.mubr.f32.mxu0 %v772_v63  ;;  %1586 = vmatprep.mubr.f32.mxu1 %v774_v17  ;;  %v805_v58 = vld [vmem:[#allocation6 + $0xf0] sm:$0xff]  ;;  %v930_v62 = vld [vmem:[#allocation6 + $0x4d8] sm:$0xff] }
 0x1d0   :  { %1516 = vmatmul.mubr.f32.vlgmr.msra.gmra.mxu0 %v771_v18  ;;  %1587 = vmatmul.mubr.f32.vlgmr.msra.gmra.mxu1 %v773_v16  ;;  %v933_v59 = vld [vmem:[#allocation6 + $0x4f0] sm:$0xff]  ;;  %v798_v4 = vld [vmem:[#allocation6 + $0xb8] sm:$0xff] }
 0x1d1   :  { %1594 = vmatpush1.msra.mxu0 %v837_v1  ;;  %1665 = vmatpush1.msra.mxu1 %v965_v21  ;;  %v801_v0 = vld [vmem:[#allocation6 + $0xd0] sm:$0xff]  ;;  %v926_v12 = vld [vmem:[#allocation6 + $0x4b8] sm:$0xff] }
 0x1d2   :  { %1595 = vmatprep.subr.mxu0 %v834_v22  ;;  %1657 = vmatprep.mubr.f32.mxu0 %v768_v26  ;;  %v950_v26 = vld [vmem:[#allocation6 + $0x578] sm:$0xff]  ;;  %v929_v3 = vld [vmem:[#allocation6 + $0x4d0] sm:$0xff] }
 0x1d3   :  { %1666 = vmatprep.subr.mxu1 %v962_v29  ;;  %1728 = vmatprep.mubr.f32.mxu1 %v770_v27  ;;  %v946_v27 = vld [vmem:[#allocation6 + $0x558] sm:$0xff]  ;;  %v797_v5 = vld [vmem:[#allocation6 + $0xb0] sm:$0xff] }
 0x1d4   :  { %1596 = vmatpush1.msra.mxu0 %v833_v30  ;;  %1667 = vmatpush1.msra.mxu1 %v961_v31  ;;  %v925_v8 = vld [vmem:[#allocation6 + $0x4b0] sm:$0xff]  ;;  %v794_v15 = vld [vmem:[#allocation6 + $0x98] sm:$0xff] }
 0x1d5   :  { %1597 = vmatprep.subr.mxu0 %v830_v32  ;;  %1668 = vmatprep.subr.mxu1 %v958_v33  ;;  %v922_v1 = vld [vmem:[#allocation6 + $0x498] sm:$0xff]  ;;  %v793_v21 = vld [vmem:[#allocation6 + $0x90] sm:$0xff] }
 0x1d6   :  { %1598 = vmatpush1.msra.mxu0 %v829_v34  ;;  %1669 = vmatpush1.msra.mxu1 %v957_v35  ;;  %v921_v22 = vld [vmem:[#allocation6 + $0x490] sm:$0xff]  ;;  %v790_v29 = vld [vmem:[#allocation6 + $0x78] sm:$0xff] }
 0x1d7   :  { %1599 = vmatprep.subr.mxu0 %v826_v36  ;;  %1670 = vmatprep.subr.mxu1 %v954_v38  ;;  %v918_v30 = vld [vmem:[#allocation6 + $0x478] sm:$0xff]  ;;  %v789_v31 = vld [vmem:[#allocation6 + $0x70] sm:$0xff] }
 0x1d8   :  { %1600 = vmatpush1.msra.mxu0 %v825_v39  ;;  %1671 = vmatpush1.msra.mxu1 %v953_v41  ;;  %v917_v32 = vld [vmem:[#allocation6 + $0x470] sm:$0xff]  ;;  %v786_v33 = vld [vmem:[#allocation6 + $0x58] sm:$0xff] }
 0x1d9   :  { %1601 = vmatprep.subr.mxu0 %v822_v23  ;;  %1672 = vmatprep.subr.mxu1 %v950_v26  ;;  %v914_v34 = vld [vmem:[#allocation6 + $0x458] sm:$0xff]  ;;  %v785_v35 = vld [vmem:[#allocation6 + $0x50] sm:$0xff] }
 0x1da   :  { %1602 = vmatpush1.msra.mxu0 %v821_v42  ;;  %1673 = vmatpush1.msra.mxu1 %v949_v45  ;;  %v913_v36 = vld [vmem:[#allocation6 + $0x450] sm:$0xff]  ;;  %v782_v38 = vld [vmem:[#allocation6 + $0x38] sm:$0xff] }
 0x1db   :  { %1603 = vmatprep.subr.mxu0 %v818_v24  ;;  %1674 = vmatprep.subr.mxu1 %v946_v27  ;;  %v910_v39 = vld [vmem:[#allocation6 + $0x438] sm:$0xff]  ;;  %v781_v41 = vld [vmem:[#allocation6 + $0x30] sm:$0xff] }
 0x1dc   :  { %1604 = vmatpush1.msra.mxu0 %v817_v46  ;;  %1675 = vmatpush1.msra.mxu1 %v945_v47  ;;  %v909_v23 = vld [vmem:[#allocation6 + $0x430] sm:$0xff]  ;;  %v778_v26 = vld [vmem:[#allocation6 + $0x18] sm:$0xff] }
 0x1dd   :  { %1605 = vmatprep.subr.mxu0 %v814_v48  ;;  %1676 = vmatprep.subr.mxu1 %v942_v49  ;;  %v906_v42 = vld [vmem:[#allocation6 + $0x418] sm:$0xff]  ;;  %v777_v45 = vld [vmem:[#allocation6 + $0x10] sm:$0xff] }
 0x1de   :  { %1606 = vmatpush1.msra.mxu0 %v813_v50  ;;  %1677 = vmatpush1.msra.mxu1 %v941_v51  ;;  %v905_v24 = vld [vmem:[#allocation6 + $0x410] sm:$0xff]  ;;  %v902_v27 = vld [vmem:[#allocation6 + $0x3f8] sm:$0xff] }
 0x1df   :  { %1607 = vmatprep.subr.mxu0 %v810_v52  ;;  %1678 = vmatprep.subr.mxu1 %v938_v53  ;;  %v1030_v46 = vld [vmem:[#allocation6 + $0x7f8] sm:$0xff]  ;;  %v901_v47 = vld [vmem:[#allocation6 + $0x3f0] sm:$0xff] }
 0x1e0   :  { %1608 = vmatpush1.msra.mxu0 %v809_v54  ;;  %1679 = vmatpush1.msra.mxu1 %v937_v55  ;;  %v1029_v48 = vld [vmem:[#allocation6 + $0x7f0] sm:$0xff]  ;;  %v898_v49 = vld [vmem:[#allocation6 + $0x3d8] sm:$0xff] }
 0x1e1   :  { %1609 = vmatprep.subr.mxu0 %v806_v56  ;;  %1680 = vmatprep.subr.mxu1 %v934_v57  ;;  %v1026_v50 = vld [vmem:[#allocation6 + $0x7d8] sm:$0xff]  ;;  %v897_v51 = vld [vmem:[#allocation6 + $0x3d0] sm:$0xff] }
 0x1e2   :  { %1610 = vmatpush1.msra.mxu0 %v805_v58  ;;  %1681 = vmatpush1.msra.mxu1 %v933_v59  ;;  %v1025_v52 = vld [vmem:[#allocation6 + $0x7d0] sm:$0xff]  ;;  %v894_v53 = vld [vmem:[#allocation6 + $0x3b8] sm:$0xff] }
 0x1e3   :  { %1611 = vmatprep.subr.mxu0 %v802_v60  ;;  %1682 = vmatprep.subr.mxu1 %v930_v62  ;;  %v1022_v54 = vld [vmem:[#allocation6 + $0x7b8] sm:$0xff]  ;;  %v893_v55 = vld [vmem:[#allocation6 + $0x3b0] sm:$0xff] }
 0x1e4   :  { %1612 = vmatpush1.msra.mxu0 %v801_v0  ;;  %1683 = vmatpush1.msra.mxu1 %v929_v3  ;;  %v1021_v56 = vld [vmem:[#allocation6 + $0x7b0] sm:$0xff]  ;;  %v890_v57 = vld [vmem:[#allocation6 + $0x398] sm:$0xff] }
 0x1e5   :  { %1613 = vmatprep.subr.mxu0 %v798_v4  ;;  %1684 = vmatprep.subr.mxu1 %v926_v12  ;;  %v1018_v58 = vld [vmem:[#allocation6 + $0x798] sm:$0xff]  ;;  %v889_v59 = vld [vmem:[#allocation6 + $0x390] sm:$0xff] }
 0x1e6   :  { %1614 = vmatpush1.msra.mxu0 %v797_v5  ;;  %1685 = vmatpush1.msra.mxu1 %v925_v8  ;;  %v1017_v60 = vld [vmem:[#allocation6 + $0x790] sm:$0xff]  ;;  %v886_v62 = vld [vmem:[#allocation6 + $0x378] sm:$0xff] }
 0x1e7   :  { %1615 = vmatprep.subr.mxu0 %v794_v15  ;;  %1686 = vmatprep.subr.mxu1 %v922_v1  ;;  %v1014_v0 = vld [vmem:[#allocation6 + $0x778] sm:$0xff]  ;;  %v885_v3 = vld [vmem:[#allocation6 + $0x370] sm:$0xff] }
 0x1e8   :  { %1616 = vmatpush1.msra.mxu0 %v793_v21  ;;  %1687 = vmatpush1.msra.mxu1 %v921_v22  ;;  %v1013_v4 = vld [vmem:[#allocation6 + $0x770] sm:$0xff]  ;;  %v882_v12 = vld [vmem:[#allocation6 + $0x358] sm:$0xff] }
 0x1e9   :  { %1617 = vmatprep.subr.mxu0 %v790_v29  ;;  %1688 = vmatprep.subr.mxu1 %v918_v30  ;;  %v1010_v5 = vld [vmem:[#allocation6 + $0x758] sm:$0xff]  ;;  %v881_v8 = vld [vmem:[#allocation6 + $0x350] sm:$0xff] }
 0x1ea   :  { %1618 = vmatpush1.msra.mxu0 %v789_v31  ;;  %1689 = vmatpush1.msra.mxu1 %v917_v32  ;;  %v1009_v15 = vld [vmem:[#allocation6 + $0x750] sm:$0xff]  ;;  %v878_v1 = vld [vmem:[#allocation6 + $0x338] sm:$0xff] }
 0x1eb   :  { %1619 = vmatprep.subr.mxu0 %v786_v33  ;;  %1690 = vmatprep.subr.mxu1 %v914_v34  ;;  %v1006_v21 = vld [vmem:[#allocation6 + $0x738] sm:$0xff]  ;;  %v877_v22 = vld [vmem:[#allocation6 + $0x330] sm:$0xff] }
 0x1ec   :  { %1620 = vmatpush1.msra.mxu0 %v785_v35  ;;  %1691 = vmatpush1.msra.mxu1 %v913_v36  ;;  %v1005_v29 = vld [vmem:[#allocation6 + $0x730] sm:$0xff]  ;;  %v874_v30 = vld [vmem:[#allocation6 + $0x318] sm:$0xff] }
 0x1ed   :  { %1621 = vmatprep.subr.mxu0 %v782_v38  ;;  %1692 = vmatprep.subr.mxu1 %v910_v39  ;;  %v1002_v31 = vld [vmem:[#allocation6 + $0x718] sm:$0xff]  ;;  %v873_v32 = vld [vmem:[#allocation6 + $0x310] sm:$0xff] }
 0x1ee   :  { %1622 = vmatpush1.msra.mxu0 %v781_v41  ;;  %1693 = vmatpush1.msra.mxu1 %v909_v23  ;;  %v1001_v33 = vld [vmem:[#allocation6 + $0x710] sm:$0xff]  ;;  %v870_v34 = vld [vmem:[#allocation6 + $0x2f8] sm:$0xff] }
 0x1ef   :  { %1623 = vmatprep.subr.mxu0 %v778_v26  ;;  %1694 = vmatprep.subr.mxu1 %v906_v42  ;;  %v998_v35 = vld [vmem:[#allocation6 + $0x6f8] sm:$0xff]  ;;  %v869_v36 = vld [vmem:[#allocation6 + $0x2f0] sm:$0xff] }
 0x1f0   :  { %1624 = vmatpush1.msra.mxu0 %v777_v45  ;;  %1695 = vmatpush1.msra.mxu1 %v905_v24  ;;  %v997_v38 = vld [vmem:[#allocation6 + $0x6f0] sm:$0xff]  ;;  %v866_v39 = vld [vmem:[#allocation6 + $0x2d8] sm:$0xff] }
 0x1f1   :  { %1625 = vmatprep.subr.mxu0 %v902_v27  ;;  %1696 = vmatprep.subr.mxu1 %v1030_v46  ;;  %v994_v41 = vld [vmem:[#allocation6 + $0x6d8] sm:$0xff]  ;;  %v865_v23 = vld [vmem:[#allocation6 + $0x2d0] sm:$0xff] }
 0x1f2   :  { %1626 = vmatpush2.msra.mxu0 %v901_v47  ;;  %1697 = vmatpush2.msra.mxu1 %v1029_v48  ;;  %v993_v26 = vld [vmem:[#allocation6 + $0x6d0] sm:$0xff]  ;;  %v862_v42 = vld [vmem:[#allocation6 + $0x2b8] sm:$0xff] }
 0x1f3   :  { %1627 = vmatprep.subr.mxu0 %v898_v49  ;;  %1698 = vmatprep.subr.mxu1 %v1026_v50  ;;  %v990_v45 = vld [vmem:[#allocation6 + $0x6b8] sm:$0xff]  ;;  %v861_v24 = vld [vmem:[#allocation6 + $0x2b0] sm:$0xff] }
 0x1f4   :  { %1628 = vmatpush2.msra.mxu0 %v897_v51  ;;  %1699 = vmatpush2.msra.mxu1 %v1025_v52  ;;  %v989_v27 = vld [vmem:[#allocation6 + $0x6b0] sm:$0xff]  ;;  %v858_v46 = vld [vmem:[#allocation6 + $0x298] sm:$0xff] }
 0x1f5   :  { %1629 = vmatprep.subr.mxu0 %v894_v53  ;;  %1700 = vmatprep.subr.mxu1 %v1022_v54  ;;  %v986_v47 = vld [vmem:[#allocation6 + $0x698] sm:$0xff]  ;;  %v857_v48 = vld [vmem:[#allocation6 + $0x290] sm:$0xff] }
 0x1f6   :  { %1630 = vmatpush2.msra.mxu0 %v893_v55  ;;  %1701 = vmatpush2.msra.mxu1 %v1021_v56  ;;  %v985_v49 = vld [vmem:[#allocation6 + $0x690] sm:$0xff]  ;;  %v854_v50 = vld [vmem:[#allocation6 + $0x278] sm:$0xff] }
 0x1f7   :  { %1631 = vmatprep.subr.mxu0 %v890_v57  ;;  %1702 = vmatprep.subr.mxu1 %v1018_v58  ;;  %v982_v51 = vld [vmem:[#allocation6 + $0x678] sm:$0xff]  ;;  %v853_v52 = vld [vmem:[#allocation6 + $0x270] sm:$0xff] }
 0x1f8   :  { %1632 = vmatpush2.msra.mxu0 %v889_v59  ;;  %1703 = vmatpush2.msra.mxu1 %v1017_v60  ;;  %v981_v53 = vld [vmem:[#allocation6 + $0x670] sm:$0xff]  ;;  %v850_v54 = vld [vmem:[#allocation6 + $0x258] sm:$0xff] }
 0x1f9   :  { %1633 = vmatprep.subr.mxu0 %v886_v62  ;;  %1704 = vmatprep.subr.mxu1 %v1014_v0  ;;  %v978_v55 = vld [vmem:[#allocation6 + $0x658] sm:$0xff]  ;;  %v849_v56 = vld [vmem:[#allocation6 + $0x250] sm:$0xff] }
 0x1fa   :  { %1634 = vmatpush2.msra.mxu0 %v885_v3  ;;  %1705 = vmatpush2.msra.mxu1 %v1013_v4  ;;  %v977_v57 = vld [vmem:[#allocation6 + $0x650] sm:$0xff]  ;;  %v846_v58 = vld [vmem:[#allocation6 + $0x238] sm:$0xff] }
 0x1fb   :  { %1635 = vmatprep.subr.mxu0 %v882_v12  ;;  %1706 = vmatprep.subr.mxu1 %v1010_v5  ;;  %v974_v59 = vld [vmem:[#allocation6 + $0x638] sm:$0xff]  ;;  %v845_v60 = vld [vmem:[#allocation6 + $0x230] sm:$0xff] }
 0x1fc   :  { %1636 = vmatpush2.msra.mxu0 %v881_v8  ;;  %1707 = vmatpush2.msra.mxu1 %v1009_v15  ;;  %v973_v62 = vld [vmem:[#allocation6 + $0x630] sm:$0xff]  ;;  %v842_v0 = vld [vmem:[#allocation6 + $0x218] sm:$0xff] }
 0x1fd   :  { %1637 = vmatprep.subr.mxu0 %v878_v1  ;;  %1708 = vmatprep.subr.mxu1 %v1006_v21  ;;  %v970_v3 = vld [vmem:[#allocation6 + $0x618] sm:$0xff]  ;;  %v841_v4 = vld [vmem:[#allocation6 + $0x210] sm:$0xff] }
 0x1fe   :  { %1638 = vmatpush2.msra.mxu0 %v877_v22  ;;  %1709 = vmatpush2.msra.mxu1 %v1005_v29  ;;  %v969_v12 = vld [vmem:[#allocation6 + $0x610] sm:$0xff]  ;;  %v1094_v5 = vld [vmem:[#allocation6 + $0x9f8] sm:$0xff] }
 0x1ff   :  { %1639 = vmatprep.subr.mxu0 %v874_v30  ;;  %1710 = vmatprep.subr.mxu1 %v1002_v31  ;;  %v1222_v8 = vld [vmem:[#allocation6 + $0xdf8] sm:$0xff]  ;;  %v1093_v15 = vld [vmem:[#allocation6 + $0x9f0] sm:$0xff] }
 0x200   :  { %1640 = vmatpush2.msra.mxu0 %v873_v32  ;;  %1711 = vmatpush2.msra.mxu1 %v1001_v33  ;;  %v1221_v1 = vld [vmem:[#allocation6 + $0xdf0] sm:$0xff]  ;;  %v1090_v21 = vld [vmem:[#allocation6 + $0x9d8] sm:$0xff] }
 0x201   :  { %1641 = vmatprep.subr.mxu0 %v870_v34  ;;  %1712 = vmatprep.subr.mxu1 %v998_v35  ;;  %v1218_v22 = vld [vmem:[#allocation6 + $0xdd8] sm:$0xff]  ;;  %v1089_v29 = vld [vmem:[#allocation6 + $0x9d0] sm:$0xff] }
 0x202   :  { %1642 = vmatpush2.msra.mxu0 %v869_v36  ;;  %1713 = vmatpush2.msra.mxu1 %v997_v38  ;;  %v1217_v30 = vld [vmem:[#allocation6 + $0xdd0] sm:$0xff]  ;;  %v1082_v31 = vld [vmem:[#allocation6 + $0x998] sm:$0xff] }
 0x203   :  { %1643 = vmatprep.subr.mxu0 %v866_v39  ;;  %1714 = vmatprep.subr.mxu1 %v994_v41  ;;  %v1210_v32 = vld [vmem:[#allocation6 + $0xd98] sm:$0xff]  ;;  %v1081_v6 = vld [vmem:[#allocation6 + $0x990] sm:$0xff] }
 0x204   :  { %1644 = vmatpush2.msra.mxu0 %v865_v23  ;;  %1715 = vmatpush2.msra.mxu1 %v993_v26  ;;  %v1078_v33 = vld [vmem:[#allocation6 + $0x978] sm:$0xff]  ;;  %v1077_v7 = vld [vmem:[#allocation6 + $0x970] sm:$0xff] }
 0x205   :  { %1645 = vmatprep.subr.mxu0 %v862_v42  ;;  %1716 = vmatprep.subr.mxu1 %v990_v45  ;;  %v1206_v34 = vld [vmem:[#allocation6 + $0xd78] sm:$0xff]  ;;  %v1073_v38 = vld [vmem:[#allocation6 + $0x950] sm:$0xff] }
 0x206   :  { %1646 = vmatpush2.msra.mxu0 %v861_v24  ;;  %1717 = vmatpush2.msra.mxu1 %v989_v27  ;;  %v1074_v35 = vld [vmem:[#allocation6 + $0x958] sm:$0xff]  ;;  %v1201_v39 = vld [vmem:[#allocation6 + $0xd50] sm:$0xff] }
 0x207   :  { %1647 = vmatprep.subr.mxu0 %v858_v46  ;;  %1718 = vmatprep.subr.mxu1 %v986_v47  ;;  %v1202_v36 = vld [vmem:[#allocation6 + $0xd58] sm:$0xff]  ;;  %v1069_v26 = vld [vmem:[#allocation6 + $0x930] sm:$0xff] }
 0x208   :  { %1648 = vmatpush2.msra.mxu0 %v857_v48  ;;  %1719 = vmatpush2.msra.mxu1 %v985_v49  ;;  %v1070_v41 = vld [vmem:[#allocation6 + $0x938] sm:$0xff]  ;;  %v1197_v42 = vld [vmem:[#allocation6 + $0xd30] sm:$0xff] }
 0x209   :  { %1649 = vmatprep.subr.mxu0 %v854_v50  ;;  %1720 = vmatprep.subr.mxu1 %v982_v51  ;;  %v1198_v23 = vld [vmem:[#allocation6 + $0xd38] sm:$0xff]  ;;  %v1065_v27 = vld [vmem:[#allocation6 + $0x910] sm:$0xff] }
 0x20a   :  { %1650 = vmatpush2.msra.mxu0 %v853_v52  ;;  %1721 = vmatpush2.msra.mxu1 %v981_v53  ;;  %v1066_v45 = vld [vmem:[#allocation6 + $0x918] sm:$0xff]  ;;  %v1193_v46 = vld [vmem:[#allocation6 + $0xd10] sm:$0xff] }
 0x20b   :  { %1651 = vmatprep.subr.mxu0 %v850_v54  ;;  %1722 = vmatprep.subr.mxu1 %v978_v55  ;;  %v1194_v24 = vld [vmem:[#allocation6 + $0xd18] sm:$0xff]  ;;  %v1061_v49 = vld [vmem:[#allocation6 + $0x8f0] sm:$0xff] }
 0x20c   :  { %1652 = vmatpush2.msra.mxu0 %v849_v56  ;;  %1723 = vmatpush2.msra.mxu1 %v977_v57  ;;  %v1062_v47 = vld [vmem:[#allocation6 + $0x8f8] sm:$0xff]  ;;  %v1189_v50 = vld [vmem:[#allocation6 + $0xcf0] sm:$0xff] }
 0x20d   :  { %1653 = vmatprep.subr.mxu0 %v846_v58  ;;  %1724 = vmatprep.subr.mxu1 %v974_v59  ;;  %v1190_v48 = vld [vmem:[#allocation6 + $0xcf8] sm:$0xff]  ;;  %v1057_v53 = vld [vmem:[#allocation6 + $0x8d0] sm:$0xff] }
 0x20e   :  { %1654 = vmatpush2.msra.mxu0 %v845_v60  ;;  %1725 = vmatpush2.msra.mxu1 %v973_v62  ;;  %v1058_v51 = vld [vmem:[#allocation6 + $0x8d8] sm:$0xff]  ;;  %v1185_v54 = vld [vmem:[#allocation6 + $0xcd0] sm:$0xff] }
 0x20f   :  { %1655 = vmatprep.subr.mxu0 %v842_v0  ;;  %1726 = vmatprep.subr.mxu1 %v970_v3  ;;  %v1186_v52 = vld [vmem:[#allocation6 + $0xcd8] sm:$0xff]  ;;  %v1053_v57 = vld [vmem:[#allocation6 + $0x8b0] sm:$0xff] }
 0x210   :  { %1656 = vmatpush2.msra.mxu0 %v841_v4  ;;  %1727 = vmatpush2.msra.mxu1 %v969_v12  ;;  %v1054_v55 = vld [vmem:[#allocation6 + $0x8b8] sm:$0xff]  ;;  %v1181_v58 = vld [vmem:[#allocation6 + $0xcb0] sm:$0xff] }
 0x211   :  { %1658 = vmatmul.mubr.f32.vlgmr.msra.gmra.mxu0 %v767_v28  ;;  %1729 = vmatmul.mubr.f32.vlgmr.msra.gmra.mxu1 %v769_v25  ;;  %v1214_v28 = vld [vmem:[#allocation6 + $0xdb8] sm:$0xff]  ;;  %v1213_v25 = vld [vmem:[#allocation6 + $0xdb0] sm:$0xff] }
 0x212   :  { %1735 = vmatprep.subr.mxu0 %v1094_v5  ;;  %1806 = vmatprep.subr.mxu1 %v1222_v8  ;;  %v1182_v56 = vld [vmem:[#allocation6 + $0xcb8] sm:$0xff]  ;;  %v1049_v62 = vld [vmem:[#allocation6 + $0x890] sm:$0xff] }
 0x213   :  { %1736 = vmatpush1.msra.mxu0 %v1093_v15  ;;  %1799 = vmatprep.mubr.f32.mxu0 %v772_v63  ;;  %v1209_v63 = vld [vmem:[#allocation6 + $0xd90] sm:$0xff]  ;;  %v1050_v59 = vld [vmem:[#allocation6 + $0x898] sm:$0xff] }
 0x214   :  { %1807 = vmatpush1.msra.mxu1 %v1221_v1  ;;  %1870 = vmatprep.mubr.f32.mxu1 %v774_v17  ;;  %v1205_v17 = vld [vmem:[#allocation6 + $0xd70] sm:$0xff]  ;;  %v1178_v60 = vld [vmem:[#allocation6 + $0xc98] sm:$0xff] }
 0x215   :  { %1737 = vmatprep.subr.mxu0 %v1090_v21  ;;  %1808 = vmatprep.subr.mxu1 %v1218_v22  ;;  %v1177_v0 = vld [vmem:[#allocation6 + $0xc90] sm:$0xff]  ;;  %v1046_v3 = vld [vmem:[#allocation6 + $0x878] sm:$0xff] }
 0x216   :  { %1738 = vmatpush1.msra.mxu0 %v1089_v29  ;;  %1809 = vmatpush1.msra.mxu1 %v1217_v30  ;;  %v1174_v4 = vld [vmem:[#allocation6 + $0xc78] sm:$0xff]  ;;  %v1045_v12 = vld [vmem:[#allocation6 + $0x870] sm:$0xff] }
 0x217   :  { %1739 = vmatprep.subr.mxu0 %v1086_v20  ;;  %1810 = vmatprep.subr.mxu1 %v1214_v28  ;;  %v1173_v5 = vld [vmem:[#allocation6 + $0xc70] sm:$0xff]  ;;  %v1042_v8 = vld [vmem:[#allocation6 + $0x858] sm:$0xff] }
 0x218   :  { %1740 = vmatpush1.msra.mxu0 %v1085_v19  ;;  %1811 = vmatpush1.msra.mxu1 %v1213_v25  ;;  %v1170_v15 = vld [vmem:[#allocation6 + $0xc58] sm:$0xff]  ;;  %v1041_v1 = vld [vmem:[#allocation6 + $0x850] sm:$0xff] }
 0x219   :  { %1741 = vmatprep.subr.mxu0 %v1082_v31  ;;  %1812 = vmatprep.subr.mxu1 %v1210_v32  ;;  %v1169_v21 = vld [vmem:[#allocation6 + $0xc50] sm:$0xff]  ;;  %v1038_v22 = vld [vmem:[#allocation6 + $0x838] sm:$0xff] }
 0x21a   :  { %1742 = vmatpush1.msra.mxu0 %v1081_v6  ;;  %1813 = vmatpush1.msra.mxu1 %v1209_v63  ;;  %v1166_v29 = vld [vmem:[#allocation6 + $0xc38] sm:$0xff]  ;;  %v1037_v30 = vld [vmem:[#allocation6 + $0x830] sm:$0xff] }
 0x21b   :  { %1743 = vmatprep.subr.mxu0 %v1078_v33  ;;  %1814 = vmatprep.subr.mxu1 %v1206_v34  ;;  %v1165_v20 = vld [vmem:[#allocation6 + $0xc30] sm:$0xff]  ;;  %v1034_v28 = vld [vmem:[#allocation6 + $0x818] sm:$0xff] }
 0x21c   :  { %1744 = vmatpush1.msra.mxu0 %v1077_v7  ;;  %1815 = vmatpush1.msra.mxu1 %v1205_v17  ;;  %v1162_v19 = vld [vmem:[#allocation6 + $0xc18] sm:$0xff]  ;;  %v1033_v25 = vld [vmem:[#allocation6 + $0x810] sm:$0xff] }
 0x21d   :  { %1745 = vmatprep.subr.mxu0 %v1074_v35  ;;  %1816 = vmatprep.subr.mxu1 %v1202_v36  ;;  %v1161_v31 = vld [vmem:[#allocation6 + $0xc10] sm:$0xff]  ;;  %v1158_v32 = vld [vmem:[#allocation6 + $0xbf8] sm:$0xff] }
 0x21e   :  { %1746 = vmatpush1.msra.mxu0 %v1073_v38  ;;  %1817 = vmatpush1.msra.mxu1 %v1201_v39  ;;  %v1286_v6 = vld [vmem:[#allocation6 + $0xff8] sm:$0xff]  ;;  %v1157_v63 = vld [vmem:[#allocation6 + $0xbf0] sm:$0xff] }
 0x21f   :  { %1747 = vmatprep.subr.mxu0 %v1070_v41  ;;  %1818 = vmatprep.subr.mxu1 %v1198_v23  ;;  %v1285_v33 = vld [vmem:[#allocation6 + $0xff0] sm:$0xff]  ;;  %v1154_v34 = vld [vmem:[#allocation6 + $0xbd8] sm:$0xff] }
 0x220   :  { %1748 = vmatpush1.msra.mxu0 %v1069_v26  ;;  %1819 = vmatpush1.msra.mxu1 %v1197_v42  ;;  %v1282_v7 = vld [vmem:[#allocation6 + $0xfd8] sm:$0xff]  ;;  %v1153_v17 = vld [vmem:[#allocation6 + $0xbd0] sm:$0xff] }
 0x221   :  { %1749 = vmatprep.subr.mxu0 %v1066_v45  ;;  %1820 = vmatprep.subr.mxu1 %v1194_v24  ;;  %v1281_v35 = vld [vmem:[#allocation6 + $0xfd0] sm:$0xff]  ;;  %v1150_v36 = vld [vmem:[#allocation6 + $0xbb8] sm:$0xff] }
 0x222   :  { %1750 = vmatpush1.msra.mxu0 %v1065_v27  ;;  %1821 = vmatpush1.msra.mxu1 %v1193_v46  ;;  %v1278_v38 = vld [vmem:[#allocation6 + $0xfb8] sm:$0xff]  ;;  %v1149_v39 = vld [vmem:[#allocation6 + $0xbb0] sm:$0xff] }
 0x223   :  { %1751 = vmatprep.subr.mxu0 %v1062_v47  ;;  %1822 = vmatprep.subr.mxu1 %v1190_v48  ;;  %v1277_v41 = vld [vmem:[#allocation6 + $0xfb0] sm:$0xff]  ;;  %v1146_v23 = vld [vmem:[#allocation6 + $0xb98] sm:$0xff] }
 0x224   :  { %1752 = vmatpush1.msra.mxu0 %v1061_v49  ;;  %1823 = vmatpush1.msra.mxu1 %v1189_v50  ;;  %v1274_v26 = vld [vmem:[#allocation6 + $0xf98] sm:$0xff]  ;;  %v1145_v42 = vld [vmem:[#allocation6 + $0xb90] sm:$0xff] }
 0x225   :  { %1753 = vmatprep.subr.mxu0 %v1058_v51  ;;  %1824 = vmatprep.subr.mxu1 %v1186_v52  ;;  %v1273_v45 = vld [vmem:[#allocation6 + $0xf90] sm:$0xff]  ;;  %v1142_v24 = vld [vmem:[#allocation6 + $0xb78] sm:$0xff] }
 0x226   :  { %1754 = vmatpush1.msra.mxu0 %v1057_v53  ;;  %1825 = vmatpush1.msra.mxu1 %v1185_v54  ;;  %v1270_v27 = vld [vmem:[#allocation6 + $0xf78] sm:$0xff]  ;;  %v1141_v46 = vld [vmem:[#allocation6 + $0xb70] sm:$0xff] }
 0x227   :  { %1755 = vmatprep.subr.mxu0 %v1054_v55  ;;  %1826 = vmatprep.subr.mxu1 %v1182_v56  ;;  %v1269_v47 = vld [vmem:[#allocation6 + $0xf70] sm:$0xff]  ;;  %v1138_v48 = vld [vmem:[#allocation6 + $0xb58] sm:$0xff] }
 0x228   :  { %1756 = vmatpush1.msra.mxu0 %v1053_v57  ;;  %1827 = vmatpush1.msra.mxu1 %v1181_v58  ;;  %v1266_v49 = vld [vmem:[#allocation6 + $0xf58] sm:$0xff]  ;;  %v1137_v50 = vld [vmem:[#allocation6 + $0xb50] sm:$0xff] }
 0x229   :  { %1757 = vmatprep.subr.mxu0 %v1050_v59  ;;  %1828 = vmatprep.subr.mxu1 %v1178_v60  ;;  %v1265_v51 = vld [vmem:[#allocation6 + $0xf50] sm:$0xff]  ;;  %v1134_v52 = vld [vmem:[#allocation6 + $0xb38] sm:$0xff] }
 0x22a   :  { %1758 = vmatpush1.msra.mxu0 %v1049_v62  ;;  %1829 = vmatpush1.msra.mxu1 %v1177_v0  ;;  %v1262_v53 = vld [vmem:[#allocation6 + $0xf38] sm:$0xff]  ;;  %v1133_v54 = vld [vmem:[#allocation6 + $0xb30] sm:$0xff] }
 0x22b   :  { %1759 = vmatprep.subr.mxu0 %v1046_v3  ;;  %1830 = vmatprep.subr.mxu1 %v1174_v4  ;;  %v1261_v55 = vld [vmem:[#allocation6 + $0xf30] sm:$0xff]  ;;  %v1130_v56 = vld [vmem:[#allocation6 + $0xb18] sm:$0xff] }
 0x22c   :  { %1760 = vmatpush1.msra.mxu0 %v1045_v12  ;;  %1831 = vmatpush1.msra.mxu1 %v1173_v5  ;;  %v1258_v57 = vld [vmem:[#allocation6 + $0xf18] sm:$0xff]  ;;  %v1129_v58 = vld [vmem:[#allocation6 + $0xb10] sm:$0xff] }
 0x22d   :  { %1761 = vmatprep.subr.mxu0 %v1042_v8  ;;  %1832 = vmatprep.subr.mxu1 %v1170_v15  ;;  %v1257_v59 = vld [vmem:[#allocation6 + $0xf10] sm:$0xff]  ;;  %v1126_v60 = vld [vmem:[#allocation6 + $0xaf8] sm:$0xff] }
 0x22e   :  { %1762 = vmatpush1.msra.mxu0 %v1041_v1  ;;  %1833 = vmatpush1.msra.mxu1 %v1169_v21  ;;  %v1254_v62 = vld [vmem:[#allocation6 + $0xef8] sm:$0xff]  ;;  %v1125_v0 = vld [vmem:[#allocation6 + $0xaf0] sm:$0xff] }
 0x22f   :  { %1763 = vmatprep.subr.mxu0 %v1038_v22  ;;  %1834 = vmatprep.subr.mxu1 %v1166_v29  ;;  %v1253_v3 = vld [vmem:[#allocation6 + $0xef0] sm:$0xff]  ;;  %v1122_v4 = vld [vmem:[#allocation6 + $0xad8] sm:$0xff] }
 0x230   :  { %1764 = vmatpush1.msra.mxu0 %v1037_v30  ;;  %1835 = vmatpush1.msra.mxu1 %v1165_v20  ;;  %v1250_v12 = vld [vmem:[#allocation6 + $0xed8] sm:$0xff]  ;;  %v1121_v5 = vld [vmem:[#allocation6 + $0xad0] sm:$0xff] }
 0x231   :  { %1765 = vmatprep.subr.mxu0 %v1034_v28  ;;  %1836 = vmatprep.subr.mxu1 %v1162_v19  ;;  %v1249_v8 = vld [vmem:[#allocation6 + $0xed0] sm:$0xff]  ;;  %v1118_v15 = vld [vmem:[#allocation6 + $0xab8] sm:$0xff] }
 0x232   :  { %1766 = vmatpush1.msra.mxu0 %v1033_v25  ;;  %1837 = vmatpush1.msra.mxu1 %v1161_v31  ;;  %v1246_v1 = vld [vmem:[#allocation6 + $0xeb8] sm:$0xff]  ;;  %v1117_v21 = vld [vmem:[#allocation6 + $0xab0] sm:$0xff] }
 0x233   :  { %1767 = vmatprep.subr.mxu0 %v1158_v32  ;;  %1838 = vmatprep.subr.mxu1 %v1286_v6  ;;  %v1245_v22 = vld [vmem:[#allocation6 + $0xeb0] sm:$0xff]  ;;  %v1114_v29 = vld [vmem:[#allocation6 + $0xa98] sm:$0xff] }
 0x234   :  { %1768 = vmatpush2.msra.mxu0 %v1157_v63  ;;  %1839 = vmatpush2.msra.mxu1 %v1285_v33  ;;  %v1242_v30 = vld [vmem:[#allocation6 + $0xe98] sm:$0xff]  ;;  %v1113_v20 = vld [vmem:[#allocation6 + $0xa90] sm:$0xff] }
 0x235   :  { %1769 = vmatprep.subr.mxu0 %v1154_v34  ;;  %1840 = vmatprep.subr.mxu1 %v1282_v7  ;;  %v1241_v28 = vld [vmem:[#allocation6 + $0xe90] sm:$0xff]  ;;  %v1110_v19 = vld [vmem:[#allocation6 + $0xa78] sm:$0xff] }
 0x236   :  { %1770 = vmatpush2.msra.mxu0 %v1153_v17  ;;  %1841 = vmatpush2.msra.mxu1 %v1281_v35  ;;  %v1238_v25 = vld [vmem:[#allocation6 + $0xe78] sm:$0xff]  ;;  %v1109_v31 = vld [vmem:[#allocation6 + $0xa70] sm:$0xff] }
 0x237   :  { %1771 = vmatprep.subr.mxu0 %v1150_v36  ;;  %1842 = vmatprep.subr.mxu1 %v1278_v38  ;;  %v1237_v32 = vld [vmem:[#allocation6 + $0xe70] sm:$0xff]  ;;  %v1106_v6 = vld [vmem:[#allocation6 + $0xa58] sm:$0xff] }
 0x238   :  { %1772 = vmatpush2.msra.mxu0 %v1149_v39  ;;  %1843 = vmatpush2.msra.mxu1 %v1277_v41  ;;  %v1234_v63 = vld [vmem:[#allocation6 + $0xe58] sm:$0xff]  ;;  %v1105_v33 = vld [vmem:[#allocation6 + $0xa50] sm:$0xff] }
 0x239   :  { %1773 = vmatprep.subr.mxu0 %v1146_v23  ;;  %1844 = vmatprep.subr.mxu1 %v1274_v26  ;;  %v1233_v34 = vld [vmem:[#allocation6 + $0xe50] sm:$0xff]  ;;  %v1102_v7 = vld [vmem:[#allocation6 + $0xa38] sm:$0xff] }
 0x23a   :  { %1774 = vmatpush2.msra.mxu0 %v1145_v42  ;;  %1845 = vmatpush2.msra.mxu1 %v1273_v45  ;;  %v1230_v17 = vld [vmem:[#allocation6 + $0xe38] sm:$0xff]  ;;  %v1101_v35 = vld [vmem:[#allocation6 + $0xa30] sm:$0xff] }
 0x23b   :  { %1775 = vmatprep.subr.mxu0 %v1142_v24  ;;  %1846 = vmatprep.subr.mxu1 %v1270_v27  ;;  %v1229_v36 = vld [vmem:[#allocation6 + $0xe30] sm:$0xff]  ;;  %v1098_v38 = vld [vmem:[#allocation6 + $0xa18] sm:$0xff]  ;;  %v1909_v24 = vld [vmem:[#allocation9 + $0xe0] sm:$0xff] }
 0x23c   :  { %1776 = vmatpush2.msra.mxu0 %v1141_v46  ;;  %1847 = vmatpush2.msra.mxu1 %v1269_v47  ;;  %v1226_v39 = vld [vmem:[#allocation6 + $0xe18] sm:$0xff]  ;;  %v1097_v41 = vld [vmem:[#allocation6 + $0xa10] sm:$0xff] }
 0x23d   :  { %1777 = vmatprep.subr.mxu0 %v1138_v48  ;;  %1848 = vmatprep.subr.mxu1 %v1266_v49  ;;  %v1225_v23 = vld [vmem:[#allocation6 + $0xe10] sm:$0xff]  ;;  %v1912_v26 = vld [vmem:[#allocation9 + $0xf8] sm:$0xff] }
 0x23e   :  { %1778 = vmatpush2.msra.mxu0 %v1137_v50  ;;  %1849 = vmatpush2.msra.mxu1 %v1265_v51  ;;  %v1911_v42 = vld [vmem:[#allocation9 + $0xf0] sm:$0xff]  ;;  %v1910_v45 = vld [vmem:[#allocation9 + $0xe8] sm:$0xff]  ;;  %v1908_v27 = vld [vmem:[#allocation9 + $0xd8] sm:$0xff] }
 0x23f   :  { %1779 = vmatprep.subr.mxu0 %v1134_v52  ;;  %1850 = vmatprep.subr.mxu1 %v1262_v53  ;;  %v1907_v46 = vld [vmem:[#allocation9 + $0xd0] sm:$0xff]  ;;  %v1976_v47 = vld [vmem:[#allocation9 + $0x2f8] sm:$0xff]  ;;  %v1974_v49 = vld [vmem:[#allocation9 + $0x2e8] sm:$0xff] }
 0x240   :  { %1780 = vmatpush2.msra.mxu0 %v1133_v54  ;;  %1851 = vmatpush2.msra.mxu1 %v1261_v55  ;;  %v1975_v48 = vld [vmem:[#allocation9 + $0x2f0] sm:$0xff]  ;;  %v1906_v50 = vld [vmem:[#allocation9 + $0xc8] sm:$0xff]  ;;  %v1973_v51 = vld [vmem:[#allocation9 + $0x2e0] sm:$0xff] }
 0x241   :  { %1781 = vmatprep.subr.mxu0 %v1130_v56  ;;  %1852 = vmatprep.subr.mxu1 %v1258_v57  ;;  %v1904_v61 = vld [vmem:[#allocation9 + $0xb8] sm:$0xff]  ;;  %v1903_v52 = vld [vmem:[#allocation9 + $0xb0] sm:$0xff]  ;;  %v1970_v53 = vld [vmem:[#allocation9 + $0x2c8] sm:$0xff] }
 0x242   :  { %1782 = vmatpush2.msra.mxu0 %v1129_v58  ;;  %1853 = vmatpush2.msra.mxu1 %v1257_v59  ;;  %v1902_v54 = vld [vmem:[#allocation9 + $0xa8] sm:$0xff]  ;;  %v1969_v55 = vld [vmem:[#allocation9 + $0x2c0] sm:$0xff]  ;;  %v1968_v57 = vld [vmem:[#allocation9 + $0x2b8] sm:$0xff] }
 0x243   :  { %1783 = vmatprep.subr.mxu0 %v1126_v60  ;;  %1854 = vmatprep.subr.mxu1 %v1254_v62  ;;  %v1901_v56 = vld [vmem:[#allocation9 + $0xa0] sm:$0xff]  ;;  %v1900_v58 = vld [vmem:[#allocation9 + $0x98] sm:$0xff]  ;;  %v1967_v59 = vld [vmem:[#allocation9 + $0x2b0] sm:$0xff] }
 0x244   :  { %1784 = vmatpush2.msra.mxu0 %v1125_v0  ;;  %1855 = vmatpush2.msra.mxu1 %v1253_v3  ;;  %v1899_v60 = vld [vmem:[#allocation9 + $0x90] sm:$0xff]  ;;  %v1966_v62 = vld [vmem:[#allocation9 + $0x2a8] sm:$0xff]  ;;  %v1965_v3 = vld [vmem:[#allocation9 + $0x2a0] sm:$0xff] }
 0x245   :  { %1785 = vmatprep.subr.mxu0 %v1122_v4  ;;  %1856 = vmatprep.subr.mxu1 %v1250_v12  ;;  %v1898_v0 = vld [vmem:[#allocation9 + $0x88] sm:$0xff]  ;;  %v1897_v4 = vld [vmem:[#allocation9 + $0x80] sm:$0xff]  ;;  %v1964_v12 = vld [vmem:[#allocation9 + $0x298] sm:$0xff] }
 0x246   :  { %1786 = vmatpush2.msra.mxu0 %v1121_v5  ;;  %1857 = vmatpush2.msra.mxu1 %v1249_v8  ;;  %v1896_v5 = vld [vmem:[#allocation9 + $0x78] sm:$0xff]  ;;  %v1963_v8 = vld [vmem:[#allocation9 + $0x290] sm:$0xff] }
 0x247   :  { %1787 = vmatprep.subr.mxu0 %v1118_v15  ;;  %1858 = vmatprep.subr.mxu1 %v1246_v1  ;;  %v1895_v15 = vld [vmem:[#allocation9 + $0x70] sm:$0xff]  ;;  %v1962_v1 = vld [vmem:[#allocation9 + $0x288] sm:$0xff] }
 0x248   :  { %1788 = vmatpush2.msra.mxu0 %v1117_v21  ;;  %1859 = vmatpush2.msra.mxu1 %v1245_v22  ;;  %v1894_v21 = vld [vmem:[#allocation9 + $0x68] sm:$0xff]  ;;  %v1961_v22 = vld [vmem:[#allocation9 + $0x280] sm:$0xff] }
 0x249   :  { %1789 = vmatprep.subr.mxu0 %v1114_v29  ;;  %1860 = vmatprep.subr.mxu1 %v1242_v30  ;;  %v1893_v29 = vld [vmem:[#allocation9 + $0x60] sm:$0xff]  ;;  %v1960_v30 = vld [vmem:[#allocation9 + $0x278] sm:$0xff] }
 0x24a   :  { %1790 = vmatpush2.msra.mxu0 %v1113_v20  ;;  %1861 = vmatpush2.msra.mxu1 %v1241_v28  ;;  %v1892_v20 = vld [vmem:[#allocation9 + $0x58] sm:$0xff]  ;;  %v1959_v28 = vld [vmem:[#allocation9 + $0x270] sm:$0xff] }
 0x24b   :  { %1791 = vmatprep.subr.mxu0 %v1110_v19  ;;  %1862 = vmatprep.subr.mxu1 %v1238_v25  ;;  %v1891_v19 = vld [vmem:[#allocation9 + $0x50] sm:$0xff]  ;;  %v1958_v25 = vld [vmem:[#allocation9 + $0x268] sm:$0xff] }
 0x24c   :  { %1792 = vmatpush2.msra.mxu0 %v1109_v31  ;;  %1863 = vmatpush2.msra.mxu1 %v1237_v32  ;;  %v1890_v31 = vld [vmem:[#allocation9 + $0x48] sm:$0xff]  ;;  %v1957_v32 = vld [vmem:[#allocation9 + $0x260] sm:$0xff] }
 0x24d   :  { %1793 = vmatprep.subr.mxu0 %v1106_v6  ;;  %1864 = vmatprep.subr.mxu1 %v1234_v63  ;;  %v1889_v6 = vld [vmem:[#allocation9 + $0x40] sm:$0xff]  ;;  %v1956_v63 = vld [vmem:[#allocation9 + $0x258] sm:$0xff] }
 0x24e   :  { %1794 = vmatpush2.msra.mxu0 %v1105_v33  ;;  %1865 = vmatpush2.msra.mxu1 %v1233_v34  ;;  %v1888_v33 = vld [vmem:[#allocation9 + $0x38] sm:$0xff]  ;;  %v1955_v34 = vld [vmem:[#allocation9 + $0x250] sm:$0xff] }
 0x24f   :  { %1795 = vmatprep.subr.mxu0 %v1102_v7  ;;  %1866 = vmatprep.subr.mxu1 %v1230_v17  ;;  %v1887_v7 = vld [vmem:[#allocation9 + $0x30] sm:$0xff]  ;;  %v1954_v17 = vld [vmem:[#allocation9 + $0x248] sm:$0xff] }
 0x250   :  { %1796 = vmatpush2.msra.mxu0 %v1101_v35  ;;  %1867 = vmatpush2.msra.mxu1 %v1229_v36  ;;  %v1886_v35 = vld [vmem:[#allocation9 + $0x28] sm:$0xff]  ;;  %v1953_v36 = vld [vmem:[#allocation9 + $0x240] sm:$0xff] }
 0x251   :  { %1797 = vmatprep.subr.mxu0 %v1098_v38  ;;  %1868 = vmatprep.subr.mxu1 %v1226_v39  ;;  %v1885_v38 = vld [vmem:[#allocation9 + $0x20] sm:$0xff]  ;;  %v1952_v39 = vld [vmem:[#allocation9 + $0x238] sm:$0xff] }
 0x252   :  { %1798 = vmatpush2.msra.mxu0 %v1097_v41  ;;  %1869 = vmatpush2.msra.mxu1 %v1225_v23  ;;  %v1884_v41 = vld [vmem:[#allocation9 + $0x18] sm:$0xff]  ;;  %v1951_v23 = vld [vmem:[#allocation9 + $0x230] sm:$0xff] }
 0x253   :  { %1800 = vmatmul.mubr.f32.vlgmr.msra.gmra.mxu0 %v771_v18  ;;  %1871 = vmatmul.mubr.f32.vlgmr.msra.gmra.mxu1 %v773_v16  ;;  %v1972_v18 = vld [vmem:[#allocation9 + $0x2d8] sm:$0xff]  ;;  %v1971_v16 = vld [vmem:[#allocation9 + $0x2d0] sm:$0xff] }
 0x254   :  { %2021 = vmatprep.subr.mxu0 %v1912_v26  ;;  %2092 = vmatprep.subr.mxu1 %v1976_v47  ;;  %v1883_v26 = vld [vmem:[#allocation9 + $0x10] sm:$0xff]  ;;  %v1944_v47 = vld [vmem:[#allocation9 + $0x1f8] sm:$0xff] }
 0x255   :  { %2022 = vmatpush1.msra.mxu0 %v1911_v42  ;;  %2093 = vmatpush1.msra.mxu1 %v1975_v48  ;;  %v1950_v42 = vld [vmem:[#allocation9 + $0x228] sm:$0xff]  ;;  %v1947_v48 = vld [vmem:[#allocation9 + $0x210] sm:$0xff] }
 0x256   :  { %2023 = vmatprep.subr.mxu0 %v1910_v45  ;;  %2094 = vmatprep.subr.mxu1 %v1974_v49  ;;  %v1882_v45 = vld [vmem:[#allocation9 + $0x8] sm:$0xff]  ;;  %v1943_v49 = vld [vmem:[#allocation9 + $0x1f0] sm:$0xff] }
 0x257   :  { %2024 = vmatpush1.msra.mxu0 %v1909_v24  ;;  %2095 = vmatpush1.msra.mxu1 %v1973_v51  ;;  %v1949_v24 = vld [vmem:[#allocation9 + $0x220] sm:$0xff]  ;;  %v1942_v51 = vld [vmem:[#allocation9 + $0x1e8] sm:$0xff] }
 0x258   :  { %2025 = vmatprep.subr.mxu0 %v1908_v27  ;;  %2096 = vmatprep.subr.mxu1 %v1972_v18  ;;  %v1881_v27 = vld [vmem:[#allocation9] sm:$0xff] }
 0x259   :  { %2026 = vmatpush1.msra.mxu0 %v1907_v46  ;;  %2097 = vmatpush1.msra.mxu1 %v1971_v16  ;;  %v1948_v46 = vld [vmem:[#allocation9 + $0x218] sm:$0xff]  ;;  %v1941_v18 = vld [vmem:[#allocation9 + $0x1e0] sm:$0xff] }
 0x25a   :  { %2027 = vmatprep.subr.mxu0 %v1906_v50  ;;  %2098 = vmatprep.subr.mxu1 %v1970_v53  ;;  %v1946_v50 = vld [vmem:[#allocation9 + $0x208] sm:$0xff]  ;;  %v1940_v16 = vld [vmem:[#allocation9 + $0x1d8] sm:$0xff]  ;;  %v1939_v53 = vld [vmem:[#allocation9 + $0x1d0] sm:$0xff] }
 0x25b   :  { %2028 = vmatpush1.msra.mxu0 %v1905_v2  ;;  %2099 = vmatpush1.msra.mxu1 %v1969_v55  ;;  %v1945_v2 = vld [vmem:[#allocation9 + $0x200] sm:$0xff]  ;;  %v1938_v55 = vld [vmem:[#allocation9 + $0x1c8] sm:$0xff] }
 0x25c   :  { %2029 = vmatprep.subr.mxu0 %v1904_v61  ;;  %2100 = vmatprep.subr.mxu1 %v1968_v57  ;;  %v2008_v61 = vld [vmem:[#allocation9 + $0x3f8] sm:$0xff]  ;;  %v1937_v57 = vld [vmem:[#allocation9 + $0x1c0] sm:$0xff] }
 0x25d   :  { %2030 = vmatpush1.msra.mxu0 %v1903_v52  ;;  %2101 = vmatpush1.msra.mxu1 %v1967_v59  ;;  %v2007_v52 = vld [vmem:[#allocation9 + $0x3f0] sm:$0xff]  ;;  %v1936_v59 = vld [vmem:[#allocation9 + $0x1b8] sm:$0xff] }
 0x25e   :  { %2031 = vmatprep.subr.mxu0 %v1902_v54  ;;  %2102 = vmatprep.subr.mxu1 %v1966_v62  ;;  %v2006_v54 = vld [vmem:[#allocation9 + $0x3e8] sm:$0xff]  ;;  %v1935_v62 = vld [vmem:[#allocation9 + $0x1b0] sm:$0xff] }
 0x25f   :  { %2032 = vmatpush1.msra.mxu0 %v1901_v56  ;;  %2103 = vmatpush1.msra.mxu1 %v1965_v3  ;;  %v2005_v56 = vld [vmem:[#allocation9 + $0x3e0] sm:$0xff]  ;;  %v1934_v3 = vld [vmem:[#allocation9 + $0x1a8] sm:$0xff] }
 0x260   :  { %2033 = vmatprep.subr.mxu0 %v1900_v58  ;;  %2104 = vmatprep.subr.mxu1 %v1964_v12  ;;  %v2004_v58 = vld [vmem:[#allocation9 + $0x3d8] sm:$0xff]  ;;  %v1933_v12 = vld [vmem:[#allocation9 + $0x1a0] sm:$0xff] }
 0x261   :  { %2034 = vmatpush1.msra.mxu0 %v1899_v60  ;;  %2105 = vmatpush1.msra.mxu1 %v1963_v8  ;;  %v2003_v60 = vld [vmem:[#allocation9 + $0x3d0] sm:$0xff]  ;;  %v1932_v8 = vld [vmem:[#allocation9 + $0x198] sm:$0xff] }
 0x262   :  { %2035 = vmatprep.subr.mxu0 %v1898_v0  ;;  %2106 = vmatprep.subr.mxu1 %v1962_v1  ;;  %v2002_v0 = vld [vmem:[#allocation9 + $0x3c8] sm:$0xff]  ;;  %v1931_v1 = vld [vmem:[#allocation9 + $0x190] sm:$0xff] }
 0x263   :  { %2036 = vmatpush1.msra.mxu0 %v1897_v4  ;;  %2107 = vmatpush1.msra.mxu1 %v1961_v22  ;;  %v2001_v4 = vld [vmem:[#allocation9 + $0x3c0] sm:$0xff]  ;;  %v1930_v22 = vld [vmem:[#allocation9 + $0x188] sm:$0xff] }
 0x264   :  { %2037 = vmatprep.subr.mxu0 %v1896_v5  ;;  %2108 = vmatprep.subr.mxu1 %v1960_v30  ;;  %v2000_v5 = vld [vmem:[#allocation9 + $0x3b8] sm:$0xff]  ;;  %v1929_v30 = vld [vmem:[#allocation9 + $0x180] sm:$0xff] }
 0x265   :  { %2038 = vmatpush1.msra.mxu0 %v1895_v15  ;;  %2109 = vmatpush1.msra.mxu1 %v1959_v28  ;;  %v1999_v15 = vld [vmem:[#allocation9 + $0x3b0] sm:$0xff]  ;;  %v1928_v28 = vld [vmem:[#allocation9 + $0x178] sm:$0xff] }
 0x266   :  { %2039 = vmatprep.subr.mxu0 %v1894_v21  ;;  %2110 = vmatprep.subr.mxu1 %v1958_v25  ;;  %v1998_v21 = vld [vmem:[#allocation9 + $0x3a8] sm:$0xff]  ;;  %v1927_v25 = vld [vmem:[#allocation9 + $0x170] sm:$0xff] }
 0x267   :  { %2040 = vmatpush1.msra.mxu0 %v1893_v29  ;;  %2111 = vmatpush1.msra.mxu1 %v1957_v32  ;;  %v1997_v29 = vld [vmem:[#allocation9 + $0x3a0] sm:$0xff]  ;;  %v1926_v32 = vld [vmem:[#allocation9 + $0x168] sm:$0xff] }
 0x268   :  { %2041 = vmatprep.subr.mxu0 %v1892_v20  ;;  %2112 = vmatprep.subr.mxu1 %v1956_v63  ;;  %v1996_v20 = vld [vmem:[#allocation9 + $0x398] sm:$0xff] }
 0x269   :  { %2042 = vmatpush1.msra.mxu0 %v1891_v19  ;;  %2113 = vmatpush1.msra.mxu1 %v1955_v34  ;;  %v1995_v19 = vld [vmem:[#allocation9 + $0x390] sm:$0xff]  ;;  %v4657_v63 = vld [vmem:[#allocation7] sm:$0xf] }
 0x26a   :  { %2043 = vmatprep.subr.mxu0 %v1890_v31  ;;  %2114 = vmatprep.subr.mxu1 %v1954_v17  ;;  %v1994_v31 = vld [vmem:[#allocation9 + $0x388] sm:$0xff]  ;;  %v1992_v34 = vld [vmem:[#allocation9 + $0x378] sm:$0xff]  ;;  %v1991_v17 = vld [vmem:[#allocation9 + $0x370] sm:$0xff] }
 0x26b   :  { %2044 = vmatpush1.msra.mxu0 %v1889_v6  ;;  %2115 = vmatpush1.msra.mxu1 %v1953_v36  ;;  %v1993_v6 = vld [vmem:[#allocation9 + $0x380] sm:$0xff]  ;;  %v1923_v36 = vld [vmem:[#allocation9 + $0x150] sm:$0xff] }
 0x26c   :  { %2045 = vmatprep.subr.mxu0 %v1888_v33  ;;  %2116 = vmatprep.subr.mxu1 %v1952_v39  ;;  %v1925_v33 = vld [vmem:[#allocation9 + $0x160] sm:$0xff]  ;;  %v1292_v39 = vrot.slane %v4657_v63, %v4567_v11 }
 0x26d   :  { %2046 = vmatpush1.msra.mxu0 %v1887_v7  ;;  %2117 = vmatpush1.msra.mxu1 %v1951_v23  ;;  %v1924_v7 = vld [vmem:[#allocation9 + $0x158] sm:$0xff]  ;;  %v1989_v23 = vld [vmem:[#allocation9 + $0x360] sm:$0xff] }
 0x26e   :  { %2047 = vmatprep.subr.mxu0 %v1886_v35  ;;  %2118 = vmatprep.subr.mxu1 %v1950_v42  ;;  %v1375_v35 = vpop.f32.mrf.mxu0  ;;  %v1988_v42 = vld [vmem:[#allocation9 + $0x358] sm:$0xff] }
 0x26f   :  { %2048 = vmatpush1.msra.mxu0 %v1885_v38  ;;  %2119 = vmatpush1.msra.mxu1 %v1949_v24  ;;  %v1990_v38 = vld [vmem:[#allocation9 + $0x368] sm:$0xff]  ;;  %v1920_v24 = vld [vmem:[#allocation9 + $0x138] sm:$0xff] }
 0x270   :  { %2049 = vmatprep.subr.mxu0 %v1884_v41  ;;  %2120 = vmatprep.subr.mxu1 %v1948_v46  ;;  %v1922_v41 = vld [vmem:[#allocation9 + $0x148] sm:$0xff]  ;;  %v1446_v46 = vpop.f32.mrf.mxu1 }
 0x271   :  { %2050 = vmatpush1.msra.mxu0 %v1883_v26  ;;  %2121 = vmatpush1.msra.mxu1 %v1947_v48  ;;  %v1921_v26 = vld [vmem:[#allocation9 + $0x140] sm:$0xff]  ;;  %v1919_v48 = vld [vmem:[#allocation9 + $0x130] sm:$0xff] }
 0x272   :  { %2051 = vmatprep.subr.mxu0 %v1882_v45  ;;  %2122 = vmatprep.subr.mxu1 %v1946_v50  ;;  %v1296_v45 = vrot.slane %v4657_v63, %v4572_v13  ;;  %v1918_v50 = vld [vmem:[#allocation9 + $0x128] sm:$0xff] }
 0x273   :  { %2052 = vmatpush1.msra.mxu0 %v1881_v27  ;;  %2123 = vmatpush1.msra.mxu1 %v1945_v2  ;;  %v1987_v27 = vld [vmem:[#allocation9 + $0x350] sm:$0xff] }
 0x274   :  { %2053 = vmatprep.subr.mxu0 %v1944_v47  ;;  %2124 = vmatprep.subr.mxu1 %v2008_v61  ;;  %v1377_v47 = vpop.f32.mrf.mxu0  ;;  %v1448_v61 = vpop.f32.mrf.mxu1 }
 0x275   :  { %2054 = vmatpush2.msra.mxu0 %v1943_v49  ;;  %2125 = vmatpush2.msra.mxu1 %v2007_v52  ;;  %v1376_v49 = vadd.f32 %v1375_v35, %v1292_v39  ;;  %v1378_v2 = vadd.f32 %v1377_v47, %v1296_v45  ;;  %v2210_v35 = vld [vmem:[#allocation12 + $0x168] sm:$0xff]  ;;  %v2205_v39 = vld [vmem:[#allocation12 + $0x140] sm:$0xff] }
 0x276   :  { %2055 = vmatprep.subr.mxu0 %v1942_v51  ;;  %2126 = vmatprep.subr.mxu1 %v2006_v54  ;;  %v1917_v51 = vld [vmem:[#allocation9 + $0x120] sm:$0xff]  ;;  %v2194_v45 = vld [vmem:[#allocation12 + $0xe8] sm:$0xff] }
 0x277   :  { %2056 = vmatpush2.msra.mxu0 %v1941_v18  ;;  %2127 = vmatpush2.msra.mxu1 %v2005_v56  ;;  %v1916_v18 = vld [vmem:[#allocation9 + $0x118] sm:$0xff]  ;;  %v1447_v52 = vadd.f32 %v1446_v46, %v1376_v49  ;;  %v1913_v56 = vld [vmem:[#allocation9 + $0x100] sm:$0xff]  ;;  %v2186_v47 = vld [vmem:[#allocation12 + $0xa8] sm:$0xff] }
 0x278   :  { %2057 = vmatprep.subr.mxu0 %v1940_v16  ;;  %2128 = vmatprep.subr.mxu1 %v2004_v58  ;;  %v1915_v16 = vld [vmem:[#allocation9 + $0x110] sm:$0xff]  ;;  %v2189_v46 = vld [vmem:[#allocation12 + $0xc0] sm:$0xff] }
 0x279   :  { %2058 = vmatpush2.msra.mxu0 %v1939_v53  ;;  %2129 = vmatpush2.msra.mxu1 %v2003_v60  ;;  %v1914_v53 = vld [vmem:[#allocation9 + $0x108] sm:$0xff] }
 0x27a   :  { %2059 = vmatprep.subr.mxu0 %v1938_v55  ;;  %2130 = vmatprep.subr.mxu1 %v2002_v0  ;;  %v1986_v60 = vld [vmem:[#allocation9 + $0x348] sm:$0xff]  ;;  %v1985_v0 = vld [vmem:[#allocation9 + $0x340] sm:$0xff] }
 0x27b   :  { %2060 = vmatpush2.msra.mxu0 %v1937_v57  ;;  %2131 = vmatpush2.msra.mxu1 %v2001_v4  ;;  %v1449_v57 = vadd.f32 %v1448_v61, %v1378_v2  ;;  %v2182_v49 = vld [vmem:[#allocation12 + $0x88] sm:$0xff]  ;;  %v2177_v2 = vld [vmem:[#allocation12 + $0x60] sm:$0xff] }
 0x27c   :  { %2061 = vmatprep.subr.mxu0 %v1936_v59  ;;  %2132 = vmatprep.subr.mxu1 %v2000_v5  ;;  %v2173_v61 = vld [vmem:[#allocation12 + $0x40] sm:$0xff] }
 0x27d   :  { %2062 = vmatpush2.msra.mxu0 %v1935_v62  ;;  %2133 = vmatpush2.msra.mxu1 %v1999_v15  ;;  %v1982_v15 = vld [vmem:[#allocation9 + $0x328] sm:$0xff] }
 0x27e   :  { %2063 = vmatprep.subr.mxu0 %v1934_v3  ;;  %2134 = vmatprep.subr.mxu1 %v1998_v21  ;;  %v1981_v21 = vld [vmem:[#allocation9 + $0x320] sm:$0xff] }
 0x27f   :  { %2064 = vmatpush2.msra.mxu0 %v1933_v12  ;;  %2135 = vmatpush2.msra.mxu1 %v1997_v29  ;;  %v1984_v12 = vld [vmem:[#allocation9 + $0x338] sm:$0xff] }
 0x280   :  { %2065 = vmatprep.subr.mxu0 %v1932_v8  ;;  %2136 = vmatprep.subr.mxu1 %v1996_v20  ;;  %v1983_v8 = vld [vmem:[#allocation9 + $0x330] sm:$0xff]  ;;  %v1980_v29 = vld [vmem:[#allocation9 + $0x318] sm:$0xff]  ;;  %v1978_v20 = vld [vmem:[#allocation9 + $0x308] sm:$0xff] }
 0x281   :  { %2066 = vmatpush2.msra.mxu0 %v1931_v1  ;;  %2137 = vmatpush2.msra.mxu1 %v1995_v19  ;;  %v2226_v19 = vld [vmem:[#allocation12 + $0x1e8] sm:$0xff] }
 0x282   :  { %2067 = vmatprep.subr.mxu0 %v1930_v22  ;;  %2138 = vmatprep.subr.mxu1 %v1994_v31  ;;  %v2225_v31 = vld [vmem:[#allocation12 + $0x1e0] sm:$0xff] }
 0x283   :  { %2068 = vmatpush2.msra.mxu0 %v1929_v30  ;;  %2139 = vmatpush2.msra.mxu1 %v1993_v6  ;;  %v1979_v30 = vld [vmem:[#allocation9 + $0x310] sm:$0xff]  ;;  %v2221_v6 = vld [vmem:[#allocation12 + $0x1c0] sm:$0xff] }
 0x284   :  { %2069 = vmatprep.subr.mxu0 %v1928_v28  ;;  %2140 = vmatprep.subr.mxu1 %v1992_v34  ;;  %v1977_v28 = vld [vmem:[#allocation9 + $0x300] sm:$0xff] }
 0x285   :  { %2070 = vmatpush2.msra.mxu0 %v1927_v25  ;;  %2141 = vmatpush2.msra.mxu1 %v1991_v17  ;;  %v2228_v25 = vld [vmem:[#allocation12 + $0x1f8] sm:$0xff]  ;;  %v2217_v34 = vld [vmem:[#allocation12 + $0x1a0] sm:$0xff] }
 0x286   :  { %2071 = vmatprep.subr.mxu0 %v1926_v32  ;;  %2142 = vmatprep.subr.mxu1 %v1990_v38  ;;  %v2222_v32 = vld [vmem:[#allocation12 + $0x1c8] sm:$0xff]  ;;  %v2213_v17 = vld [vmem:[#allocation12 + $0x180] sm:$0xff] }
 0x287   :  { %2072 = vmatpush2.msra.mxu0 %v1925_v33  ;;  %2143 = vmatpush2.msra.mxu1 %v1989_v23  ;;  %v2218_v33 = vld [vmem:[#allocation12 + $0x1a8] sm:$0xff]  ;;  %v2201_v23 = vld [vmem:[#allocation12 + $0x120] sm:$0xff] }
 0x288   :  { %2073 = vmatprep.subr.mxu0 %v1924_v7  ;;  %2144 = vmatprep.subr.mxu1 %v1988_v42  ;;  %v2214_v7 = vld [vmem:[#allocation12 + $0x188] sm:$0xff]  ;;  %v2197_v42 = vld [vmem:[#allocation12 + $0x100] sm:$0xff] }
 0x289   :  { %2074 = vmatpush2.msra.mxu0 %v1923_v36  ;;  %2145 = vmatpush2.msra.mxu1 %v1987_v27  ;;  %v2209_v36 = vld [vmem:[#allocation12 + $0x160] sm:$0xff]  ;;  %v2206_v38 = vld [vmem:[#allocation12 + $0x148] sm:$0xff] }
 0x28a   :  { %2075 = vmatprep.subr.mxu0 %v1922_v41  ;;  %2146 = vmatprep.subr.mxu1 %v1986_v60  ;;  %v2202_v41 = vld [vmem:[#allocation12 + $0x128] sm:$0xff]  ;;  %v2281_v60 = vld [vmem:[#allocation12 + $0x3a0] sm:$0xff] }
 0x28b   :  { %2076 = vmatpush2.msra.mxu0 %v1921_v26  ;;  %2147 = vmatpush2.msra.mxu1 %v1985_v0  ;;  %v2198_v26 = vld [vmem:[#allocation12 + $0x108] sm:$0xff]  ;;  %v2277_v0 = vld [vmem:[#allocation12 + $0x380] sm:$0xff] }
 0x28c   :  { %2077 = vmatprep.subr.mxu0 %v1920_v24  ;;  %2148 = vmatprep.subr.mxu1 %v1984_v12  ;;  %v2193_v24 = vld [vmem:[#allocation12 + $0xe0] sm:$0xff]  ;;  %v2190_v27 = vld [vmem:[#allocation12 + $0xc8] sm:$0xff] }
 0x28d   :  { %2078 = vmatpush2.msra.mxu0 %v1919_v48  ;;  %2149 = vmatpush2.msra.mxu1 %v1983_v8  ;;  %v2185_v48 = vld [vmem:[#allocation12 + $0xa0] sm:$0xff]  ;;  %v2270_v12 = vld [vmem:[#allocation12 + $0x348] sm:$0xff] }
 0x28e   :  { %2079 = vmatprep.subr.mxu0 %v1918_v50  ;;  %2150 = vmatprep.subr.mxu1 %v1982_v15  ;;  %v2181_v50 = vld [vmem:[#allocation12 + $0x80] sm:$0xff]  ;;  %v2266_v8 = vld [vmem:[#allocation12 + $0x328] sm:$0xff] }
 0x28f   :  { %2080 = vmatpush2.msra.mxu0 %v1917_v51  ;;  %2151 = vmatpush2.msra.mxu1 %v1981_v21  ;;  %v2178_v51 = vld [vmem:[#allocation12 + $0x68] sm:$0xff]  ;;  %v2265_v15 = vld [vmem:[#allocation12 + $0x320] sm:$0xff] }
 0x290   :  { %v1517_v54 = vpop.f32.mrf.mxu0  ;;  %v1588_v55 = vpop.f32.mrf.mxu1  ;;  %2081 = vmatprep.subr.mxu0 %v1916_v18  ;;  %2152 = vmatprep.subr.mxu1 %v1980_v29  ;;  %v2174_v18 = vld [vmem:[#allocation12 + $0x48] sm:$0xff]  ;;  %v2261_v29 = vld [vmem:[#allocation12 + $0x300] sm:$0xff] }
 0x291   :  { %v1518_v58 = vadd.f32 %v1517_v54, %v1447_v52  ;;  %2082 = vmatpush2.msra.mxu0 %v1915_v16  ;;  %2153 = vmatpush2.msra.mxu1 %v1979_v30  ;;  %v2170_v16 = vld [vmem:[#allocation12 + $0x28] sm:$0xff]  ;;  %v2169_v52 = vld [vmem:[#allocation12 + $0x20] sm:$0xff] }
 0x292   :  { %v1519_v59 = vpop.f32.mrf.mxu0  ;;  %2083 = vmatprep.subr.mxu0 %v1914_v53  ;;  %v1590_v4 = vpop.f32.mrf.mxu1  ;;  %2154 = vmatprep.subr.mxu1 %v1978_v20  ;;  %v2166_v53 = vld [vmem:[#allocation12 + $0x8] sm:$0xff]  ;;  %v2165_v54 = vld [vmem:[#allocation12] sm:$0xff]  ;;  %v1304_v20 = vrot.slane %v4657_v63, %v4575_v14 }
 0x293   :  { %v1520_v62 = vadd.f32 %v1519_v59, %v1449_v57  ;;  %2084 = vmatpush2.msra.mxu0 %v1913_v56  ;;  %v1589_v3 = vadd.f32 %v1588_v55, %v1518_v58  ;;  %2155 = vmatpush2.msra.mxu1 %v1977_v28  ;;  %v2290_v55 = vld [vmem:[#allocation12 + $0x3e8] sm:$0xff]  ;;  %v2289_v56 = vld [vmem:[#allocation12 + $0x3e0] sm:$0xff] }
 0x294   :  { %2315 = vmatprep.subr.mxu0 %v2226_v19  ;;  %2386 = vmatprep.subr.mxu1 %v2228_v25  ;;  %v2286_v57 = vld [vmem:[#allocation12 + $0x3c8] sm:$0xff]  ;;  %v2285_v58 = vld [vmem:[#allocation12 + $0x3c0] sm:$0xff] }
 0x295   :  { %v1591_v5 = vadd.f32 %v1590_v4, %v1520_v62  ;;  %v1877_v22 = vmax.f32 %v1589_v3, 0.0  ;;  %v2282_v59 = vld [vmem:[#allocation12 + $0x3a8] sm:$0xff]  ;;  %v2273_v4 = vld [vmem:[#allocation12 + $0x360] sm:$0xff] }
 0x296   :  { %v2278_v62 = vld [vmem:[#allocation12 + $0x388] sm:$0xff]  ;;  %v2257_v28 = vld [vmem:[#allocation12 + $0x2e0] sm:$0xff] }
 0x297   :  { %v1878_v1 = vmax.f32 %v1591_v5, 0.0  ;;  %v2274_v3 = vld [vmem:[#allocation12 + $0x368] sm:$0xff]  ;;  %v2269_v5 = vld [vmem:[#allocation12 + $0x340] sm:$0xff] }
 0x298   :  { %v2262_v21 = vld [vmem:[#allocation12 + $0x308] sm:$0xff] }
 0x299   :  { %2085 = vmatprep.mubr.f32.mxu0 %v1878_v1  ;;  %v2258_v30 = vld [vmem:[#allocation12 + $0x2e8] sm:$0xff] }
 0x29a   :  { %2086 = vmatmul.mubr.f32.vlgmr.msra.gmra.mxu0 %v1877_v22  ;;  %v1300_v22 = vrot.slane %v4657_v63, %v4564_v10  ;;  %v2245_v63 = vld [vmem:[#allocation12 + $0x280] sm:$0xff] }
 0x29b   :  { %2316 = vmatpush1.msra.mxu0 %v2225_v31  ;;  %v2254_v31 = vld [vmem:[#allocation12 + $0x2c8] sm:$0xff] }
 0x29c   :  { %2317 = vmatprep.subr.mxu0 %v2222_v32 }
 0x29d   :  { %2318 = vmatpush1.msra.mxu0 %v2221_v6  ;;  %v2253_v6 = vld [vmem:[#allocation12 + $0x2c0] sm:$0xff] }
 0x29e   :  { %2319 = vmatprep.subr.mxu0 %v2218_v33  ;;  %v2250_v33 = vld [vmem:[#allocation12 + $0x2a8] sm:$0xff] }
 0x29f   :  { %2320 = vmatpush1.msra.mxu0 %v2217_v34 }
 0x2a0   :  { %2321 = vmatprep.subr.mxu0 %v2214_v7  ;;  %v2249_v7 = vld [vmem:[#allocation12 + $0x2a0] sm:$0xff] }
 0x2a1   :  { %2322 = vmatpush1.msra.mxu0 %v2213_v17 }
 0x2a2   :  { %2323 = vmatprep.subr.mxu0 %v2210_v35  ;;  %v2246_v35 = vld [vmem:[#allocation12 + $0x288] sm:$0xff] }
 0x2a3   :  { %2324 = vmatpush1.msra.mxu0 %v2209_v36 }
 0x2a4   :  { %2325 = vmatprep.subr.mxu0 %v2206_v38 }
 0x2a5   :  { %2326 = vmatpush1.msra.mxu0 %v2205_v39 }
 0x2a6   :  { %2327 = vmatprep.subr.mxu0 %v2202_v41 }
 0x2a7   :  { %2328 = vmatpush1.msra.mxu0 %v2201_v23 }
 0x2a8   :  { %2329 = vmatprep.subr.mxu0 %v2198_v26 }
 0x2a9   :  { %2330 = vmatpush1.msra.mxu0 %v2197_v42 }
 0x2aa   :  { %2331 = vmatprep.subr.mxu0 %v2194_v45 }
 0x2ab   :  { %2332 = vmatpush1.msra.mxu0 %v2193_v24 }
 0x2ac   :  { %2333 = vmatprep.subr.mxu0 %v2190_v27 }
 0x2ad   :  { %2334 = vmatpush1.msra.mxu0 %v2189_v46 }
 0x2ae   :  { %2335 = vmatprep.subr.mxu0 %v2186_v47 }
 0x2af   :  { %2336 = vmatpush1.msra.mxu0 %v2185_v48  ;;  %v2227_v48 = vld [vmem:[#allocation12 + $0x1f0] sm:$0xff] }
 0x2b0   :  { %2337 = vmatprep.subr.mxu0 %v2182_v49  ;;  %v2224_v49 = vld [vmem:[#allocation12 + $0x1d8] sm:$0xff] }
 0x2b1   :  { %2338 = vmatpush1.msra.mxu0 %v2181_v50  ;;  %v2223_v50 = vld [vmem:[#allocation12 + $0x1d0] sm:$0xff] }
 0x2b2   :  { %2339 = vmatprep.subr.mxu0 %v2178_v51  ;;  %v2220_v51 = vld [vmem:[#allocation12 + $0x1b8] sm:$0xff] }
 0x2b3   :  { %2340 = vmatpush1.msra.mxu0 %v2177_v2  ;;  %v2219_v2 = vld [vmem:[#allocation12 + $0x1b0] sm:$0xff] }
 0x2b4   :  { %2341 = vmatprep.subr.mxu0 %v2174_v18  ;;  %v2216_v18 = vld [vmem:[#allocation12 + $0x198] sm:$0xff] }
 0x2b5   :  { %2342 = vmatpush1.msra.mxu0 %v2173_v61  ;;  %v2215_v61 = vld [vmem:[#allocation12 + $0x190] sm:$0xff] }
 0x2b6   :  { %2343 = vmatprep.subr.mxu0 %v2170_v16  ;;  %v2212_v16 = vld [vmem:[#allocation12 + $0x178] sm:$0xff] }
 0x2b7   :  { %2344 = vmatpush1.msra.mxu0 %v2169_v52  ;;  %v2211_v52 = vld [vmem:[#allocation12 + $0x170] sm:$0xff] }
 0x2b8   :  { %2345 = vmatprep.subr.mxu0 %v2166_v53  ;;  %v2208_v53 = vld [vmem:[#allocation12 + $0x158] sm:$0xff] }
 0x2b9   :  { %2346 = vmatpush1.msra.mxu0 %v2165_v54  ;;  %v2207_v54 = vld [vmem:[#allocation12 + $0x150] sm:$0xff] }
 0x2ba   :  { %2347 = vmatprep.subr.mxu0 %v2290_v55  ;;  %v2204_v55 = vld [vmem:[#allocation12 + $0x138] sm:$0xff] }
 0x2bb   :  { %2348 = vmatpush2.msra.mxu0 %v2289_v56  ;;  %v2203_v56 = vld [vmem:[#allocation12 + $0x130] sm:$0xff] }
 0x2bc   :  { %2349 = vmatprep.subr.mxu0 %v2286_v57  ;;  %v2200_v57 = vld [vmem:[#allocation12 + $0x118] sm:$0xff] }
 0x2bd   :  { %2350 = vmatpush2.msra.mxu0 %v2285_v58  ;;  %v2199_v58 = vld [vmem:[#allocation12 + $0x110] sm:$0xff] }
 0x2be   :  { %2351 = vmatprep.subr.mxu0 %v2282_v59  ;;  %v2196_v59 = vld [vmem:[#allocation12 + $0xf8] sm:$0xff] }
 0x2bf   :  { %2352 = vmatpush2.msra.mxu0 %v2281_v60  ;;  %v2195_v60 = vld [vmem:[#allocation12 + $0xf0] sm:$0xff] }
 0x2c0   :  { %2353 = vmatprep.subr.mxu0 %v2278_v62  ;;  %v2192_v62 = vld [vmem:[#allocation12 + $0xd8] sm:$0xff] }
 0x2c1   :  { %2354 = vmatpush2.msra.mxu0 %v2277_v0  ;;  %v2191_v0 = vld [vmem:[#allocation12 + $0xd0] sm:$0xff] }
 0x2c2   :  { %2355 = vmatprep.subr.mxu0 %v2274_v3  ;;  %v2188_v3 = vld [vmem:[#allocation12 + $0xb8] sm:$0xff] }
 0x2c3   :  { %2356 = vmatpush2.msra.mxu0 %v2273_v4  ;;  %v2187_v4 = vld [vmem:[#allocation12 + $0xb0] sm:$0xff] }
 0x2c4   :  { %2357 = vmatprep.subr.mxu0 %v2270_v12  ;;  %v2184_v12 = vld [vmem:[#allocation12 + $0x98] sm:$0xff] }
 0x2c5   :  { %2358 = vmatpush2.msra.mxu0 %v2269_v5  ;;  %v2183_v5 = vld [vmem:[#allocation12 + $0x90] sm:$0xff] }
 0x2c6   :  { %2359 = vmatprep.subr.mxu0 %v2266_v8  ;;  %v2180_v8 = vld [vmem:[#allocation12 + $0x78] sm:$0xff] }
 0x2c7   :  { %2360 = vmatpush2.msra.mxu0 %v2265_v15  ;;  %v2179_v15 = vld [vmem:[#allocation12 + $0x70] sm:$0xff] }
 0x2c8   :  { %2361 = vmatprep.subr.mxu0 %v2262_v21  ;;  %v2175_v21 = vld [vmem:[#allocation12 + $0x50] sm:$0xff] }
 0x2c9   :  { %2362 = vmatpush2.msra.mxu0 %v2261_v29  ;;  %v2171_v29 = vld [vmem:[#allocation12 + $0x30] sm:$0xff] }
 0x2ca   :  { %2363 = vmatprep.subr.mxu0 %v2258_v30  ;;  %v2168_v30 = vld [vmem:[#allocation12 + $0x18] sm:$0xff] }
 0x2cb   :  { %2364 = vmatpush2.msra.mxu0 %v2257_v28  ;;  %v2292_v28 = vld [vmem:[#allocation12 + $0x3f8] sm:$0xff] }
 0x2cc   :  { %2365 = vmatprep.subr.mxu0 %v2254_v31  ;;  %v2287_v31 = vld [vmem:[#allocation12 + $0x3d0] sm:$0xff] }
 0x2cd   :  { %2366 = vmatpush2.msra.mxu0 %v2253_v6  ;;  %v2283_v6 = vld [vmem:[#allocation12 + $0x3b0] sm:$0xff] }
 0x2ce   :  { %2367 = vmatprep.subr.mxu0 %v2250_v33  ;;  %v2280_v33 = vld [vmem:[#allocation12 + $0x398] sm:$0xff] }
 0x2cf   :  { %2368 = vmatpush2.msra.mxu0 %v2249_v7  ;;  %v2276_v7 = vld [vmem:[#allocation12 + $0x378] sm:$0xff] }
 0x2d0   :  { %2369 = vmatprep.subr.mxu0 %v2246_v35  ;;  %v2272_v35 = vld [vmem:[#allocation12 + $0x358] sm:$0xff] }
 0x2d1   :  { %v1659_v1 = vpop.f32.mrf.mxu0  ;;  %v1730_v19 = vpop.f32.mrf.mxu1  ;;  %2370 = vmatpush2.msra.mxu0 %v2245_v63  ;;  %v2268_v63 = vld [vmem:[#allocation12 + $0x338] sm:$0xff] }
 0x2d2   :  { %v1660_v32 = vadd.f32 %v1659_v1, %v1300_v22  ;;  %v2176_v1 = vld [vmem:[#allocation12 + $0x58] sm:$0xff] }
 0x2d3   :  { %v1661_v25 = vpop.f32.mrf.mxu0  ;;  %v1732_v17 = vpop.f32.mrf.mxu1  ;;  %v2172_v22 = vld [vmem:[#allocation12 + $0x38] sm:$0xff] }
 0x2d4   :  { %v1662_v34 = vadd.f32 %v1661_v25, %v1304_v20  ;;  %v1731_v36 = vadd.f32 %v1730_v19, %v1660_v32  ;;  %v2167_v20 = vld [vmem:[#allocation12 + $0x10] sm:$0xff]  ;;  %v2288_v25 = vld [vmem:[#allocation12 + $0x3d8] sm:$0xff] }
 0x2d5   :  { %v2291_v19 = vld [vmem:[#allocation12 + $0x3f0] sm:$0xff]  ;;  %v2284_v32 = vld [vmem:[#allocation12 + $0x3b8] sm:$0xff] }
 0x2d6   :  { %v1733_v41 = vadd.f32 %v1732_v17, %v1662_v34  ;;  %v2279_v34 = vld [vmem:[#allocation12 + $0x390] sm:$0xff] }
 0x2d7   :  { %v2275_v17 = vld [vmem:[#allocation12 + $0x370] sm:$0xff] }
 0x313   :  { %v1801_v38 = vpop.f32.mrf.mxu0  ;;  %v1872_v39 = vpop.f32.mrf.mxu1 }
 0x314   :  { %v1802_v23 = vadd.f32 %v1801_v38, %v1731_v36  ;;  %v2271_v36 = vld [vmem:[#allocation12 + $0x350] sm:$0xff] }
 0x315   :  { %v1803_v26 = vpop.f32.mrf.mxu0  ;;  %v1874_v24 = vpop.f32.mrf.mxu1  ;;  %v2267_v38 = vld [vmem:[#allocation12 + $0x330] sm:$0xff] }
 0x316   :  { %v1804_v42 = vadd.f32 %v1803_v26, %v1733_v41  ;;  %v1873_v45 = vadd.f32 %v1872_v39, %v1802_v23  ;;  %v2264_v39 = vld [vmem:[#allocation12 + $0x318] sm:$0xff]  ;;  %v2263_v41 = vld [vmem:[#allocation12 + $0x310] sm:$0xff] }
 0x317   :  { %v2260_v23 = vld [vmem:[#allocation12 + $0x2f8] sm:$0xff]  ;;  %v2259_v26 = vld [vmem:[#allocation12 + $0x2f0] sm:$0xff] }
 0x318   :  { %v1875_v27 = vadd.f32 %v1874_v24, %v1804_v42  ;;  %v1879_v47 = vmax.f32 %v1873_v45, 0.0  ;;  %v2256_v42 = vld [vmem:[#allocation12 + $0x2d8] sm:$0xff]  ;;  %v2255_v45 = vld [vmem:[#allocation12 + $0x2d0] sm:$0xff] }
 0x319   :  { %v2252_v24 = vld [vmem:[#allocation12 + $0x2b8] sm:$0xff] }
 0x31a   :  { %v1880_v46 = vmax.f32 %v1875_v27, 0.0  ;;  %v2251_v27 = vld [vmem:[#allocation12 + $0x2b0] sm:$0xff] }
 0x31c   :  { %2156 = vmatprep.mubr.f32.mxu1 %v1880_v46  ;;  %v2248_v46 = vld [vmem:[#allocation12 + $0x298] sm:$0xff] }
 0x31d   :  { %2157 = vmatmul.mubr.f32.vlgmr.msra.gmra.mxu1 %v1879_v47  ;;  %v2247_v47 = vld [vmem:[#allocation12 + $0x290] sm:$0xff] }
 0x31e   :  { %2387 = vmatpush1.msra.mxu1 %v2227_v48  ;;  %v2242_v48 = vld [vmem:[#allocation12 + $0x268] sm:$0xff] }
 0x31f   :  { %2388 = vmatprep.subr.mxu1 %v2224_v49  ;;  %v2244_v49 = vld [vmem:[#allocation12 + $0x278] sm:$0xff]  ;;  %2371 = vmatprep.subr.mxu0 %v2242_v48  ;;  %v2533_v48 = vld [vmem:[#allocation15 + $0x240] sm:$0xff] }
 0x320   :  { %2389 = vmatpush1.msra.mxu1 %v2223_v50  ;;  %v2241_v50 = vld [vmem:[#allocation12 + $0x260] sm:$0xff] }
 0x321   :  { %2390 = vmatprep.subr.mxu1 %v2220_v51  ;;  %v2243_v51 = vld [vmem:[#allocation12 + $0x270] sm:$0xff]  ;;  %2372 = vmatpush2.msra.mxu0 %v2241_v50 }
 0x322   :  { %2391 = vmatpush1.msra.mxu1 %v2219_v2  ;;  %v2238_v2 = vld [vmem:[#allocation12 + $0x248] sm:$0xff] }
 0x323   :  { %2392 = vmatprep.subr.mxu1 %v2216_v18  ;;  %v2240_v18 = vld [vmem:[#allocation12 + $0x258] sm:$0xff]  ;;  %2373 = vmatprep.subr.mxu0 %v2238_v2  ;;  %v2526_v50 = vld [vmem:[#allocation15 + $0x208] sm:$0xff]  ;;  %v2525_v2 = vld [vmem:[#allocation15 + $0x200] sm:$0xff] }
 0x324   :  { %2393 = vmatpush1.msra.mxu1 %v2215_v61  ;;  %v2237_v61 = vld [vmem:[#allocation12 + $0x240] sm:$0xff] }
 0x325   :  { %2394 = vmatprep.subr.mxu1 %v2212_v16  ;;  %v2239_v16 = vld [vmem:[#allocation12 + $0x250] sm:$0xff]  ;;  %2374 = vmatpush2.msra.mxu0 %v2237_v61 }
 0x326   :  { %2395 = vmatpush1.msra.mxu1 %v2211_v52  ;;  %v2234_v52 = vld [vmem:[#allocation12 + $0x228] sm:$0xff] }
 0x327   :  { %2396 = vmatprep.subr.mxu1 %v2208_v53  ;;  %v2236_v53 = vld [vmem:[#allocation12 + $0x238] sm:$0xff]  ;;  %2375 = vmatprep.subr.mxu0 %v2234_v52  ;;  %v2518_v61 = vld [vmem:[#allocation15 + $0x1c8] sm:$0xff]  ;;  %v2517_v52 = vld [vmem:[#allocation15 + $0x1c0] sm:$0xff] }
 0x328   :  { %2397 = vmatpush1.msra.mxu1 %v2207_v54  ;;  %v2233_v54 = vld [vmem:[#allocation12 + $0x220] sm:$0xff] }
 0x329   :  { %2398 = vmatprep.subr.mxu1 %v2204_v55  ;;  %v2235_v55 = vld [vmem:[#allocation12 + $0x230] sm:$0xff]  ;;  %2376 = vmatpush2.msra.mxu0 %v2233_v54 }
 0x32a   :  { %2399 = vmatpush1.msra.mxu1 %v2203_v56  ;;  %v2230_v56 = vld [vmem:[#allocation12 + $0x208] sm:$0xff] }
 0x32b   :  { %2400 = vmatprep.subr.mxu1 %v2200_v57  ;;  %v2232_v57 = vld [vmem:[#allocation12 + $0x218] sm:$0xff]  ;;  %2377 = vmatprep.subr.mxu0 %v2230_v56  ;;  %v2510_v54 = vld [vmem:[#allocation15 + $0x188] sm:$0xff]  ;;  %v2509_v56 = vld [vmem:[#allocation15 + $0x180] sm:$0xff] }
 0x32c   :  { %2401 = vmatpush1.msra.mxu1 %v2199_v58  ;;  %v2229_v58 = vld [vmem:[#allocation12 + $0x200] sm:$0xff] }
 0x32d   :  { %2402 = vmatprep.subr.mxu1 %v2196_v59  ;;  %v2231_v59 = vld [vmem:[#allocation12 + $0x210] sm:$0xff]  ;;  %2378 = vmatpush2.msra.mxu0 %v2229_v58 }
 0x32e   :  { %2403 = vmatpush1.msra.mxu1 %v2195_v60  ;;  %v2582_v60 = vld [vmem:[#allocation15 + $0x3c8] sm:$0xff] }
 0x32f   :  { %2404 = vmatprep.subr.mxu1 %v2192_v62  ;;  %v2838_v62 = vld [vmem:[#allocation15 + $0xbc8] sm:$0xff]  ;;  %3015 = vmatprep.subr.mxu0 %v2582_v60  ;;  %v2501_v60 = vld [vmem:[#allocation15 + $0x140] sm:$0xff] }
 0x330   :  { %2405 = vmatpush1.msra.mxu1 %v2191_v0  ;;  %v2009_v0 = vld [vmem:[#allocation10] sm:$0x3]  ;;  %v2502_v58 = vld [vmem:[#allocation15 + $0x148] sm:$0xff] }
 0x331   :  { %2406 = vmatprep.subr.mxu1 %v2188_v3 }
 0x332   :  { %2407 = vmatpush1.msra.mxu1 %v2187_v4  ;;  %v2014_v4 = vrot.slane %v2009_v0, %v4567_v11 }
 0x333   :  { %2408 = vmatprep.subr.mxu1 %v2184_v12  ;;  %v2018_v12 = vrot.slane %v2009_v0, %v4572_v13  ;;  %v2494_v0 = vld [vmem:[#allocation15 + $0x108] sm:$0xff] }
 0x334   :  { %2409 = vmatpush1.msra.mxu1 %v2183_v5 }
 0x335   :  { %2410 = vmatprep.subr.mxu1 %v2180_v8 }
 0x336   :  { %2411 = vmatpush1.msra.mxu1 %v2179_v15 }
 0x337   :  { %2412 = vmatprep.subr.mxu1 %v2176_v1 }
 0x338   :  { %2413 = vmatpush1.msra.mxu1 %v2175_v21 }
 0x339   :  { %2414 = vmatprep.subr.mxu1 %v2172_v22 }
 0x33a   :  { %2415 = vmatpush1.msra.mxu1 %v2171_v29 }
 0x33b   :  { %2416 = vmatprep.subr.mxu1 %v2168_v30 }
 0x33c   :  { %2417 = vmatpush1.msra.mxu1 %v2167_v20 }
 0x33d   :  { %2418 = vmatprep.subr.mxu1 %v2292_v28  ;;  %v2581_v28 = vld [vmem:[#allocation15 + $0x3c0] sm:$0xff] }
 0x33e   :  { %2419 = vmatpush2.msra.mxu1 %v2291_v19  ;;  %v2837_v19 = vld [vmem:[#allocation15 + $0xbc0] sm:$0xff] }
 0x33f   :  { %2420 = vmatprep.subr.mxu1 %v2288_v25  ;;  %v2574_v25 = vld [vmem:[#allocation15 + $0x388] sm:$0xff] }
 0x340   :  { %2421 = vmatpush2.msra.mxu1 %v2287_v31  ;;  %v2830_v31 = vld [vmem:[#allocation15 + $0xb88] sm:$0xff] }
 0x341   :  { %2422 = vmatprep.subr.mxu1 %v2284_v32  ;;  %v2573_v32 = vld [vmem:[#allocation15 + $0x380] sm:$0xff] }
 0x342   :  { %2423 = vmatpush2.msra.mxu1 %v2283_v6  ;;  %v2829_v6 = vld [vmem:[#allocation15 + $0xb80] sm:$0xff] }
 0x343   :  { %2424 = vmatprep.subr.mxu1 %v2280_v33  ;;  %v2566_v33 = vld [vmem:[#allocation15 + $0x348] sm:$0xff] }
 0x344   :  { %2425 = vmatpush2.msra.mxu1 %v2279_v34  ;;  %v2822_v34 = vld [vmem:[#allocation15 + $0xb48] sm:$0xff] }
 0x345   :  { %2426 = vmatprep.subr.mxu1 %v2276_v7  ;;  %v2565_v7 = vld [vmem:[#allocation15 + $0x340] sm:$0xff] }
 0x346   :  { %2427 = vmatpush2.msra.mxu1 %v2275_v17  ;;  %v2821_v17 = vld [vmem:[#allocation15 + $0xb40] sm:$0xff] }
 0x347   :  { %2428 = vmatprep.subr.mxu1 %v2272_v35  ;;  %v2558_v35 = vld [vmem:[#allocation15 + $0x308] sm:$0xff] }
 0x348   :  { %2429 = vmatpush2.msra.mxu1 %v2271_v36  ;;  %v2814_v36 = vld [vmem:[#allocation15 + $0xb08] sm:$0xff] }
 0x349   :  { %2430 = vmatprep.subr.mxu1 %v2268_v63  ;;  %v2557_v63 = vld [vmem:[#allocation15 + $0x300] sm:$0xff] }
 0x34a   :  { %2431 = vmatpush2.msra.mxu1 %v2267_v38  ;;  %v2813_v38 = vld [vmem:[#allocation15 + $0xb00] sm:$0xff] }
 0x34b   :  { %2432 = vmatprep.subr.mxu1 %v2264_v39  ;;  %v2550_v39 = vld [vmem:[#allocation15 + $0x2c8] sm:$0xff] }
 0x34c   :  { %2433 = vmatpush2.msra.mxu1 %v2263_v41  ;;  %v2806_v41 = vld [vmem:[#allocation15 + $0xac8] sm:$0xff] }
 0x34d   :  { %2434 = vmatprep.subr.mxu1 %v2260_v23  ;;  %v2549_v23 = vld [vmem:[#allocation15 + $0x2c0] sm:$0xff] }
 0x34e   :  { %2435 = vmatpush2.msra.mxu1 %v2259_v26  ;;  %v2805_v26 = vld [vmem:[#allocation15 + $0xac0] sm:$0xff] }
 0x34f   :  { %2436 = vmatprep.subr.mxu1 %v2256_v42  ;;  %v2542_v42 = vld [vmem:[#allocation15 + $0x288] sm:$0xff] }
 0x350   :  { %2437 = vmatpush2.msra.mxu1 %v2255_v45  ;;  %v2798_v45 = vld [vmem:[#allocation15 + $0xa88] sm:$0xff] }
 0x351   :  { %2438 = vmatprep.subr.mxu1 %v2252_v24  ;;  %v2541_v24 = vld [vmem:[#allocation15 + $0x280] sm:$0xff] }
 0x352   :  { %2439 = vmatpush2.msra.mxu1 %v2251_v27  ;;  %v2797_v27 = vld [vmem:[#allocation15 + $0xa80] sm:$0xff] }
 0x353   :  { %2440 = vmatprep.subr.mxu1 %v2248_v46  ;;  %v2534_v46 = vld [vmem:[#allocation15 + $0x248] sm:$0xff] }
 0x354   :  { %2441 = vmatpush2.msra.mxu1 %v2247_v47  ;;  %v2790_v47 = vld [vmem:[#allocation15 + $0xa48] sm:$0xff] }
 0x355   :  { %2442 = vmatprep.subr.mxu1 %v2244_v49  ;;  %v2789_v49 = vld [vmem:[#allocation15 + $0xa40] sm:$0xff] }
 0x356   :  { %2443 = vmatpush2.msra.mxu1 %v2243_v51  ;;  %v2782_v51 = vld [vmem:[#allocation15 + $0xa08] sm:$0xff] }
 0x357   :  { %2444 = vmatprep.subr.mxu1 %v2240_v18  ;;  %v2781_v18 = vld [vmem:[#allocation15 + $0xa00] sm:$0xff] }
 0x358   :  { %2445 = vmatpush2.msra.mxu1 %v2239_v16  ;;  %v2774_v16 = vld [vmem:[#allocation15 + $0x9c8] sm:$0xff] }
 0x359   :  { %2446 = vmatprep.subr.mxu1 %v2236_v53  ;;  %v2773_v53 = vld [vmem:[#allocation15 + $0x9c0] sm:$0xff] }
 0x35a   :  { %2447 = vmatpush2.msra.mxu1 %v2235_v55  ;;  %v2087_v3 = vpop.f32.mrf.mxu0  ;;  %v2766_v55 = vld [vmem:[#allocation15 + $0x988] sm:$0xff] }
 0x35b   :  { %2448 = vmatprep.subr.mxu1 %v2232_v57  ;;  %v2088_v8 = vadd.f32 %v2087_v3, %v2014_v4  ;;  %v2765_v57 = vld [vmem:[#allocation15 + $0x980] sm:$0xff]  ;;  %v2750_v3 = vld [vmem:[#allocation15 + $0x908] sm:$0xff] }
 0x35c   :  { %2449 = vmatpush2.msra.mxu1 %v2231_v59  ;;  %v2089_v5 = vpop.f32.mrf.mxu0  ;;  %v2758_v59 = vld [vmem:[#allocation15 + $0x948] sm:$0xff]  ;;  %v2493_v4 = vld [vmem:[#allocation15 + $0x100] sm:$0xff] }
 0x35d   :  { %3086 = vmatprep.subr.mxu1 %v2838_v62  ;;  %v2090_v1 = vadd.f32 %v2089_v5, %v2018_v12  ;;  %v2757_v62 = vld [vmem:[#allocation15 + $0x940] sm:$0xff]  ;;  %v2486_v5 = vld [vmem:[#allocation15 + $0xc8] sm:$0xff] }
 0x35e   :  { %v2749_v12 = vld [vmem:[#allocation15 + $0x900] sm:$0xff] }
 0x3dd   :  { %v2158_v15 = vpop.f32.mrf.mxu1 }
 0x3de   :  { %v2159_v21 = vadd.f32 %v2158_v15, %v2088_v8  ;;  %v2742_v8 = vld [vmem:[#allocation15 + $0x8c8] sm:$0xff]  ;;  %v2485_v15 = vld [vmem:[#allocation15 + $0xc0] sm:$0xff] }
 0x3df   :  { %v2160_v22 = vpop.f32.mrf.mxu1 }
 0x3e0   :  { %v2161_v29 = vadd.f32 %v2160_v22, %v2090_v1  ;;  %v2163_v20 = vmax.f32 %v2159_v21, 0.0  ;;  %v2741_v1 = vld [vmem:[#allocation15 + $0x8c0] sm:$0xff]  ;;  %v2478_v21 = vld [vmem:[#allocation15 + $0x88] sm:$0xff] }
 0x3e1   :  { %v2734_v22 = vld [vmem:[#allocation15 + $0x888] sm:$0xff] }
 0x3e2   :  { %v2164_v30 = vmax.f32 %v2161_v29, 0.0  ;;  %v2477_v29 = vld [vmem:[#allocation15 + $0x80] sm:$0xff] }
 0x3e4   :  { %2379 = vmatprep.mubr.f32.mxu0 %v2164_v30  ;;  %2450 = vmatprep.mubr.f32.mxu1 %v2164_v30  ;;  %v2733_v30 = vld [vmem:[#allocation15 + $0x880] sm:$0xff] }
 0x3e5   :  { %2380 = vmatmul.mubr.f32.vlgmr.msra.gmra.mxu0 %v2163_v20  ;;  %2451 = vmatmul.mubr.f32.vlgmr.msra.gmra.mxu1 %v2163_v20  ;;  %v2470_v20 = vld [vmem:[#allocation15 + $0x48] sm:$0xff] }
 0x3e6   :  { %3016 = vmatpush1.msra.mxu0 %v2581_v28  ;;  %3087 = vmatpush1.msra.mxu1 %v2837_v19  ;;  %v2726_v28 = vld [vmem:[#allocation15 + $0x848] sm:$0xff]  ;;  %v2469_v19 = vld [vmem:[#allocation15 + $0x40] sm:$0xff] }
 0x3e7   :  { %3017 = vmatprep.subr.mxu0 %v2574_v25  ;;  %3088 = vmatprep.subr.mxu1 %v2830_v31  ;;  %v2725_v25 = vld [vmem:[#allocation15 + $0x840] sm:$0xff]  ;;  %v2462_v31 = vld [vmem:[#allocation15 + $0x8] sm:$0xff] }
 0x3e8   :  { %3018 = vmatpush1.msra.mxu0 %v2573_v32  ;;  %3089 = vmatpush1.msra.mxu1 %v2829_v6  ;;  %v2718_v32 = vld [vmem:[#allocation15 + $0x808] sm:$0xff]  ;;  %v2461_v6 = vld [vmem:[#allocation15] sm:$0xff] }
 0x3e9   :  { %3019 = vmatprep.subr.mxu0 %v2566_v33  ;;  %3090 = vmatprep.subr.mxu1 %v2822_v34  ;;  %v2717_v33 = vld [vmem:[#allocation15 + $0x800] sm:$0xff]  ;;  %v2710_v34 = vld [vmem:[#allocation15 + $0x7c8] sm:$0xff] }
 0x3ea   :  { %3020 = vmatpush1.msra.mxu0 %v2565_v7  ;;  %3091 = vmatpush1.msra.mxu1 %v2821_v17  ;;  %v2966_v7 = vld [vmem:[#allocation15 + $0xfc8] sm:$0xff]  ;;  %v2709_v17 = vld [vmem:[#allocation15 + $0x7c0] sm:$0xff] }
 0x3eb   :  { %3021 = vmatprep.subr.mxu0 %v2558_v35  ;;  %3092 = vmatprep.subr.mxu1 %v2814_v36  ;;  %v2965_v35 = vld [vmem:[#allocation15 + $0xfc0] sm:$0xff]  ;;  %v2702_v36 = vld [vmem:[#allocation15 + $0x788] sm:$0xff] }
 0x3ec   :  { %3022 = vmatpush1.msra.mxu0 %v2557_v63  ;;  %3093 = vmatpush1.msra.mxu1 %v2813_v38  ;;  %v2958_v63 = vld [vmem:[#allocation15 + $0xf88] sm:$0xff]  ;;  %v2701_v38 = vld [vmem:[#allocation15 + $0x780] sm:$0xff] }
 0x3ed   :  { %3023 = vmatprep.subr.mxu0 %v2550_v39  ;;  %3094 = vmatprep.subr.mxu1 %v2806_v41  ;;  %v2957_v39 = vld [vmem:[#allocation15 + $0xf80] sm:$0xff]  ;;  %v2694_v41 = vld [vmem:[#allocation15 + $0x748] sm:$0xff] }
 0x3ee   :  { %3024 = vmatpush1.msra.mxu0 %v2549_v23  ;;  %3095 = vmatpush1.msra.mxu1 %v2805_v26  ;;  %v2950_v23 = vld [vmem:[#allocation15 + $0xf48] sm:$0xff]  ;;  %v2693_v26 = vld [vmem:[#allocation15 + $0x740] sm:$0xff] }
 0x3ef   :  { %3025 = vmatprep.subr.mxu0 %v2542_v42  ;;  %3096 = vmatprep.subr.mxu1 %v2798_v45  ;;  %v2949_v42 = vld [vmem:[#allocation15 + $0xf40] sm:$0xff]  ;;  %v2686_v45 = vld [vmem:[#allocation15 + $0x708] sm:$0xff] }
 0x3f0   :  { %3026 = vmatpush1.msra.mxu0 %v2541_v24  ;;  %3097 = vmatpush1.msra.mxu1 %v2797_v27  ;;  %v2942_v24 = vld [vmem:[#allocation15 + $0xf08] sm:$0xff]  ;;  %v2685_v27 = vld [vmem:[#allocation15 + $0x700] sm:$0xff] }
 0x3f1   :  { %3027 = vmatprep.subr.mxu0 %v2534_v46  ;;  %3098 = vmatprep.subr.mxu1 %v2790_v47  ;;  %v2941_v46 = vld [vmem:[#allocation15 + $0xf00] sm:$0xff]  ;;  %v2678_v47 = vld [vmem:[#allocation15 + $0x6c8] sm:$0xff] }
 0x3f2   :  { %3028 = vmatpush1.msra.mxu0 %v2533_v48  ;;  %3099 = vmatpush1.msra.mxu1 %v2789_v49  ;;  %v2934_v48 = vld [vmem:[#allocation15 + $0xec8] sm:$0xff]  ;;  %v2677_v49 = vld [vmem:[#allocation15 + $0x6c0] sm:$0xff] }
 0x3f3   :  { %3029 = vmatprep.subr.mxu0 %v2526_v50  ;;  %3100 = vmatprep.subr.mxu1 %v2782_v51  ;;  %v2933_v50 = vld [vmem:[#allocation15 + $0xec0] sm:$0xff]  ;;  %v2670_v51 = vld [vmem:[#allocation15 + $0x688] sm:$0xff] }
 0x3f4   :  { %3030 = vmatpush1.msra.mxu0 %v2525_v2  ;;  %3101 = vmatpush1.msra.mxu1 %v2781_v18  ;;  %v2926_v2 = vld [vmem:[#allocation15 + $0xe88] sm:$0xff]  ;;  %v2669_v18 = vld [vmem:[#allocation15 + $0x680] sm:$0xff] }
 0x3f5   :  { %3031 = vmatprep.subr.mxu0 %v2518_v61  ;;  %3102 = vmatprep.subr.mxu1 %v2774_v16  ;;  %v2925_v61 = vld [vmem:[#allocation15 + $0xe80] sm:$0xff]  ;;  %v2662_v16 = vld [vmem:[#allocation15 + $0x648] sm:$0xff] }
 0x3f6   :  { %3032 = vmatpush1.msra.mxu0 %v2517_v52  ;;  %3103 = vmatpush1.msra.mxu1 %v2773_v53  ;;  %v2918_v52 = vld [vmem:[#allocation15 + $0xe48] sm:$0xff]  ;;  %v2661_v53 = vld [vmem:[#allocation15 + $0x640] sm:$0xff] }
 0x3f7   :  { %3033 = vmatprep.subr.mxu0 %v2510_v54  ;;  %3104 = vmatprep.subr.mxu1 %v2766_v55  ;;  %v2917_v54 = vld [vmem:[#allocation15 + $0xe40] sm:$0xff]  ;;  %v2654_v55 = vld [vmem:[#allocation15 + $0x608] sm:$0xff] }
 0x3f8   :  { %3034 = vmatpush1.msra.mxu0 %v2509_v56  ;;  %3105 = vmatpush1.msra.mxu1 %v2765_v57  ;;  %v2910_v56 = vld [vmem:[#allocation15 + $0xe08] sm:$0xff]  ;;  %v2653_v57 = vld [vmem:[#allocation15 + $0x600] sm:$0xff] }
 0x3f9   :  { %3035 = vmatprep.subr.mxu0 %v2502_v58  ;;  %3106 = vmatprep.subr.mxu1 %v2758_v59  ;;  %v2909_v58 = vld [vmem:[#allocation15 + $0xe00] sm:$0xff]  ;;  %v2646_v59 = vld [vmem:[#allocation15 + $0x5c8] sm:$0xff] }
 0x3fa   :  { %3036 = vmatpush1.msra.mxu0 %v2501_v60  ;;  %3107 = vmatpush1.msra.mxu1 %v2757_v62  ;;  %v2902_v60 = vld [vmem:[#allocation15 + $0xdc8] sm:$0xff]  ;;  %v2645_v62 = vld [vmem:[#allocation15 + $0x5c0] sm:$0xff] }
 0x3fb   :  { %3037 = vmatprep.subr.mxu0 %v2494_v0  ;;  %3108 = vmatprep.subr.mxu1 %v2750_v3  ;;  %v2901_v0 = vld [vmem:[#allocation15 + $0xdc0] sm:$0xff]  ;;  %v2638_v3 = vld [vmem:[#allocation15 + $0x588] sm:$0xff] }
 0x3fc   :  { %3038 = vmatpush1.msra.mxu0 %v2493_v4  ;;  %3109 = vmatpush1.msra.mxu1 %v2749_v12  ;;  %v2894_v4 = vld [vmem:[#allocation15 + $0xd88] sm:$0xff]  ;;  %v2637_v12 = vld [vmem:[#allocation15 + $0x580] sm:$0xff] }
 0x3fd   :  { %3039 = vmatprep.subr.mxu0 %v2486_v5  ;;  %3110 = vmatprep.subr.mxu1 %v2742_v8  ;;  %v2893_v5 = vld [vmem:[#allocation15 + $0xd80] sm:$0xff]  ;;  %v2630_v8 = vld [vmem:[#allocation15 + $0x548] sm:$0xff] }
 0x3fe   :  { %3040 = vmatpush1.msra.mxu0 %v2485_v15  ;;  %3111 = vmatpush1.msra.mxu1 %v2741_v1  ;;  %v2886_v15 = vld [vmem:[#allocation15 + $0xd48] sm:$0xff]  ;;  %v2629_v1 = vld [vmem:[#allocation15 + $0x540] sm:$0xff] }
 0x3ff   :  { %3041 = vmatprep.subr.mxu0 %v2478_v21  ;;  %3112 = vmatprep.subr.mxu1 %v2734_v22  ;;  %v2885_v21 = vld [vmem:[#allocation15 + $0xd40] sm:$0xff]  ;;  %v2622_v22 = vld [vmem:[#allocation15 + $0x508] sm:$0xff] }
 0x400   :  { %3042 = vmatpush1.msra.mxu0 %v2477_v29  ;;  %3113 = vmatpush1.msra.mxu1 %v2733_v30  ;;  %v2878_v29 = vld [vmem:[#allocation15 + $0xd08] sm:$0xff]  ;;  %v2621_v30 = vld [vmem:[#allocation15 + $0x500] sm:$0xff] }
 0x401   :  { %3043 = vmatprep.subr.mxu0 %v2470_v20  ;;  %3114 = vmatprep.subr.mxu1 %v2726_v28  ;;  %v2877_v20 = vld [vmem:[#allocation15 + $0xd00] sm:$0xff]  ;;  %v2614_v28 = vld [vmem:[#allocation15 + $0x4c8] sm:$0xff] }
 0x402   :  { %3044 = vmatpush1.msra.mxu0 %v2469_v19  ;;  %3115 = vmatpush1.msra.mxu1 %v2725_v25  ;;  %v2870_v19 = vld [vmem:[#allocation15 + $0xcc8] sm:$0xff]  ;;  %v2613_v25 = vld [vmem:[#allocation15 + $0x4c0] sm:$0xff] }
 0x403   :  { %3045 = vmatprep.subr.mxu0 %v2462_v31  ;;  %3116 = vmatprep.subr.mxu1 %v2718_v32  ;;  %v2869_v31 = vld [vmem:[#allocation15 + $0xcc0] sm:$0xff]  ;;  %v2606_v32 = vld [vmem:[#allocation15 + $0x488] sm:$0xff] }
 0x404   :  { %3046 = vmatpush1.msra.mxu0 %v2461_v6  ;;  %3117 = vmatpush1.msra.mxu1 %v2717_v33  ;;  %v2862_v6 = vld [vmem:[#allocation15 + $0xc88] sm:$0xff]  ;;  %v2605_v33 = vld [vmem:[#allocation15 + $0x480] sm:$0xff] }
 0x405   :  { %3047 = vmatprep.subr.mxu0 %v2710_v34  ;;  %3118 = vmatprep.subr.mxu1 %v2966_v7  ;;  %v2861_v34 = vld [vmem:[#allocation15 + $0xc80] sm:$0xff]  ;;  %v2598_v7 = vld [vmem:[#allocation15 + $0x448] sm:$0xff] }
 0x406   :  { %3048 = vmatpush2.msra.mxu0 %v2709_v17  ;;  %3119 = vmatpush2.msra.mxu1 %v2965_v35  ;;  %v2854_v17 = vld [vmem:[#allocation15 + $0xc48] sm:$0xff]  ;;  %v2597_v35 = vld [vmem:[#allocation15 + $0x440] sm:$0xff] }
 0x407   :  { %3049 = vmatprep.subr.mxu0 %v2702_v36  ;;  %3120 = vmatprep.subr.mxu1 %v2958_v63  ;;  %v2853_v36 = vld [vmem:[#allocation15 + $0xc40] sm:$0xff]  ;;  %v2590_v63 = vld [vmem:[#allocation15 + $0x408] sm:$0xff] }
 0x408   :  { %3050 = vmatpush2.msra.mxu0 %v2701_v38  ;;  %3121 = vmatpush2.msra.mxu1 %v2957_v39  ;;  %v2846_v38 = vld [vmem:[#allocation15 + $0xc08] sm:$0xff]  ;;  %v2589_v39 = vld [vmem:[#allocation15 + $0x400] sm:$0xff] }
 0x409   :  { %3051 = vmatprep.subr.mxu0 %v2694_v41  ;;  %3122 = vmatprep.subr.mxu1 %v2950_v23  ;;  %v2845_v41 = vld [vmem:[#allocation15 + $0xc00] sm:$0xff]  ;;  %v2584_v23 = vld [vmem:[#allocation15 + $0x3d8] sm:$0xff] }
 0x40a   :  { %3052 = vmatpush2.msra.mxu0 %v2693_v26  ;;  %3123 = vmatpush2.msra.mxu1 %v2949_v42  ;;  %v2840_v26 = vld [vmem:[#allocation15 + $0xbd8] sm:$0xff] }
 0x40b   :  { %3053 = vmatprep.subr.mxu0 %v2686_v45  ;;  %3124 = vmatprep.subr.mxu1 %v2942_v24  ;;  %v2293_v42 = vld [vmem:[#allocation13] sm:$0xf] }
 0x40c   :  { %3054 = vmatpush2.msra.mxu0 %v2685_v27  ;;  %3125 = vmatpush2.msra.mxu1 %v2941_v46  ;;  %v2298_v45 = vrot.slane %v2293_v42, %v4567_v11  ;;  %v2306_v24 = vrot.slane %v2293_v42, %v4564_v10  ;;  %v2302_v27 = vrot.slane %v2293_v42, %v4572_v13 }
 0x40d   :  { %3055 = vmatprep.subr.mxu0 %v2678_v47  ;;  %3126 = vmatprep.subr.mxu1 %v2934_v48  ;;  %v2310_v46 = vrot.slane %v2293_v42, %v4575_v14  ;;  %v2504_v42 = vld [vmem:[#allocation15 + $0x158] sm:$0xff] }
 0x40e   :  { %3056 = vmatpush2.msra.mxu0 %v2677_v49  ;;  %3127 = vmatpush2.msra.mxu1 %v2933_v50 }
 0x40f   :  { %3057 = vmatprep.subr.mxu0 %v2670_v51  ;;  %3128 = vmatprep.subr.mxu1 %v2926_v2 }
 0x410   :  { %3058 = vmatpush2.msra.mxu0 %v2669_v18  ;;  %3129 = vmatpush2.msra.mxu1 %v2925_v61 }
 0x411   :  { %3059 = vmatprep.subr.mxu0 %v2662_v16  ;;  %3130 = vmatprep.subr.mxu1 %v2918_v52 }
 0x412   :  { %3060 = vmatpush2.msra.mxu0 %v2661_v53  ;;  %3131 = vmatpush2.msra.mxu1 %v2917_v54 }
 0x413   :  { %3061 = vmatprep.subr.mxu0 %v2654_v55  ;;  %3132 = vmatprep.subr.mxu1 %v2910_v56  ;;  %v2583_v55 = vld [vmem:[#allocation15 + $0x3d0] sm:$0xff] }
 0x414   :  { %3062 = vmatpush2.msra.mxu0 %v2653_v57  ;;  %3133 = vmatpush2.msra.mxu1 %v2909_v58  ;;  %v2839_v56 = vld [vmem:[#allocation15 + $0xbd0] sm:$0xff]  ;;  %v2576_v57 = vld [vmem:[#allocation15 + $0x398] sm:$0xff] }
 0x415   :  { %3063 = vmatprep.subr.mxu0 %v2646_v59  ;;  %3134 = vmatprep.subr.mxu1 %v2902_v60  ;;  %v2832_v58 = vld [vmem:[#allocation15 + $0xb98] sm:$0xff]  ;;  %v2575_v59 = vld [vmem:[#allocation15 + $0x390] sm:$0xff] }
 0x416   :  { %3064 = vmatpush2.msra.mxu0 %v2645_v62  ;;  %3135 = vmatpush2.msra.mxu1 %v2901_v0  ;;  %v2831_v60 = vld [vmem:[#allocation15 + $0xb90] sm:$0xff]  ;;  %v2568_v62 = vld [vmem:[#allocation15 + $0x358] sm:$0xff] }
 0x417   :  { %3065 = vmatprep.subr.mxu0 %v2638_v3  ;;  %3136 = vmatprep.subr.mxu1 %v2894_v4  ;;  %v2824_v0 = vld [vmem:[#allocation15 + $0xb58] sm:$0xff]  ;;  %v2567_v3 = vld [vmem:[#allocation15 + $0x350] sm:$0xff] }
 0x418   :  { %3066 = vmatpush2.msra.mxu0 %v2637_v12  ;;  %3137 = vmatpush2.msra.mxu1 %v2893_v5  ;;  %v2823_v4 = vld [vmem:[#allocation15 + $0xb50] sm:$0xff]  ;;  %v2560_v12 = vld [vmem:[#allocation15 + $0x318] sm:$0xff] }
 0x419   :  { %3067 = vmatprep.subr.mxu0 %v2630_v8  ;;  %3138 = vmatprep.subr.mxu1 %v2886_v15  ;;  %v2816_v5 = vld [vmem:[#allocation15 + $0xb18] sm:$0xff]  ;;  %v2559_v8 = vld [vmem:[#allocation15 + $0x310] sm:$0xff] }
 0x41a   :  { %3068 = vmatpush2.msra.mxu0 %v2629_v1  ;;  %3139 = vmatpush2.msra.mxu1 %v2885_v21  ;;  %v2815_v15 = vld [vmem:[#allocation15 + $0xb10] sm:$0xff]  ;;  %v2552_v1 = vld [vmem:[#allocation15 + $0x2d8] sm:$0xff] }
 0x41b   :  { %3069 = vmatprep.subr.mxu0 %v2622_v22  ;;  %3140 = vmatprep.subr.mxu1 %v2878_v29  ;;  %v2808_v21 = vld [vmem:[#allocation15 + $0xad8] sm:$0xff]  ;;  %v2551_v22 = vld [vmem:[#allocation15 + $0x2d0] sm:$0xff] }
 0x41c   :  { %3070 = vmatpush2.msra.mxu0 %v2621_v30  ;;  %3141 = vmatpush2.msra.mxu1 %v2877_v20  ;;  %v2807_v29 = vld [vmem:[#allocation15 + $0xad0] sm:$0xff]  ;;  %v2544_v30 = vld [vmem:[#allocation15 + $0x298] sm:$0xff] }
 0x41d   :  { %3071 = vmatprep.subr.mxu0 %v2614_v28  ;;  %3142 = vmatprep.subr.mxu1 %v2870_v19  ;;  %v2800_v20 = vld [vmem:[#allocation15 + $0xa98] sm:$0xff]  ;;  %v2543_v28 = vld [vmem:[#allocation15 + $0x290] sm:$0xff] }
 0x41e   :  { %3072 = vmatpush2.msra.mxu0 %v2613_v25  ;;  %3143 = vmatpush2.msra.mxu1 %v2869_v31  ;;  %v2799_v19 = vld [vmem:[#allocation15 + $0xa90] sm:$0xff]  ;;  %v2536_v25 = vld [vmem:[#allocation15 + $0x258] sm:$0xff] }
 0x41f   :  { %3073 = vmatprep.subr.mxu0 %v2606_v32  ;;  %3144 = vmatprep.subr.mxu1 %v2862_v6  ;;  %v2792_v31 = vld [vmem:[#allocation15 + $0xa58] sm:$0xff]  ;;  %v2535_v32 = vld [vmem:[#allocation15 + $0x250] sm:$0xff] }
 0x420   :  { %3074 = vmatpush2.msra.mxu0 %v2605_v33  ;;  %3145 = vmatpush2.msra.mxu1 %v2861_v34  ;;  %v2791_v6 = vld [vmem:[#allocation15 + $0xa50] sm:$0xff]  ;;  %v2528_v33 = vld [vmem:[#allocation15 + $0x218] sm:$0xff] }
 0x421   :  { %3075 = vmatprep.subr.mxu0 %v2598_v7  ;;  %3146 = vmatprep.subr.mxu1 %v2854_v17  ;;  %v2784_v34 = vld [vmem:[#allocation15 + $0xa18] sm:$0xff]  ;;  %v2527_v7 = vld [vmem:[#allocation15 + $0x210] sm:$0xff] }
 0x422   :  { %3076 = vmatpush2.msra.mxu0 %v2597_v35  ;;  %3147 = vmatpush2.msra.mxu1 %v2853_v36  ;;  %v2783_v17 = vld [vmem:[#allocation15 + $0xa10] sm:$0xff]  ;;  %v2520_v35 = vld [vmem:[#allocation15 + $0x1d8] sm:$0xff] }
 0x423   :  { %3077 = vmatprep.subr.mxu0 %v2590_v63  ;;  %3148 = vmatprep.subr.mxu1 %v2846_v38  ;;  %v2776_v36 = vld [vmem:[#allocation15 + $0x9d8] sm:$0xff]  ;;  %v2519_v63 = vld [vmem:[#allocation15 + $0x1d0] sm:$0xff] }
 0x424   :  { %3078 = vmatpush2.msra.mxu0 %v2589_v39  ;;  %3149 = vmatpush2.msra.mxu1 %v2845_v41  ;;  %v2775_v38 = vld [vmem:[#allocation15 + $0x9d0] sm:$0xff]  ;;  %v2512_v39 = vld [vmem:[#allocation15 + $0x198] sm:$0xff] }
 0x425   :  { %3157 = vmatprep.subr.mxu0 %v2584_v23  ;;  %3228 = vmatprep.subr.mxu1 %v2840_v26  ;;  %v2768_v41 = vld [vmem:[#allocation15 + $0x998] sm:$0xff]  ;;  %v2511_v23 = vld [vmem:[#allocation15 + $0x190] sm:$0xff] }
 0x426   :  { %v2767_v26 = vld [vmem:[#allocation15 + $0x990] sm:$0xff] }
 0x4a5   :  { %v2381_v47 = vpop.f32.mrf.mxu0  ;;  %v2452_v48 = vpop.f32.mrf.mxu1 }
 0x4a6   :  { %v2382_v49 = vadd.f32 %v2381_v47, %v2298_v45  ;;  %v2453_v50 = vadd.f32 %v2452_v48, %v2306_v24  ;;  %v2760_v45 = vld [vmem:[#allocation15 + $0x958] sm:$0xff]  ;;  %v2503_v24 = vld [vmem:[#allocation15 + $0x150] sm:$0xff] }
 0x4a7   :  { %v2383_v51 = vpop.f32.mrf.mxu0  ;;  %v2454_v2 = vpop.f32.mrf.mxu1  ;;  %v2752_v47 = vld [vmem:[#allocation15 + $0x918] sm:$0xff]  ;;  %v2495_v48 = vld [vmem:[#allocation15 + $0x110] sm:$0xff] }
 0x4a8   :  { %v2384_v18 = vadd.f32 %v2383_v51, %v2302_v27  ;;  %v2455_v61 = vadd.f32 %v2454_v2, %v2310_v46  ;;  %v4677_v53 = vmax.f32 %v2382_v49, 0.0  ;;  %v4679_v54 = vmax.f32 %v2453_v50, 0.0  ;;  %v2759_v27 = vld [vmem:[#allocation15 + $0x950] sm:$0xff]  ;;  %v2496_v46 = vld [vmem:[#allocation15 + $0x118] sm:$0xff] }
 0x4a9   :  { %v2751_v49 = vld [vmem:[#allocation15 + $0x910] sm:$0xff]  ;;  %v2488_v50 = vld [vmem:[#allocation15 + $0xd8] sm:$0xff] }
 0x4aa   :  { %v4673_v16 = vmax.f32 %v2384_v18, 0.0  ;;  %v4675_v52 = vmax.f32 %v2455_v61, 0.0  ;;  %v2744_v51 = vld [vmem:[#allocation15 + $0x8d8] sm:$0xff]  ;;  %v2487_v2 = vld [vmem:[#allocation15 + $0xd0] sm:$0xff] }
 0x4ab   :  { %v2743_v18 = vld [vmem:[#allocation15 + $0x8d0] sm:$0xff]  ;;  %v2480_v61 = vld [vmem:[#allocation15 + $0x98] sm:$0xff] }
 0x4ac   :  { %3079 = vmatprep.mubr.f32.mxu0 %v4673_v16  ;;  %3150 = vmatprep.mubr.f32.mxu1 %v4675_v52 }
 0x4ad   :  { %3080 = vmatmul.mubr.f32.vlgmr.msra.gmra.mxu0 %v4677_v53  ;;  %3151 = vmatmul.mubr.f32.vlgmr.msra.gmra.mxu1 %v4679_v54 }
 0x4ae   :  { %3158 = vmatpush1.msra.mxu0 %v2583_v55  ;;  %3229 = vmatpush1.msra.mxu1 %v2839_v56  ;;  %v2736_v55 = vld [vmem:[#allocation15 + $0x898] sm:$0xff]  ;;  %v2479_v56 = vld [vmem:[#allocation15 + $0x90] sm:$0xff] }
 0x4af   :  { %3159 = vmatprep.subr.mxu0 %v2576_v57  ;;  %3221 = vmatprep.mubr.f32.mxu0 %v4673_v16  ;;  %v2735_v57 = vld [vmem:[#allocation15 + $0x890] sm:$0xff] }
 0x4b0   :  { %3230 = vmatprep.subr.mxu1 %v2832_v58  ;;  %3292 = vmatprep.mubr.f32.mxu1 %v4675_v52  ;;  %v2472_v58 = vld [vmem:[#allocation15 + $0x58] sm:$0xff] }
 0x4b1   :  { %3160 = vmatpush1.msra.mxu0 %v2575_v59  ;;  %3231 = vmatpush1.msra.mxu1 %v2831_v60  ;;  %v2728_v59 = vld [vmem:[#allocation15 + $0x858] sm:$0xff]  ;;  %v2471_v60 = vld [vmem:[#allocation15 + $0x50] sm:$0xff] }
 0x4b2   :  { %3161 = vmatprep.subr.mxu0 %v2568_v62  ;;  %3232 = vmatprep.subr.mxu1 %v2824_v0  ;;  %v2727_v62 = vld [vmem:[#allocation15 + $0x850] sm:$0xff]  ;;  %v2464_v0 = vld [vmem:[#allocation15 + $0x18] sm:$0xff] }
 0x4b3   :  { %3162 = vmatpush1.msra.mxu0 %v2567_v3  ;;  %3233 = vmatpush1.msra.mxu1 %v2823_v4  ;;  %v2720_v3 = vld [vmem:[#allocation15 + $0x818] sm:$0xff]  ;;  %v2463_v4 = vld [vmem:[#allocation15 + $0x10] sm:$0xff] }
 0x4b4   :  { %3163 = vmatprep.subr.mxu0 %v2560_v12  ;;  %3234 = vmatprep.subr.mxu1 %v2816_v5  ;;  %v2719_v12 = vld [vmem:[#allocation15 + $0x810] sm:$0xff]  ;;  %v2712_v5 = vld [vmem:[#allocation15 + $0x7d8] sm:$0xff] }
 0x4b5   :  { %3164 = vmatpush1.msra.mxu0 %v2559_v8  ;;  %3235 = vmatpush1.msra.mxu1 %v2815_v15  ;;  %v2968_v8 = vld [vmem:[#allocation15 + $0xfd8] sm:$0xff]  ;;  %v2711_v15 = vld [vmem:[#allocation15 + $0x7d0] sm:$0xff] }
 0x4b6   :  { %3165 = vmatprep.subr.mxu0 %v2552_v1  ;;  %3236 = vmatprep.subr.mxu1 %v2808_v21  ;;  %v2967_v1 = vld [vmem:[#allocation15 + $0xfd0] sm:$0xff]  ;;  %v2704_v21 = vld [vmem:[#allocation15 + $0x798] sm:$0xff] }
 0x4b7   :  { %3166 = vmatpush1.msra.mxu0 %v2551_v22  ;;  %3237 = vmatpush1.msra.mxu1 %v2807_v29  ;;  %v2960_v22 = vld [vmem:[#allocation15 + $0xf98] sm:$0xff]  ;;  %v2703_v29 = vld [vmem:[#allocation15 + $0x790] sm:$0xff] }
 0x4b8   :  { %3167 = vmatprep.subr.mxu0 %v2544_v30  ;;  %3238 = vmatprep.subr.mxu1 %v2800_v20  ;;  %v2959_v30 = vld [vmem:[#allocation15 + $0xf90] sm:$0xff]  ;;  %v2696_v20 = vld [vmem:[#allocation15 + $0x758] sm:$0xff] }
 0x4b9   :  { %3168 = vmatpush1.msra.mxu0 %v2543_v28  ;;  %3239 = vmatpush1.msra.mxu1 %v2799_v19  ;;  %v2952_v28 = vld [vmem:[#allocation15 + $0xf58] sm:$0xff]  ;;  %v2695_v19 = vld [vmem:[#allocation15 + $0x750] sm:$0xff] }
 0x4ba   :  { %3169 = vmatprep.subr.mxu0 %v2536_v25  ;;  %3240 = vmatprep.subr.mxu1 %v2792_v31  ;;  %v2951_v25 = vld [vmem:[#allocation15 + $0xf50] sm:$0xff]  ;;  %v2688_v31 = vld [vmem:[#allocation15 + $0x718] sm:$0xff] }
 0x4bb   :  { %3170 = vmatpush1.msra.mxu0 %v2535_v32  ;;  %3241 = vmatpush1.msra.mxu1 %v2791_v6  ;;  %v2944_v32 = vld [vmem:[#allocation15 + $0xf18] sm:$0xff]  ;;  %v2687_v6 = vld [vmem:[#allocation15 + $0x710] sm:$0xff] }
 0x4bc   :  { %3171 = vmatprep.subr.mxu0 %v2528_v33  ;;  %3242 = vmatprep.subr.mxu1 %v2784_v34  ;;  %v2943_v33 = vld [vmem:[#allocation15 + $0xf10] sm:$0xff]  ;;  %v2680_v34 = vld [vmem:[#allocation15 + $0x6d8] sm:$0xff] }
 0x4bd   :  { %3172 = vmatpush1.msra.mxu0 %v2527_v7  ;;  %3243 = vmatpush1.msra.mxu1 %v2783_v17  ;;  %v2936_v7 = vld [vmem:[#allocation15 + $0xed8] sm:$0xff]  ;;  %v2679_v17 = vld [vmem:[#allocation15 + $0x6d0] sm:$0xff] }
 0x4be   :  { %3173 = vmatprep.subr.mxu0 %v2520_v35  ;;  %3244 = vmatprep.subr.mxu1 %v2776_v36  ;;  %v2935_v35 = vld [vmem:[#allocation15 + $0xed0] sm:$0xff]  ;;  %v2672_v36 = vld [vmem:[#allocation15 + $0x698] sm:$0xff] }
 0x4bf   :  { %3174 = vmatpush1.msra.mxu0 %v2519_v63  ;;  %3245 = vmatpush1.msra.mxu1 %v2775_v38  ;;  %v2928_v63 = vld [vmem:[#allocation15 + $0xe98] sm:$0xff]  ;;  %v2671_v38 = vld [vmem:[#allocation15 + $0x690] sm:$0xff] }
 0x4c0   :  { %3175 = vmatprep.subr.mxu0 %v2512_v39  ;;  %3246 = vmatprep.subr.mxu1 %v2768_v41  ;;  %v2927_v39 = vld [vmem:[#allocation15 + $0xe90] sm:$0xff]  ;;  %v2664_v41 = vld [vmem:[#allocation15 + $0x658] sm:$0xff] }
 0x4c1   :  { %3176 = vmatpush1.msra.mxu0 %v2511_v23  ;;  %3247 = vmatpush1.msra.mxu1 %v2767_v26  ;;  %v2920_v23 = vld [vmem:[#allocation15 + $0xe58] sm:$0xff]  ;;  %v2663_v26 = vld [vmem:[#allocation15 + $0x650] sm:$0xff] }
 0x4c2   :  { %3177 = vmatprep.subr.mxu0 %v2504_v42  ;;  %3248 = vmatprep.subr.mxu1 %v2760_v45  ;;  %v2919_v42 = vld [vmem:[#allocation15 + $0xe50] sm:$0xff]  ;;  %v2656_v45 = vld [vmem:[#allocation15 + $0x618] sm:$0xff] }
 0x4c3   :  { %3178 = vmatpush1.msra.mxu0 %v2503_v24  ;;  %3249 = vmatpush1.msra.mxu1 %v2759_v27  ;;  %v2912_v24 = vld [vmem:[#allocation15 + $0xe18] sm:$0xff]  ;;  %v2655_v27 = vld [vmem:[#allocation15 + $0x610] sm:$0xff] }
 0x4c4   :  { %3179 = vmatprep.subr.mxu0 %v2496_v46  ;;  %3250 = vmatprep.subr.mxu1 %v2752_v47  ;;  %v2911_v46 = vld [vmem:[#allocation15 + $0xe10] sm:$0xff]  ;;  %v2648_v47 = vld [vmem:[#allocation15 + $0x5d8] sm:$0xff] }
 0x4c5   :  { %3180 = vmatpush1.msra.mxu0 %v2495_v48  ;;  %3251 = vmatpush1.msra.mxu1 %v2751_v49  ;;  %v2904_v48 = vld [vmem:[#allocation15 + $0xdd8] sm:$0xff]  ;;  %v2647_v49 = vld [vmem:[#allocation15 + $0x5d0] sm:$0xff] }
 0x4c6   :  { %3181 = vmatprep.subr.mxu0 %v2488_v50  ;;  %3252 = vmatprep.subr.mxu1 %v2744_v51  ;;  %v2903_v50 = vld [vmem:[#allocation15 + $0xdd0] sm:$0xff]  ;;  %v2640_v51 = vld [vmem:[#allocation15 + $0x598] sm:$0xff] }
 0x4c7   :  { %3182 = vmatpush1.msra.mxu0 %v2487_v2  ;;  %3253 = vmatpush1.msra.mxu1 %v2743_v18  ;;  %v2896_v2 = vld [vmem:[#allocation15 + $0xd98] sm:$0xff]  ;;  %v2639_v18 = vld [vmem:[#allocation15 + $0x590] sm:$0xff] }
 0x4c8   :  { %3183 = vmatprep.subr.mxu0 %v2480_v61  ;;  %3254 = vmatprep.subr.mxu1 %v2736_v55  ;;  %v2895_v61 = vld [vmem:[#allocation15 + $0xd90] sm:$0xff]  ;;  %v2632_v55 = vld [vmem:[#allocation15 + $0x558] sm:$0xff] }
 0x4c9   :  { %3184 = vmatpush1.msra.mxu0 %v2479_v56  ;;  %3255 = vmatpush1.msra.mxu1 %v2735_v57  ;;  %v2888_v56 = vld [vmem:[#allocation15 + $0xd58] sm:$0xff]  ;;  %v2631_v57 = vld [vmem:[#allocation15 + $0x550] sm:$0xff] }
 0x4ca   :  { %3185 = vmatprep.subr.mxu0 %v2472_v58  ;;  %3256 = vmatprep.subr.mxu1 %v2728_v59  ;;  %v2887_v58 = vld [vmem:[#allocation15 + $0xd50] sm:$0xff]  ;;  %v2624_v59 = vld [vmem:[#allocation15 + $0x518] sm:$0xff] }
 0x4cb   :  { %3186 = vmatpush1.msra.mxu0 %v2471_v60  ;;  %3257 = vmatpush1.msra.mxu1 %v2727_v62  ;;  %v2880_v60 = vld [vmem:[#allocation15 + $0xd18] sm:$0xff]  ;;  %v2623_v62 = vld [vmem:[#allocation15 + $0x510] sm:$0xff] }
 0x4cc   :  { %3187 = vmatprep.subr.mxu0 %v2464_v0  ;;  %3258 = vmatprep.subr.mxu1 %v2720_v3  ;;  %v2879_v0 = vld [vmem:[#allocation15 + $0xd10] sm:$0xff]  ;;  %v2616_v3 = vld [vmem:[#allocation15 + $0x4d8] sm:$0xff] }
 0x4cd   :  { %3188 = vmatpush1.msra.mxu0 %v2463_v4  ;;  %3259 = vmatpush1.msra.mxu1 %v2719_v12  ;;  %v2872_v4 = vld [vmem:[#allocation15 + $0xcd8] sm:$0xff]  ;;  %v2615_v12 = vld [vmem:[#allocation15 + $0x4d0] sm:$0xff] }
 0x4ce   :  { %3189 = vmatprep.subr.mxu0 %v2712_v5  ;;  %3260 = vmatprep.subr.mxu1 %v2968_v8  ;;  %v2871_v5 = vld [vmem:[#allocation15 + $0xcd0] sm:$0xff]  ;;  %v2608_v8 = vld [vmem:[#allocation15 + $0x498] sm:$0xff] }
 0x4cf   :  { %3190 = vmatpush2.msra.mxu0 %v2711_v15  ;;  %3261 = vmatpush2.msra.mxu1 %v2967_v1  ;;  %v2864_v15 = vld [vmem:[#allocation15 + $0xc98] sm:$0xff]  ;;  %v2607_v1 = vld [vmem:[#allocation15 + $0x490] sm:$0xff] }
 0x4d0   :  { %3191 = vmatprep.subr.mxu0 %v2704_v21  ;;  %3262 = vmatprep.subr.mxu1 %v2960_v22  ;;  %v2863_v21 = vld [vmem:[#allocation15 + $0xc90] sm:$0xff]  ;;  %v2600_v22 = vld [vmem:[#allocation15 + $0x458] sm:$0xff] }
 0x4d1   :  { %3192 = vmatpush2.msra.mxu0 %v2703_v29  ;;  %3263 = vmatpush2.msra.mxu1 %v2959_v30  ;;  %v2856_v29 = vld [vmem:[#allocation15 + $0xc58] sm:$0xff]  ;;  %v2599_v30 = vld [vmem:[#allocation15 + $0x450] sm:$0xff] }
 0x4d2   :  { %3193 = vmatprep.subr.mxu0 %v2696_v20  ;;  %3264 = vmatprep.subr.mxu1 %v2952_v28  ;;  %v2855_v20 = vld [vmem:[#allocation15 + $0xc50] sm:$0xff]  ;;  %v2592_v28 = vld [vmem:[#allocation15 + $0x418] sm:$0xff] }
 0x4d3   :  { %3194 = vmatpush2.msra.mxu0 %v2695_v19  ;;  %3265 = vmatpush2.msra.mxu1 %v2951_v25  ;;  %v2848_v19 = vld [vmem:[#allocation15 + $0xc18] sm:$0xff]  ;;  %v2591_v25 = vld [vmem:[#allocation15 + $0x410] sm:$0xff] }
 0x4d4   :  { %3195 = vmatprep.subr.mxu0 %v2688_v31  ;;  %3266 = vmatprep.subr.mxu1 %v2944_v32  ;;  %v2847_v31 = vld [vmem:[#allocation15 + $0xc10] sm:$0xff]  ;;  %v2586_v32 = vld [vmem:[#allocation15 + $0x3e8] sm:$0xff] }
 0x4d5   :  { %3196 = vmatpush2.msra.mxu0 %v2687_v6  ;;  %3267 = vmatpush2.msra.mxu1 %v2943_v33  ;;  %v2842_v6 = vld [vmem:[#allocation15 + $0xbe8] sm:$0xff]  ;;  %v2585_v33 = vld [vmem:[#allocation15 + $0x3e0] sm:$0xff] }
 0x4d6   :  { %3197 = vmatprep.subr.mxu0 %v2680_v34  ;;  %3268 = vmatprep.subr.mxu1 %v2936_v7  ;;  %v2841_v34 = vld [vmem:[#allocation15 + $0xbe0] sm:$0xff]  ;;  %v2578_v7 = vld [vmem:[#allocation15 + $0x3a8] sm:$0xff] }
 0x4d7   :  { %3198 = vmatpush2.msra.mxu0 %v2679_v17  ;;  %3269 = vmatpush2.msra.mxu1 %v2935_v35  ;;  %v2834_v17 = vld [vmem:[#allocation15 + $0xba8] sm:$0xff]  ;;  %v2577_v35 = vld [vmem:[#allocation15 + $0x3a0] sm:$0xff] }
 0x4d8   :  { %3199 = vmatprep.subr.mxu0 %v2672_v36  ;;  %3270 = vmatprep.subr.mxu1 %v2928_v63  ;;  %v2833_v36 = vld [vmem:[#allocation15 + $0xba0] sm:$0xff]  ;;  %v2570_v63 = vld [vmem:[#allocation15 + $0x368] sm:$0xff] }
 0x4d9   :  { %3200 = vmatpush2.msra.mxu0 %v2671_v38  ;;  %3271 = vmatpush2.msra.mxu1 %v2927_v39  ;;  %v2826_v38 = vld [vmem:[#allocation15 + $0xb68] sm:$0xff]  ;;  %v2569_v39 = vld [vmem:[#allocation15 + $0x360] sm:$0xff] }
 0x4da   :  { %3201 = vmatprep.subr.mxu0 %v2664_v41  ;;  %3272 = vmatprep.subr.mxu1 %v2920_v23  ;;  %v2825_v41 = vld [vmem:[#allocation15 + $0xb60] sm:$0xff]  ;;  %v2562_v23 = vld [vmem:[#allocation15 + $0x328] sm:$0xff] }
 0x4db   :  { %3202 = vmatpush2.msra.mxu0 %v2663_v26  ;;  %3273 = vmatpush2.msra.mxu1 %v2919_v42  ;;  %v2818_v26 = vld [vmem:[#allocation15 + $0xb28] sm:$0xff]  ;;  %v2561_v42 = vld [vmem:[#allocation15 + $0x320] sm:$0xff] }
 0x4dc   :  { %3203 = vmatprep.subr.mxu0 %v2656_v45  ;;  %3274 = vmatprep.subr.mxu1 %v2912_v24  ;;  %v2817_v45 = vld [vmem:[#allocation15 + $0xb20] sm:$0xff]  ;;  %v2554_v24 = vld [vmem:[#allocation15 + $0x2e8] sm:$0xff] }
 0x4dd   :  { %3204 = vmatpush2.msra.mxu0 %v2655_v27  ;;  %3275 = vmatpush2.msra.mxu1 %v2911_v46  ;;  %v2810_v27 = vld [vmem:[#allocation15 + $0xae8] sm:$0xff]  ;;  %v2553_v46 = vld [vmem:[#allocation15 + $0x2e0] sm:$0xff] }
 0x4de   :  { %3205 = vmatprep.subr.mxu0 %v2648_v47  ;;  %3276 = vmatprep.subr.mxu1 %v2904_v48  ;;  %v2809_v47 = vld [vmem:[#allocation15 + $0xae0] sm:$0xff]  ;;  %v2546_v48 = vld [vmem:[#allocation15 + $0x2a8] sm:$0xff] }
 0x4df   :  { %3206 = vmatpush2.msra.mxu0 %v2647_v49  ;;  %3277 = vmatpush2.msra.mxu1 %v2903_v50  ;;  %v2802_v49 = vld [vmem:[#allocation15 + $0xaa8] sm:$0xff]  ;;  %v2545_v50 = vld [vmem:[#allocation15 + $0x2a0] sm:$0xff] }
 0x4e0   :  { %3207 = vmatprep.subr.mxu0 %v2640_v51  ;;  %3278 = vmatprep.subr.mxu1 %v2896_v2  ;;  %v2801_v51 = vld [vmem:[#allocation15 + $0xaa0] sm:$0xff]  ;;  %v2538_v2 = vld [vmem:[#allocation15 + $0x268] sm:$0xff] }
 0x4e1   :  { %3208 = vmatpush2.msra.mxu0 %v2639_v18  ;;  %3279 = vmatpush2.msra.mxu1 %v2895_v61  ;;  %v2794_v18 = vld [vmem:[#allocation15 + $0xa68] sm:$0xff]  ;;  %v2537_v61 = vld [vmem:[#allocation15 + $0x260] sm:$0xff] }
 0x4e2   :  { %3209 = vmatprep.subr.mxu0 %v2632_v55  ;;  %3280 = vmatprep.subr.mxu1 %v2888_v56  ;;  %v2793_v55 = vld [vmem:[#allocation15 + $0xa60] sm:$0xff]  ;;  %v2530_v56 = vld [vmem:[#allocation15 + $0x228] sm:$0xff] }
 0x4e3   :  { %3210 = vmatpush2.msra.mxu0 %v2631_v57  ;;  %3281 = vmatpush2.msra.mxu1 %v2887_v58  ;;  %v2786_v57 = vld [vmem:[#allocation15 + $0xa28] sm:$0xff]  ;;  %v2529_v58 = vld [vmem:[#allocation15 + $0x220] sm:$0xff] }
 0x4e4   :  { %3211 = vmatprep.subr.mxu0 %v2624_v59  ;;  %3282 = vmatprep.subr.mxu1 %v2880_v60  ;;  %v2785_v59 = vld [vmem:[#allocation15 + $0xa20] sm:$0xff]  ;;  %v2522_v60 = vld [vmem:[#allocation15 + $0x1e8] sm:$0xff] }
 0x4e5   :  { %3212 = vmatpush2.msra.mxu0 %v2623_v62  ;;  %3283 = vmatpush2.msra.mxu1 %v2879_v0  ;;  %v2778_v62 = vld [vmem:[#allocation15 + $0x9e8] sm:$0xff]  ;;  %v2521_v0 = vld [vmem:[#allocation15 + $0x1e0] sm:$0xff] }
 0x4e6   :  { %3213 = vmatprep.subr.mxu0 %v2616_v3  ;;  %3284 = vmatprep.subr.mxu1 %v2872_v4  ;;  %v2777_v3 = vld [vmem:[#allocation15 + $0x9e0] sm:$0xff]  ;;  %v2514_v4 = vld [vmem:[#allocation15 + $0x1a8] sm:$0xff] }
 0x4e7   :  { %3214 = vmatpush2.msra.mxu0 %v2615_v12  ;;  %3285 = vmatpush2.msra.mxu1 %v2871_v5  ;;  %v2770_v12 = vld [vmem:[#allocation15 + $0x9a8] sm:$0xff]  ;;  %v2513_v5 = vld [vmem:[#allocation15 + $0x1a0] sm:$0xff] }
 0x4e8   :  { %3215 = vmatprep.subr.mxu0 %v2608_v8  ;;  %3286 = vmatprep.subr.mxu1 %v2864_v15  ;;  %v2769_v8 = vld [vmem:[#allocation15 + $0x9a0] sm:$0xff]  ;;  %v2506_v15 = vld [vmem:[#allocation15 + $0x168] sm:$0xff] }
 0x4e9   :  { %3216 = vmatpush2.msra.mxu0 %v2607_v1  ;;  %3287 = vmatpush2.msra.mxu1 %v2863_v21  ;;  %v2762_v1 = vld [vmem:[#allocation15 + $0x968] sm:$0xff]  ;;  %v2505_v21 = vld [vmem:[#allocation15 + $0x160] sm:$0xff] }
 0x4ea   :  { %3217 = vmatprep.subr.mxu0 %v2600_v22  ;;  %3288 = vmatprep.subr.mxu1 %v2856_v29  ;;  %v2761_v22 = vld [vmem:[#allocation15 + $0x960] sm:$0xff]  ;;  %v2498_v29 = vld [vmem:[#allocation15 + $0x128] sm:$0xff] }
 0x4eb   :  { %3218 = vmatpush2.msra.mxu0 %v2599_v30  ;;  %3289 = vmatpush2.msra.mxu1 %v2855_v20  ;;  %v2754_v30 = vld [vmem:[#allocation15 + $0x928] sm:$0xff]  ;;  %v2497_v20 = vld [vmem:[#allocation15 + $0x120] sm:$0xff] }
 0x4ec   :  { %3219 = vmatprep.subr.mxu0 %v2592_v28  ;;  %3290 = vmatprep.subr.mxu1 %v2848_v19  ;;  %v2753_v28 = vld [vmem:[#allocation15 + $0x920] sm:$0xff]  ;;  %v2490_v19 = vld [vmem:[#allocation15 + $0xe8] sm:$0xff] }
 0x4ed   :  { %3220 = vmatpush2.msra.mxu0 %v2591_v25  ;;  %3291 = vmatpush2.msra.mxu1 %v2847_v31  ;;  %v2746_v25 = vld [vmem:[#allocation15 + $0x8e8] sm:$0xff]  ;;  %v2489_v31 = vld [vmem:[#allocation15 + $0xe0] sm:$0xff] }
 0x4ee   :  { %3222 = vmatmul.mubr.f32.vlgmr.msra.gmra.mxu0 %v4677_v53  ;;  %3293 = vmatmul.mubr.f32.vlgmr.msra.gmra.mxu1 %v4679_v54 }
 0x4ef   :  { %3299 = vmatprep.subr.mxu0 %v2586_v32  ;;  %3370 = vmatprep.subr.mxu1 %v2842_v6  ;;  %v2745_v32 = vld [vmem:[#allocation15 + $0x8e0] sm:$0xff]  ;;  %v2482_v6 = vld [vmem:[#allocation15 + $0xa8] sm:$0xff] }
 0x4f0   :  { %3300 = vmatpush1.msra.mxu0 %v2585_v33  ;;  %3363 = vmatprep.mubr.f32.mxu0 %v4673_v16  ;;  %v2738_v33 = vld [vmem:[#allocation15 + $0x8a8] sm:$0xff] }
 0x4f1   :  { %3371 = vmatpush1.msra.mxu1 %v2841_v34  ;;  %3434 = vmatprep.mubr.f32.mxu1 %v4675_v52  ;;  %v2481_v34 = vld [vmem:[#allocation15 + $0xa0] sm:$0xff] }
 0x4f2   :  { %3301 = vmatprep.subr.mxu0 %v2578_v7  ;;  %3372 = vmatprep.subr.mxu1 %v2834_v17  ;;  %v2737_v7 = vld [vmem:[#allocation15 + $0x8a0] sm:$0xff]  ;;  %v2474_v17 = vld [vmem:[#allocation15 + $0x68] sm:$0xff] }
 0x4f3   :  { %3302 = vmatpush1.msra.mxu0 %v2577_v35  ;;  %3373 = vmatpush1.msra.mxu1 %v2833_v36  ;;  %v2730_v35 = vld [vmem:[#allocation15 + $0x868] sm:$0xff]  ;;  %v2473_v36 = vld [vmem:[#allocation15 + $0x60] sm:$0xff] }
 0x4f4   :  { %3303 = vmatprep.subr.mxu0 %v2570_v63  ;;  %3374 = vmatprep.subr.mxu1 %v2826_v38  ;;  %v2729_v63 = vld [vmem:[#allocation15 + $0x860] sm:$0xff]  ;;  %v2466_v38 = vld [vmem:[#allocation15 + $0x28] sm:$0xff] }
 0x4f5   :  { %3304 = vmatpush1.msra.mxu0 %v2569_v39  ;;  %3375 = vmatpush1.msra.mxu1 %v2825_v41  ;;  %v2722_v39 = vld [vmem:[#allocation15 + $0x828] sm:$0xff]  ;;  %v2465_v41 = vld [vmem:[#allocation15 + $0x20] sm:$0xff] }
 0x4f6   :  { %3305 = vmatprep.subr.mxu0 %v2562_v23  ;;  %3376 = vmatprep.subr.mxu1 %v2818_v26  ;;  %v2721_v23 = vld [vmem:[#allocation15 + $0x820] sm:$0xff]  ;;  %v2714_v26 = vld [vmem:[#allocation15 + $0x7e8] sm:$0xff] }
 0x4f7   :  { %3306 = vmatpush1.msra.mxu0 %v2561_v42  ;;  %3377 = vmatpush1.msra.mxu1 %v2817_v45  ;;  %v2970_v42 = vld [vmem:[#allocation15 + $0xfe8] sm:$0xff]  ;;  %v2713_v45 = vld [vmem:[#allocation15 + $0x7e0] sm:$0xff] }
 0x4f8   :  { %3307 = vmatprep.subr.mxu0 %v2554_v24  ;;  %3378 = vmatprep.subr.mxu1 %v2810_v27  ;;  %v2969_v24 = vld [vmem:[#allocation15 + $0xfe0] sm:$0xff]  ;;  %v2706_v27 = vld [vmem:[#allocation15 + $0x7a8] sm:$0xff] }
 0x4f9   :  { %3308 = vmatpush1.msra.mxu0 %v2553_v46  ;;  %3379 = vmatpush1.msra.mxu1 %v2809_v47  ;;  %v2962_v46 = vld [vmem:[#allocation15 + $0xfa8] sm:$0xff]  ;;  %v2705_v47 = vld [vmem:[#allocation15 + $0x7a0] sm:$0xff] }
 0x4fa   :  { %3309 = vmatprep.subr.mxu0 %v2546_v48  ;;  %3380 = vmatprep.subr.mxu1 %v2802_v49  ;;  %v2961_v48 = vld [vmem:[#allocation15 + $0xfa0] sm:$0xff]  ;;  %v2698_v49 = vld [vmem:[#allocation15 + $0x768] sm:$0xff] }
 0x4fb   :  { %3310 = vmatpush1.msra.mxu0 %v2545_v50  ;;  %3381 = vmatpush1.msra.mxu1 %v2801_v51  ;;  %v2954_v50 = vld [vmem:[#allocation15 + $0xf68] sm:$0xff]  ;;  %v2697_v51 = vld [vmem:[#allocation15 + $0x760] sm:$0xff] }
 0x4fc   :  { %3311 = vmatprep.subr.mxu0 %v2538_v2  ;;  %3382 = vmatprep.subr.mxu1 %v2794_v18  ;;  %v2953_v2 = vld [vmem:[#allocation15 + $0xf60] sm:$0xff]  ;;  %v2690_v18 = vld [vmem:[#allocation15 + $0x728] sm:$0xff] }
 0x4fd   :  { %3312 = vmatpush1.msra.mxu0 %v2537_v61  ;;  %3383 = vmatpush1.msra.mxu1 %v2793_v55  ;;  %v2946_v61 = vld [vmem:[#allocation15 + $0xf28] sm:$0xff]  ;;  %v2689_v55 = vld [vmem:[#allocation15 + $0x720] sm:$0xff] }
 0x4fe   :  { %3313 = vmatprep.subr.mxu0 %v2530_v56  ;;  %3384 = vmatprep.subr.mxu1 %v2786_v57  ;;  %v2945_v56 = vld [vmem:[#allocation15 + $0xf20] sm:$0xff]  ;;  %v2682_v57 = vld [vmem:[#allocation15 + $0x6e8] sm:$0xff] }
 0x4ff   :  { %3314 = vmatpush1.msra.mxu0 %v2529_v58  ;;  %3385 = vmatpush1.msra.mxu1 %v2785_v59  ;;  %v2938_v58 = vld [vmem:[#allocation15 + $0xee8] sm:$0xff]  ;;  %v2681_v59 = vld [vmem:[#allocation15 + $0x6e0] sm:$0xff] }
 0x500   :  { %3315 = vmatprep.subr.mxu0 %v2522_v60  ;;  %3386 = vmatprep.subr.mxu1 %v2778_v62  ;;  %v2937_v60 = vld [vmem:[#allocation15 + $0xee0] sm:$0xff]  ;;  %v2674_v62 = vld [vmem:[#allocation15 + $0x6a8] sm:$0xff] }
 0x501   :  { %3316 = vmatpush1.msra.mxu0 %v2521_v0  ;;  %3387 = vmatpush1.msra.mxu1 %v2777_v3  ;;  %v2930_v0 = vld [vmem:[#allocation15 + $0xea8] sm:$0xff]  ;;  %v2673_v3 = vld [vmem:[#allocation15 + $0x6a0] sm:$0xff] }
 0x502   :  { %3317 = vmatprep.subr.mxu0 %v2514_v4  ;;  %3388 = vmatprep.subr.mxu1 %v2770_v12  ;;  %v2929_v4 = vld [vmem:[#allocation15 + $0xea0] sm:$0xff]  ;;  %v2666_v12 = vld [vmem:[#allocation15 + $0x668] sm:$0xff] }
 0x503   :  { %3318 = vmatpush1.msra.mxu0 %v2513_v5  ;;  %3389 = vmatpush1.msra.mxu1 %v2769_v8  ;;  %v2922_v5 = vld [vmem:[#allocation15 + $0xe68] sm:$0xff]  ;;  %v2665_v8 = vld [vmem:[#allocation15 + $0x660] sm:$0xff] }
 0x504   :  { %3319 = vmatprep.subr.mxu0 %v2506_v15  ;;  %3390 = vmatprep.subr.mxu1 %v2762_v1  ;;  %v2921_v15 = vld [vmem:[#allocation15 + $0xe60] sm:$0xff]  ;;  %v2658_v1 = vld [vmem:[#allocation15 + $0x628] sm:$0xff] }
 0x505   :  { %3320 = vmatpush1.msra.mxu0 %v2505_v21  ;;  %3391 = vmatpush1.msra.mxu1 %v2761_v22  ;;  %v2914_v21 = vld [vmem:[#allocation15 + $0xe28] sm:$0xff]  ;;  %v2657_v22 = vld [vmem:[#allocation15 + $0x620] sm:$0xff] }
 0x506   :  { %3321 = vmatprep.subr.mxu0 %v2498_v29  ;;  %3392 = vmatprep.subr.mxu1 %v2754_v30  ;;  %v2913_v29 = vld [vmem:[#allocation15 + $0xe20] sm:$0xff]  ;;  %v2650_v30 = vld [vmem:[#allocation15 + $0x5e8] sm:$0xff] }
 0x507   :  { %3322 = vmatpush1.msra.mxu0 %v2497_v20  ;;  %3393 = vmatpush1.msra.mxu1 %v2753_v28  ;;  %v2906_v20 = vld [vmem:[#allocation15 + $0xde8] sm:$0xff]  ;;  %v2649_v28 = vld [vmem:[#allocation15 + $0x5e0] sm:$0xff] }
 0x508   :  { %3323 = vmatprep.subr.mxu0 %v2490_v19  ;;  %3394 = vmatprep.subr.mxu1 %v2746_v25  ;;  %v2905_v19 = vld [vmem:[#allocation15 + $0xde0] sm:$0xff]  ;;  %v2642_v25 = vld [vmem:[#allocation15 + $0x5a8] sm:$0xff] }
 0x509   :  { %3324 = vmatpush1.msra.mxu0 %v2489_v31  ;;  %3395 = vmatpush1.msra.mxu1 %v2745_v32  ;;  %v2898_v31 = vld [vmem:[#allocation15 + $0xda8] sm:$0xff]  ;;  %v2641_v32 = vld [vmem:[#allocation15 + $0x5a0] sm:$0xff] }
 0x50a   :  { %3325 = vmatprep.subr.mxu0 %v2482_v6  ;;  %3396 = vmatprep.subr.mxu1 %v2738_v33  ;;  %v2897_v6 = vld [vmem:[#allocation15 + $0xda0] sm:$0xff]  ;;  %v2634_v33 = vld [vmem:[#allocation15 + $0x568] sm:$0xff] }
 0x50b   :  { %3326 = vmatpush1.msra.mxu0 %v2481_v34  ;;  %3397 = vmatpush1.msra.mxu1 %v2737_v7  ;;  %v2890_v34 = vld [vmem:[#allocation15 + $0xd68] sm:$0xff]  ;;  %v2633_v7 = vld [vmem:[#allocation15 + $0x560] sm:$0xff] }
 0x50c   :  { %3327 = vmatprep.subr.mxu0 %v2474_v17  ;;  %3398 = vmatprep.subr.mxu1 %v2730_v35  ;;  %v2889_v17 = vld [vmem:[#allocation15 + $0xd60] sm:$0xff]  ;;  %v2626_v35 = vld [vmem:[#allocation15 + $0x528] sm:$0xff] }
 0x50d   :  { %3328 = vmatpush1.msra.mxu0 %v2473_v36  ;;  %3399 = vmatpush1.msra.mxu1 %v2729_v63  ;;  %v2882_v36 = vld [vmem:[#allocation15 + $0xd28] sm:$0xff]  ;;  %v2625_v63 = vld [vmem:[#allocation15 + $0x520] sm:$0xff] }
 0x50e   :  { %3329 = vmatprep.subr.mxu0 %v2466_v38  ;;  %3400 = vmatprep.subr.mxu1 %v2722_v39  ;;  %v2881_v38 = vld [vmem:[#allocation15 + $0xd20] sm:$0xff]  ;;  %v2618_v39 = vld [vmem:[#allocation15 + $0x4e8] sm:$0xff] }
 0x50f   :  { %3330 = vmatpush1.msra.mxu0 %v2465_v41  ;;  %3401 = vmatpush1.msra.mxu1 %v2721_v23  ;;  %v2874_v41 = vld [vmem:[#allocation15 + $0xce8] sm:$0xff]  ;;  %v2617_v23 = vld [vmem:[#allocation15 + $0x4e0] sm:$0xff] }
 0x510   :  { %3331 = vmatprep.subr.mxu0 %v2714_v26  ;;  %3402 = vmatprep.subr.mxu1 %v2970_v42  ;;  %v2873_v26 = vld [vmem:[#allocation15 + $0xce0] sm:$0xff]  ;;  %v2610_v42 = vld [vmem:[#allocation15 + $0x4a8] sm:$0xff] }
 0x511   :  { %3332 = vmatpush2.msra.mxu0 %v2713_v45  ;;  %3403 = vmatpush2.msra.mxu1 %v2969_v24  ;;  %v2866_v45 = vld [vmem:[#allocation15 + $0xca8] sm:$0xff]  ;;  %v2609_v24 = vld [vmem:[#allocation15 + $0x4a0] sm:$0xff] }
 0x512   :  { %3333 = vmatprep.subr.mxu0 %v2706_v27  ;;  %3404 = vmatprep.subr.mxu1 %v2962_v46  ;;  %v2865_v27 = vld [vmem:[#allocation15 + $0xca0] sm:$0xff]  ;;  %v2602_v46 = vld [vmem:[#allocation15 + $0x468] sm:$0xff] }
 0x513   :  { %3334 = vmatpush2.msra.mxu0 %v2705_v47  ;;  %3405 = vmatpush2.msra.mxu1 %v2961_v48  ;;  %v2858_v47 = vld [vmem:[#allocation15 + $0xc68] sm:$0xff]  ;;  %v2601_v48 = vld [vmem:[#allocation15 + $0x460] sm:$0xff] }
 0x514   :  { %3335 = vmatprep.subr.mxu0 %v2698_v49  ;;  %3406 = vmatprep.subr.mxu1 %v2954_v50  ;;  %v2857_v49 = vld [vmem:[#allocation15 + $0xc60] sm:$0xff]  ;;  %v2594_v50 = vld [vmem:[#allocation15 + $0x428] sm:$0xff] }
 0x515   :  { %3336 = vmatpush2.msra.mxu0 %v2697_v51  ;;  %3407 = vmatpush2.msra.mxu1 %v2953_v2  ;;  %v2850_v51 = vld [vmem:[#allocation15 + $0xc28] sm:$0xff]  ;;  %v2593_v2 = vld [vmem:[#allocation15 + $0x420] sm:$0xff] }
 0x516   :  { %3337 = vmatprep.subr.mxu0 %v2690_v18  ;;  %3408 = vmatprep.subr.mxu1 %v2946_v61  ;;  %v2849_v18 = vld [vmem:[#allocation15 + $0xc20] sm:$0xff]  ;;  %v2588_v61 = vld [vmem:[#allocation15 + $0x3f8] sm:$0xff] }
 0x517   :  { %3338 = vmatpush2.msra.mxu0 %v2689_v55  ;;  %3409 = vmatpush2.msra.mxu1 %v2945_v56  ;;  %v2844_v55 = vld [vmem:[#allocation15 + $0xbf8] sm:$0xff]  ;;  %v2587_v56 = vld [vmem:[#allocation15 + $0x3f0] sm:$0xff] }
 0x518   :  { %3339 = vmatprep.subr.mxu0 %v2682_v57  ;;  %3410 = vmatprep.subr.mxu1 %v2938_v58  ;;  %v2843_v57 = vld [vmem:[#allocation15 + $0xbf0] sm:$0xff]  ;;  %v2580_v58 = vld [vmem:[#allocation15 + $0x3b8] sm:$0xff] }
 0x519   :  { %3340 = vmatpush2.msra.mxu0 %v2681_v59  ;;  %3411 = vmatpush2.msra.mxu1 %v2937_v60  ;;  %v2836_v59 = vld [vmem:[#allocation15 + $0xbb8] sm:$0xff]  ;;  %v2579_v60 = vld [vmem:[#allocation15 + $0x3b0] sm:$0xff] }
 0x51a   :  { %3341 = vmatprep.subr.mxu0 %v2674_v62  ;;  %3412 = vmatprep.subr.mxu1 %v2930_v0  ;;  %v2835_v62 = vld [vmem:[#allocation15 + $0xbb0] sm:$0xff]  ;;  %v2572_v0 = vld [vmem:[#allocation15 + $0x378] sm:$0xff] }
 0x51b   :  { %3342 = vmatpush2.msra.mxu0 %v2673_v3  ;;  %3413 = vmatpush2.msra.mxu1 %v2929_v4  ;;  %v2828_v3 = vld [vmem:[#allocation15 + $0xb78] sm:$0xff]  ;;  %v2571_v4 = vld [vmem:[#allocation15 + $0x370] sm:$0xff] }
 0x51c   :  { %3343 = vmatprep.subr.mxu0 %v2666_v12  ;;  %3414 = vmatprep.subr.mxu1 %v2922_v5  ;;  %v2827_v12 = vld [vmem:[#allocation15 + $0xb70] sm:$0xff]  ;;  %v2564_v5 = vld [vmem:[#allocation15 + $0x338] sm:$0xff] }
 0x51d   :  { %3344 = vmatpush2.msra.mxu0 %v2665_v8  ;;  %3415 = vmatpush2.msra.mxu1 %v2921_v15  ;;  %v2820_v8 = vld [vmem:[#allocation15 + $0xb38] sm:$0xff]  ;;  %v2563_v15 = vld [vmem:[#allocation15 + $0x330] sm:$0xff] }
 0x51e   :  { %3345 = vmatprep.subr.mxu0 %v2658_v1  ;;  %3416 = vmatprep.subr.mxu1 %v2914_v21  ;;  %v2819_v1 = vld [vmem:[#allocation15 + $0xb30] sm:$0xff]  ;;  %v2812_v21 = vld [vmem:[#allocation15 + $0xaf8] sm:$0xff] }
 0x51f   :  { %3346 = vmatpush2.msra.mxu0 %v2657_v22  ;;  %3417 = vmatpush2.msra.mxu1 %v2913_v29  ;;  %v2811_v22 = vld [vmem:[#allocation15 + $0xaf0] sm:$0xff]  ;;  %v2548_v29 = vld [vmem:[#allocation15 + $0x2b8] sm:$0xff] }
 0x520   :  { %3347 = vmatprep.subr.mxu0 %v2650_v30  ;;  %3418 = vmatprep.subr.mxu1 %v2906_v20  ;;  %v2804_v30 = vld [vmem:[#allocation15 + $0xab8] sm:$0xff]  ;;  %v2547_v20 = vld [vmem:[#allocation15 + $0x2b0] sm:$0xff] }
 0x521   :  { %3348 = vmatpush2.msra.mxu0 %v2649_v28  ;;  %3419 = vmatpush2.msra.mxu1 %v2905_v19  ;;  %v2803_v28 = vld [vmem:[#allocation15 + $0xab0] sm:$0xff]  ;;  %v2540_v19 = vld [vmem:[#allocation15 + $0x278] sm:$0xff] }
 0x522   :  { %3349 = vmatprep.subr.mxu0 %v2642_v25  ;;  %3420 = vmatprep.subr.mxu1 %v2898_v31  ;;  %v2796_v25 = vld [vmem:[#allocation15 + $0xa78] sm:$0xff]  ;;  %v2539_v31 = vld [vmem:[#allocation15 + $0x270] sm:$0xff] }
 0x523   :  { %3350 = vmatpush2.msra.mxu0 %v2641_v32  ;;  %3421 = vmatpush2.msra.mxu1 %v2897_v6  ;;  %v2795_v32 = vld [vmem:[#allocation15 + $0xa70] sm:$0xff]  ;;  %v2532_v6 = vld [vmem:[#allocation15 + $0x238] sm:$0xff] }
 0x524   :  { %3351 = vmatprep.subr.mxu0 %v2634_v33  ;;  %3422 = vmatprep.subr.mxu1 %v2890_v34  ;;  %v2788_v33 = vld [vmem:[#allocation15 + $0xa38] sm:$0xff]  ;;  %v2531_v34 = vld [vmem:[#allocation15 + $0x230] sm:$0xff] }
 0x525   :  { %3352 = vmatpush2.msra.mxu0 %v2633_v7  ;;  %3423 = vmatpush2.msra.mxu1 %v2889_v17  ;;  %v2787_v7 = vld [vmem:[#allocation15 + $0xa30] sm:$0xff]  ;;  %v2524_v17 = vld [vmem:[#allocation15 + $0x1f8] sm:$0xff] }
 0x526   :  { %3353 = vmatprep.subr.mxu0 %v2626_v35  ;;  %3424 = vmatprep.subr.mxu1 %v2882_v36  ;;  %v2780_v35 = vld [vmem:[#allocation15 + $0x9f8] sm:$0xff]  ;;  %v2523_v36 = vld [vmem:[#allocation15 + $0x1f0] sm:$0xff] }
 0x527   :  { %3354 = vmatpush2.msra.mxu0 %v2625_v63  ;;  %3425 = vmatpush2.msra.mxu1 %v2881_v38  ;;  %v2779_v63 = vld [vmem:[#allocation15 + $0x9f0] sm:$0xff]  ;;  %v2516_v38 = vld [vmem:[#allocation15 + $0x1b8] sm:$0xff] }
 0x528   :  { %3355 = vmatprep.subr.mxu0 %v2618_v39  ;;  %3426 = vmatprep.subr.mxu1 %v2874_v41  ;;  %v2772_v39 = vld [vmem:[#allocation15 + $0x9b8] sm:$0xff]  ;;  %v2515_v41 = vld [vmem:[#allocation15 + $0x1b0] sm:$0xff] }
 0x529   :  { %3356 = vmatpush2.msra.mxu0 %v2617_v23  ;;  %3427 = vmatpush2.msra.mxu1 %v2873_v26  ;;  %v2771_v23 = vld [vmem:[#allocation15 + $0x9b0] sm:$0xff]  ;;  %v2508_v26 = vld [vmem:[#allocation15 + $0x178] sm:$0xff] }
 0x52a   :  { %3357 = vmatprep.subr.mxu0 %v2610_v42  ;;  %3428 = vmatprep.subr.mxu1 %v2866_v45  ;;  %v2764_v42 = vld [vmem:[#allocation15 + $0x978] sm:$0xff]  ;;  %v2507_v45 = vld [vmem:[#allocation15 + $0x170] sm:$0xff] }
 0x52b   :  { %3358 = vmatpush2.msra.mxu0 %v2609_v24  ;;  %3429 = vmatpush2.msra.mxu1 %v2865_v27  ;;  %v2763_v24 = vld [vmem:[#allocation15 + $0x970] sm:$0xff]  ;;  %v2500_v27 = vld [vmem:[#allocation15 + $0x138] sm:$0xff] }
 0x52c   :  { %3359 = vmatprep.subr.mxu0 %v2602_v46  ;;  %3430 = vmatprep.subr.mxu1 %v2858_v47  ;;  %v2756_v46 = vld [vmem:[#allocation15 + $0x938] sm:$0xff]  ;;  %v2499_v47 = vld [vmem:[#allocation15 + $0x130] sm:$0xff] }
 0x52d   :  { %3360 = vmatpush2.msra.mxu0 %v2601_v48  ;;  %3431 = vmatpush2.msra.mxu1 %v2857_v49  ;;  %v2755_v48 = vld [vmem:[#allocation15 + $0x930] sm:$0xff]  ;;  %v2492_v49 = vld [vmem:[#allocation15 + $0xf8] sm:$0xff] }
 0x52e   :  { %3361 = vmatprep.subr.mxu0 %v2594_v50  ;;  %3432 = vmatprep.subr.mxu1 %v2850_v51  ;;  %v2748_v50 = vld [vmem:[#allocation15 + $0x8f8] sm:$0xff]  ;;  %v2491_v51 = vld [vmem:[#allocation15 + $0xf0] sm:$0xff] }
 0x52f   :  { %3362 = vmatpush2.msra.mxu0 %v2593_v2  ;;  %3433 = vmatpush2.msra.mxu1 %v2849_v18  ;;  %v2747_v2 = vld [vmem:[#allocation15 + $0x8f0] sm:$0xff]  ;;  %v2484_v18 = vld [vmem:[#allocation15 + $0xb8] sm:$0xff] }
 0x530   :  { %3364 = vmatmul.mubr.f32.vlgmr.msra.gmra.mxu0 %v4677_v53  ;;  %3435 = vmatmul.mubr.f32.vlgmr.msra.gmra.mxu1 %v4679_v54 }
 0x531   :  { %3441 = vmatprep.subr.mxu0 %v2588_v61  ;;  %3512 = vmatprep.subr.mxu1 %v2844_v55  ;;  %v2740_v61 = vld [vmem:[#allocation15 + $0x8b8] sm:$0xff]  ;;  %v2483_v55 = vld [vmem:[#allocation15 + $0xb0] sm:$0xff] }
 0x532   :  { %3442 = vmatpush1.msra.mxu0 %v2587_v56  ;;  %3505 = vmatprep.mubr.f32.mxu0 %v4673_v16  ;;  %v2556_v16 = vld [vmem:[#allocation15 + $0x2f8] sm:$0xff]  ;;  %v2739_v56 = vld [vmem:[#allocation15 + $0x8b0] sm:$0xff] }
 0x533   :  { %3513 = vmatpush1.msra.mxu1 %v2843_v57  ;;  %3576 = vmatprep.mubr.f32.mxu1 %v4675_v52  ;;  %v2555_v52 = vld [vmem:[#allocation15 + $0x2f0] sm:$0xff]  ;;  %v2476_v57 = vld [vmem:[#allocation15 + $0x78] sm:$0xff] }
 0x534   :  { %3443 = vmatprep.subr.mxu0 %v2580_v58  ;;  %3514 = vmatprep.subr.mxu1 %v2836_v59  ;;  %v2732_v58 = vld [vmem:[#allocation15 + $0x878] sm:$0xff]  ;;  %v2475_v59 = vld [vmem:[#allocation15 + $0x70] sm:$0xff] }
 0x535   :  { %3444 = vmatpush1.msra.mxu0 %v2579_v60  ;;  %3515 = vmatpush1.msra.mxu1 %v2835_v62  ;;  %v2731_v60 = vld [vmem:[#allocation15 + $0x870] sm:$0xff]  ;;  %v2468_v62 = vld [vmem:[#allocation15 + $0x38] sm:$0xff] }
 0x536   :  { %3445 = vmatprep.subr.mxu0 %v2572_v0  ;;  %3516 = vmatprep.subr.mxu1 %v2828_v3  ;;  %v2724_v0 = vld [vmem:[#allocation15 + $0x838] sm:$0xff]  ;;  %v2467_v3 = vld [vmem:[#allocation15 + $0x30] sm:$0xff] }
 0x537   :  { %3446 = vmatpush1.msra.mxu0 %v2571_v4  ;;  %3517 = vmatpush1.msra.mxu1 %v2827_v12  ;;  %v2723_v4 = vld [vmem:[#allocation15 + $0x830] sm:$0xff]  ;;  %v2716_v12 = vld [vmem:[#allocation15 + $0x7f8] sm:$0xff] }
 0x538   :  { %3447 = vmatprep.subr.mxu0 %v2564_v5  ;;  %3518 = vmatprep.subr.mxu1 %v2820_v8  ;;  %v2972_v5 = vld [vmem:[#allocation15 + $0xff8] sm:$0xff]  ;;  %v2715_v8 = vld [vmem:[#allocation15 + $0x7f0] sm:$0xff] }
 0x539   :  { %3448 = vmatpush1.msra.mxu0 %v2563_v15  ;;  %3519 = vmatpush1.msra.mxu1 %v2819_v1  ;;  %v2971_v15 = vld [vmem:[#allocation15 + $0xff0] sm:$0xff]  ;;  %v2708_v1 = vld [vmem:[#allocation15 + $0x7b8] sm:$0xff] }
 0x53a   :  { %3449 = vmatprep.subr.mxu0 %v2556_v16  ;;  %3520 = vmatprep.subr.mxu1 %v2812_v21  ;;  %v2964_v16 = vld [vmem:[#allocation15 + $0xfb8] sm:$0xff]  ;;  %v2707_v21 = vld [vmem:[#allocation15 + $0x7b0] sm:$0xff] }
 0x53b   :  { %3450 = vmatpush1.msra.mxu0 %v2555_v52  ;;  %3521 = vmatpush1.msra.mxu1 %v2811_v22  ;;  %v2963_v52 = vld [vmem:[#allocation15 + $0xfb0] sm:$0xff]  ;;  %v2700_v22 = vld [vmem:[#allocation15 + $0x778] sm:$0xff] }
 0x53c   :  { %3451 = vmatprep.subr.mxu0 %v2548_v29  ;;  %3522 = vmatprep.subr.mxu1 %v2804_v30  ;;  %v2956_v29 = vld [vmem:[#allocation15 + $0xf78] sm:$0xff]  ;;  %v2699_v30 = vld [vmem:[#allocation15 + $0x770] sm:$0xff] }
 0x53d   :  { %3452 = vmatpush1.msra.mxu0 %v2547_v20  ;;  %3523 = vmatpush1.msra.mxu1 %v2803_v28  ;;  %v2955_v20 = vld [vmem:[#allocation15 + $0xf70] sm:$0xff]  ;;  %v2692_v28 = vld [vmem:[#allocation15 + $0x738] sm:$0xff] }
 0x53e   :  { %3453 = vmatprep.subr.mxu0 %v2540_v19  ;;  %3524 = vmatprep.subr.mxu1 %v2796_v25  ;;  %v2948_v19 = vld [vmem:[#allocation15 + $0xf38] sm:$0xff]  ;;  %v2691_v25 = vld [vmem:[#allocation15 + $0x730] sm:$0xff] }
 0x53f   :  { %3454 = vmatpush1.msra.mxu0 %v2539_v31  ;;  %3525 = vmatpush1.msra.mxu1 %v2795_v32  ;;  %v2947_v31 = vld [vmem:[#allocation15 + $0xf30] sm:$0xff]  ;;  %v2684_v32 = vld [vmem:[#allocation15 + $0x6f8] sm:$0xff] }
 0x540   :  { %3455 = vmatprep.subr.mxu0 %v2532_v6  ;;  %3526 = vmatprep.subr.mxu1 %v2788_v33  ;;  %v2940_v6 = vld [vmem:[#allocation15 + $0xef8] sm:$0xff]  ;;  %v2683_v33 = vld [vmem:[#allocation15 + $0x6f0] sm:$0xff] }
 0x541   :  { %3456 = vmatpush1.msra.mxu0 %v2531_v34  ;;  %3527 = vmatpush1.msra.mxu1 %v2787_v7  ;;  %v2939_v34 = vld [vmem:[#allocation15 + $0xef0] sm:$0xff]  ;;  %v2676_v7 = vld [vmem:[#allocation15 + $0x6b8] sm:$0xff] }
 0x542   :  { %3457 = vmatprep.subr.mxu0 %v2524_v17  ;;  %3528 = vmatprep.subr.mxu1 %v2780_v35  ;;  %v2932_v17 = vld [vmem:[#allocation15 + $0xeb8] sm:$0xff]  ;;  %v2675_v35 = vld [vmem:[#allocation15 + $0x6b0] sm:$0xff] }
 0x543   :  { %3458 = vmatpush1.msra.mxu0 %v2523_v36  ;;  %3529 = vmatpush1.msra.mxu1 %v2779_v63  ;;  %v2931_v36 = vld [vmem:[#allocation15 + $0xeb0] sm:$0xff]  ;;  %v2668_v63 = vld [vmem:[#allocation15 + $0x678] sm:$0xff] }
 0x544   :  { %3459 = vmatprep.subr.mxu0 %v2516_v38  ;;  %3530 = vmatprep.subr.mxu1 %v2772_v39  ;;  %v2924_v38 = vld [vmem:[#allocation15 + $0xe78] sm:$0xff]  ;;  %v2667_v39 = vld [vmem:[#allocation15 + $0x670] sm:$0xff] }
 0x545   :  { %3460 = vmatpush1.msra.mxu0 %v2515_v41  ;;  %3531 = vmatpush1.msra.mxu1 %v2771_v23  ;;  %v2923_v41 = vld [vmem:[#allocation15 + $0xe70] sm:$0xff]  ;;  %v2660_v23 = vld [vmem:[#allocation15 + $0x638] sm:$0xff] }
 0x546   :  { %3461 = vmatprep.subr.mxu0 %v2508_v26  ;;  %3532 = vmatprep.subr.mxu1 %v2764_v42  ;;  %v2916_v26 = vld [vmem:[#allocation15 + $0xe38] sm:$0xff]  ;;  %v2659_v42 = vld [vmem:[#allocation15 + $0x630] sm:$0xff] }
 0x547   :  { %3462 = vmatpush1.msra.mxu0 %v2507_v45  ;;  %3533 = vmatpush1.msra.mxu1 %v2763_v24  ;;  %v2915_v45 = vld [vmem:[#allocation15 + $0xe30] sm:$0xff]  ;;  %v2652_v24 = vld [vmem:[#allocation15 + $0x5f8] sm:$0xff] }
 0x548   :  { %3463 = vmatprep.subr.mxu0 %v2500_v27  ;;  %3534 = vmatprep.subr.mxu1 %v2756_v46  ;;  %v2908_v27 = vld [vmem:[#allocation15 + $0xdf8] sm:$0xff]  ;;  %v2651_v46 = vld [vmem:[#allocation15 + $0x5f0] sm:$0xff] }
 0x549   :  { %3464 = vmatpush1.msra.mxu0 %v2499_v47  ;;  %3535 = vmatpush1.msra.mxu1 %v2755_v48  ;;  %v2907_v47 = vld [vmem:[#allocation15 + $0xdf0] sm:$0xff]  ;;  %v2644_v48 = vld [vmem:[#allocation15 + $0x5b8] sm:$0xff] }
 0x54a   :  { %3465 = vmatprep.subr.mxu0 %v2492_v49  ;;  %3536 = vmatprep.subr.mxu1 %v2748_v50  ;;  %v2900_v49 = vld [vmem:[#allocation15 + $0xdb8] sm:$0xff]  ;;  %v2643_v50 = vld [vmem:[#allocation15 + $0x5b0] sm:$0xff] }
 0x54b   :  { %3466 = vmatpush1.msra.mxu0 %v2491_v51  ;;  %3537 = vmatpush1.msra.mxu1 %v2747_v2  ;;  %v2899_v51 = vld [vmem:[#allocation15 + $0xdb0] sm:$0xff]  ;;  %v2636_v2 = vld [vmem:[#allocation15 + $0x578] sm:$0xff] }
 0x54c   :  { %3467 = vmatprep.subr.mxu0 %v2484_v18  ;;  %3538 = vmatprep.subr.mxu1 %v2740_v61  ;;  %v2892_v18 = vld [vmem:[#allocation15 + $0xd78] sm:$0xff]  ;;  %v2635_v61 = vld [vmem:[#allocation15 + $0x570] sm:$0xff] }
 0x54d   :  { %3468 = vmatpush1.msra.mxu0 %v2483_v55  ;;  %3539 = vmatpush1.msra.mxu1 %v2739_v56  ;;  %v2891_v55 = vld [vmem:[#allocation15 + $0xd70] sm:$0xff]  ;;  %v2628_v56 = vld [vmem:[#allocation15 + $0x538] sm:$0xff] }
 0x54e   :  { %3469 = vmatprep.subr.mxu0 %v2476_v57  ;;  %3540 = vmatprep.subr.mxu1 %v2732_v58  ;;  %v2884_v57 = vld [vmem:[#allocation15 + $0xd38] sm:$0xff]  ;;  %v2627_v58 = vld [vmem:[#allocation15 + $0x530] sm:$0xff] }
 0x54f   :  { %3470 = vmatpush1.msra.mxu0 %v2475_v59  ;;  %3541 = vmatpush1.msra.mxu1 %v2731_v60  ;;  %v2883_v59 = vld [vmem:[#allocation15 + $0xd30] sm:$0xff]  ;;  %v2620_v60 = vld [vmem:[#allocation15 + $0x4f8] sm:$0xff] }
 0x550   :  { %3471 = vmatprep.subr.mxu0 %v2468_v62  ;;  %3542 = vmatprep.subr.mxu1 %v2724_v0  ;;  %v2876_v62 = vld [vmem:[#allocation15 + $0xcf8] sm:$0xff]  ;;  %v2619_v0 = vld [vmem:[#allocation15 + $0x4f0] sm:$0xff] }
 0x551   :  { %3472 = vmatpush1.msra.mxu0 %v2467_v3  ;;  %3543 = vmatpush1.msra.mxu1 %v2723_v4  ;;  %v2875_v3 = vld [vmem:[#allocation15 + $0xcf0] sm:$0xff]  ;;  %v2612_v4 = vld [vmem:[#allocation15 + $0x4b8] sm:$0xff] }
 0x552   :  { %3473 = vmatprep.subr.mxu0 %v2716_v12  ;;  %3544 = vmatprep.subr.mxu1 %v2972_v5  ;;  %v2868_v12 = vld [vmem:[#allocation15 + $0xcb8] sm:$0xff]  ;;  %v2611_v5 = vld [vmem:[#allocation15 + $0x4b0] sm:$0xff] }
 0x553   :  { %3474 = vmatpush2.msra.mxu0 %v2715_v8  ;;  %3545 = vmatpush2.msra.mxu1 %v2971_v15  ;;  %v2867_v8 = vld [vmem:[#allocation15 + $0xcb0] sm:$0xff]  ;;  %v2604_v15 = vld [vmem:[#allocation15 + $0x478] sm:$0xff] }
 0x554   :  { %3475 = vmatprep.subr.mxu0 %v2708_v1  ;;  %3546 = vmatprep.subr.mxu1 %v2964_v16  ;;  %v2860_v1 = vld [vmem:[#allocation15 + $0xc78] sm:$0xff]  ;;  %v4695_v16 = vld [vmem:[#allocation16] sm:$0xff] }
 0x555   :  { %3476 = vmatpush2.msra.mxu0 %v2707_v21  ;;  %3547 = vmatpush2.msra.mxu1 %v2963_v52  ;;  %v2603_v21 = vld [vmem:[#allocation15 + $0x470] sm:$0xff] }
 0x556   :  { %3477 = vmatprep.subr.mxu0 %v2700_v22  ;;  %3548 = vmatprep.subr.mxu1 %v2956_v29  ;;  %v2859_v52 = vld [vmem:[#allocation15 + $0xc70] sm:$0xff]  ;;  %v2982_v22 = vrot.slane %v4695_v16, %v4572_v13  ;;  %v2596_v29 = vld [vmem:[#allocation15 + $0x438] sm:$0xff] }
 0x557   :  { %3478 = vmatpush2.msra.mxu0 %v2699_v30  ;;  %3549 = vmatpush2.msra.mxu1 %v2955_v20  ;;  %v2852_v30 = vld [vmem:[#allocation15 + $0xc38] sm:$0xff] }
 0x558   :  { %3479 = vmatprep.subr.mxu0 %v2692_v28  ;;  %3550 = vmatprep.subr.mxu1 %v2948_v19  ;;  %v2595_v19 = vld [vmem:[#allocation15 + $0x430] sm:$0xff] }
 0x559   :  { %3480 = vmatpush2.msra.mxu0 %v2691_v25  ;;  %3551 = vmatpush2.msra.mxu1 %v2947_v31  ;;  %v2851_v25 = vld [vmem:[#allocation15 + $0xc30] sm:$0xff] }
 0x55a   :  { %3481 = vmatprep.subr.mxu0 %v2684_v32  ;;  %3552 = vmatprep.subr.mxu1 %v2940_v6  ;;  %v3622_v32 = vld [vmem:[#allocation18 + $0xf8] sm:$0xff] }
 0x55b   :  { %3482 = vmatpush2.msra.mxu0 %v2683_v33  ;;  %3553 = vmatpush2.msra.mxu1 %v2939_v34  ;;  %v3686_v33 = vld [vmem:[#allocation18 + $0x2f8] sm:$0xff]  ;;  %v3621_v34 = vld [vmem:[#allocation18 + $0xf0] sm:$0xff] }
 0x55c   :  { %3483 = vmatprep.subr.mxu0 %v2676_v7  ;;  %3554 = vmatprep.subr.mxu1 %v2932_v17  ;;  %v3685_v17 = vld [vmem:[#allocation18 + $0x2f0] sm:$0xff] }
 0x55d   :  { %3484 = vmatpush2.msra.mxu0 %v2675_v35  ;;  %3555 = vmatpush2.msra.mxu1 %v2931_v36  ;;  %v3620_v35 = vld [vmem:[#allocation18 + $0xe8] sm:$0xff] }
 0x55e   :  { %3485 = vmatprep.subr.mxu0 %v2668_v63  ;;  %3556 = vmatprep.subr.mxu1 %v2924_v38  ;;  %v3684_v63 = vld [vmem:[#allocation18 + $0x2e8] sm:$0xff]  ;;  %v3619_v38 = vld [vmem:[#allocation18 + $0xe0] sm:$0xff] }
 0x55f   :  { %3486 = vmatpush2.msra.mxu0 %v2667_v39  ;;  %3557 = vmatpush2.msra.mxu1 %v2923_v41  ;;  %v3618_v41 = vld [vmem:[#allocation18 + $0xd8] sm:$0xff] }
 0x560   :  { %3487 = vmatprep.subr.mxu0 %v2660_v23  ;;  %3558 = vmatprep.subr.mxu1 %v2916_v26  ;;  %v3683_v23 = vld [vmem:[#allocation18 + $0x2e0] sm:$0xff]  ;;  %v3617_v26 = vld [vmem:[#allocation18 + $0xd0] sm:$0xff] }
 0x561   :  { %3488 = vmatpush2.msra.mxu0 %v2659_v42  ;;  %3559 = vmatpush2.msra.mxu1 %v2915_v45  ;;  %v3682_v42 = vld [vmem:[#allocation18 + $0x2d8] sm:$0xff]  ;;  %v3616_v45 = vld [vmem:[#allocation18 + $0xc8] sm:$0xff] }
 0x562   :  { %3489 = vmatprep.subr.mxu0 %v2652_v24  ;;  %3560 = vmatprep.subr.mxu1 %v2908_v27  ;;  %v3680_v24 = vld [vmem:[#allocation18 + $0x2c8] sm:$0xff]  ;;  %v3614_v27 = vld [vmem:[#allocation18 + $0xb8] sm:$0xff] }
 0x563   :  { %3490 = vmatpush2.msra.mxu0 %v2651_v46  ;;  %3561 = vmatpush2.msra.mxu1 %v2907_v47  ;;  %v3679_v46 = vld [vmem:[#allocation18 + $0x2c0] sm:$0xff]  ;;  %v3613_v47 = vld [vmem:[#allocation18 + $0xb0] sm:$0xff] }
 0x564   :  { %3491 = vmatprep.subr.mxu0 %v2644_v48  ;;  %3562 = vmatprep.subr.mxu1 %v2900_v49  ;;  %v3678_v48 = vld [vmem:[#allocation18 + $0x2b8] sm:$0xff]  ;;  %v3612_v49 = vld [vmem:[#allocation18 + $0xa8] sm:$0xff] }
 0x565   :  { %3492 = vmatpush2.msra.mxu0 %v2643_v50  ;;  %3563 = vmatpush2.msra.mxu1 %v2899_v51  ;;  %v3677_v50 = vld [vmem:[#allocation18 + $0x2b0] sm:$0xff]  ;;  %v3611_v51 = vld [vmem:[#allocation18 + $0xa0] sm:$0xff] }
 0x566   :  { %3493 = vmatprep.subr.mxu0 %v2636_v2  ;;  %3564 = vmatprep.subr.mxu1 %v2892_v18  ;;  %v3676_v2 = vld [vmem:[#allocation18 + $0x2a8] sm:$0xff]  ;;  %v3610_v18 = vld [vmem:[#allocation18 + $0x98] sm:$0xff] }
 0x567   :  { %3494 = vmatpush2.msra.mxu0 %v2635_v61  ;;  %3565 = vmatpush2.msra.mxu1 %v2891_v55  ;;  %v3675_v61 = vld [vmem:[#allocation18 + $0x2a0] sm:$0xff]  ;;  %v3609_v55 = vld [vmem:[#allocation18 + $0x90] sm:$0xff] }
 0x568   :  { %3495 = vmatprep.subr.mxu0 %v2628_v56  ;;  %3566 = vmatprep.subr.mxu1 %v2884_v57  ;;  %v3674_v56 = vld [vmem:[#allocation18 + $0x298] sm:$0xff]  ;;  %v3608_v57 = vld [vmem:[#allocation18 + $0x88] sm:$0xff] }
 0x569   :  { %3496 = vmatpush2.msra.mxu0 %v2627_v58  ;;  %3567 = vmatpush2.msra.mxu1 %v2883_v59  ;;  %v3673_v58 = vld [vmem:[#allocation18 + $0x290] sm:$0xff]  ;;  %v3607_v59 = vld [vmem:[#allocation18 + $0x80] sm:$0xff] }
 0x56a   :  { %3497 = vmatprep.subr.mxu0 %v2620_v60  ;;  %3568 = vmatprep.subr.mxu1 %v2876_v62  ;;  %v3672_v60 = vld [vmem:[#allocation18 + $0x288] sm:$0xff]  ;;  %v3606_v62 = vld [vmem:[#allocation18 + $0x78] sm:$0xff] }
 0x56b   :  { %3498 = vmatpush2.msra.mxu0 %v2619_v0  ;;  %3569 = vmatpush2.msra.mxu1 %v2875_v3  ;;  %v3671_v0 = vld [vmem:[#allocation18 + $0x280] sm:$0xff]  ;;  %v3605_v3 = vld [vmem:[#allocation18 + $0x70] sm:$0xff] }
 0x56c   :  { %3499 = vmatprep.subr.mxu0 %v2612_v4  ;;  %3570 = vmatprep.subr.mxu1 %v2868_v12  ;;  %v3670_v4 = vld [vmem:[#allocation18 + $0x278] sm:$0xff]  ;;  %v3604_v12 = vld [vmem:[#allocation18 + $0x68] sm:$0xff] }
 0x56d   :  { %3500 = vmatpush2.msra.mxu0 %v2611_v5  ;;  %3571 = vmatpush2.msra.mxu1 %v2867_v8  ;;  %v4699_v20 = vpop.f32.mrf.mxu0  ;;  %v4701_v28 = vpop.f32.mrf.mxu1  ;;  %v3669_v5 = vld [vmem:[#allocation18 + $0x270] sm:$0xff]  ;;  %v3603_v8 = vld [vmem:[#allocation18 + $0x60] sm:$0xff] }
 0x56e   :  { %3501 = vmatprep.subr.mxu0 %v2604_v15  ;;  %3572 = vmatprep.subr.mxu1 %v2860_v1  ;;  %v3668_v15 = vld [vmem:[#allocation18 + $0x268] sm:$0xff]  ;;  %v3602_v1 = vld [vmem:[#allocation18 + $0x58] sm:$0xff] }
 0x56f   :  { %3502 = vmatpush2.msra.mxu0 %v2603_v21  ;;  %3573 = vmatpush2.msra.mxu1 %v2859_v52  ;;  %v3083_v31 = vpop.f32.mrf.mxu0  ;;  %v3154_v7 = vpop.f32.mrf.mxu1  ;;  %v3667_v21 = vld [vmem:[#allocation18 + $0x260] sm:$0xff]  ;;  %v3601_v52 = vld [vmem:[#allocation18 + $0x50] sm:$0xff] }
 0x570   :  { %3503 = vmatprep.subr.mxu0 %v2596_v29  ;;  %3574 = vmatprep.subr.mxu1 %v2852_v30  ;;  %v3084_v6 = vadd.f32 %v3083_v31, %v2982_v22  ;;  %v3666_v22 = vld [vmem:[#allocation18 + $0x258] sm:$0xff]  ;;  %v3600_v29 = vld [vmem:[#allocation18 + $0x48] sm:$0xff]  ;;  %v3665_v30 = vld [vmem:[#allocation18 + $0x250] sm:$0xff] }
 0x571   :  { %3504 = vmatpush2.msra.mxu0 %v2595_v19  ;;  %3575 = vmatpush2.msra.mxu1 %v2851_v25  ;;  %v3599_v19 = vld [vmem:[#allocation18 + $0x40] sm:$0xff]  ;;  %v3664_v25 = vld [vmem:[#allocation18 + $0x248] sm:$0xff]  ;;  %v3598_v31 = vld [vmem:[#allocation18 + $0x38] sm:$0xff] }
 0x572   :  { %3506 = vmatmul.mubr.f32.vlgmr.msra.gmra.mxu0 %v4677_v53  ;;  %3577 = vmatmul.mubr.f32.vlgmr.msra.gmra.mxu1 %v4679_v54  ;;  %v3155_v36 = vadd.f32 %v3154_v7, %v3084_v6  ;;  %v3681_v53 = vld [vmem:[#allocation18 + $0x2d0] sm:$0xff]  ;;  %v3615_v54 = vld [vmem:[#allocation18 + $0xc0] sm:$0xff] }
 0x573   :  { %3859 = vmatprep.subr.mxu0 %v3622_v32  ;;  %3930 = vmatprep.subr.mxu1 %v3686_v33  ;;  %v3663_v32 = vld [vmem:[#allocation18 + $0x240] sm:$0xff]  ;;  %v3597_v6 = vld [vmem:[#allocation18 + $0x30] sm:$0xff]  ;;  %v3662_v33 = vld [vmem:[#allocation18 + $0x238] sm:$0xff] }
 0x574   :  { %3860 = vmatpush1.msra.mxu0 %v3621_v34  ;;  %v3584_v39 = vmax.f32 %v3155_v36, 0.0  ;;  %3931 = vmatpush1.msra.mxu1 %v3685_v17  ;;  %v3596_v34 = vld [vmem:[#allocation18 + $0x28] sm:$0xff]  ;;  %v3661_v7 = vld [vmem:[#allocation18 + $0x230] sm:$0xff]  ;;  %v3595_v17 = vld [vmem:[#allocation18 + $0x20] sm:$0xff] }
 0x575   :  { %3861 = vmatprep.subr.mxu0 %v3620_v35  ;;  %3932 = vmatprep.subr.mxu1 %v3684_v63  ;;  %v3660_v35 = vld [vmem:[#allocation18 + $0x228] sm:$0xff]  ;;  %v3594_v36 = vld [vmem:[#allocation18 + $0x18] sm:$0xff]  ;;  %v3659_v63 = vld [vmem:[#allocation18 + $0x220] sm:$0xff] }
 0x576   :  { %3862 = vmatpush1.msra.mxu0 %v3619_v38  ;;  %3923 = vmatprep.mubr.f32.mxu0 %v3584_v39  ;;  %v3593_v38 = vld [vmem:[#allocation18 + $0x10] sm:$0xff]  ;;  %v3658_v39 = vld [vmem:[#allocation18 + $0x218] sm:$0xff] }
 0x577   :  { %3863 = vmatprep.subr.mxu0 %v3618_v41  ;;  %3933 = vmatpush1.msra.mxu1 %v3683_v23  ;;  %v3592_v41 = vld [vmem:[#allocation18 + $0x8] sm:$0xff]  ;;  %v3657_v23 = vld [vmem:[#allocation18 + $0x210] sm:$0xff] }
 0x578   :  { %3864 = vmatpush1.msra.mxu0 %v3617_v26  ;;  %3934 = vmatprep.subr.mxu1 %v3682_v42  ;;  %v3591_v26 = vld [vmem:[#allocation18] sm:$0xff]  ;;  %v3656_v42 = vld [vmem:[#allocation18 + $0x208] sm:$0xff] }
 0x579   :  { %3865 = vmatprep.subr.mxu0 %v3616_v45  ;;  %3935 = vmatpush1.msra.mxu1 %v3681_v53  ;;  %v3654_v45 = vld [vmem:[#allocation18 + $0x1f8] sm:$0xff]  ;;  %v3655_v53 = vld [vmem:[#allocation18 + $0x200] sm:$0xff] }
 0x57a   :  { %3866 = vmatpush1.msra.mxu0 %v3615_v54  ;;  %3936 = vmatprep.subr.mxu1 %v3680_v24  ;;  %v3653_v54 = vld [vmem:[#allocation18 + $0x1f0] sm:$0xff]  ;;  %v3718_v24 = vld [vmem:[#allocation18 + $0x3f8] sm:$0xff] }
 0x57b   :  { %3867 = vmatprep.subr.mxu0 %v3614_v27  ;;  %3937 = vmatpush1.msra.mxu1 %v3679_v46  ;;  %v3652_v27 = vld [vmem:[#allocation18 + $0x1e8] sm:$0xff]  ;;  %v3717_v46 = vld [vmem:[#allocation18 + $0x3f0] sm:$0xff] }
 0x57c   :  { %3868 = vmatpush1.msra.mxu0 %v3613_v47  ;;  %3938 = vmatprep.subr.mxu1 %v3678_v48  ;;  %v3651_v47 = vld [vmem:[#allocation18 + $0x1e0] sm:$0xff]  ;;  %v3716_v48 = vld [vmem:[#allocation18 + $0x3e8] sm:$0xff] }
 0x57d   :  { %3869 = vmatprep.subr.mxu0 %v3612_v49  ;;  %3939 = vmatpush1.msra.mxu1 %v3677_v50  ;;  %v3650_v49 = vld [vmem:[#allocation18 + $0x1d8] sm:$0xff]  ;;  %v3715_v50 = vld [vmem:[#allocation18 + $0x3e0] sm:$0xff] }
 0x57e   :  { %3870 = vmatpush1.msra.mxu0 %v3611_v51  ;;  %3940 = vmatprep.subr.mxu1 %v3676_v2  ;;  %v3649_v51 = vld [vmem:[#allocation18 + $0x1d0] sm:$0xff]  ;;  %v3714_v2 = vld [vmem:[#allocation18 + $0x3d8] sm:$0xff] }
 0x57f   :  { %3871 = vmatprep.subr.mxu0 %v3610_v18  ;;  %3941 = vmatpush1.msra.mxu1 %v3675_v61  ;;  %v3648_v18 = vld [vmem:[#allocation18 + $0x1c8] sm:$0xff]  ;;  %v3713_v61 = vld [vmem:[#allocation18 + $0x3d0] sm:$0xff] }
 0x580   :  { %3872 = vmatpush1.msra.mxu0 %v3609_v55  ;;  %3942 = vmatprep.subr.mxu1 %v3674_v56  ;;  %v3647_v55 = vld [vmem:[#allocation18 + $0x1c0] sm:$0xff]  ;;  %v3712_v56 = vld [vmem:[#allocation18 + $0x3c8] sm:$0xff] }
 0x581   :  { %3873 = vmatprep.subr.mxu0 %v3608_v57  ;;  %3943 = vmatpush1.msra.mxu1 %v3673_v58  ;;  %v3646_v57 = vld [vmem:[#allocation18 + $0x1b8] sm:$0xff]  ;;  %v3711_v58 = vld [vmem:[#allocation18 + $0x3c0] sm:$0xff] }
 0x582   :  { %3874 = vmatpush1.msra.mxu0 %v3607_v59  ;;  %3944 = vmatprep.subr.mxu1 %v3672_v60  ;;  %v3645_v59 = vld [vmem:[#allocation18 + $0x1b0] sm:$0xff]  ;;  %v3710_v60 = vld [vmem:[#allocation18 + $0x3b8] sm:$0xff] }
 0x583   :  { %3875 = vmatprep.subr.mxu0 %v3606_v62  ;;  %3945 = vmatpush1.msra.mxu1 %v3671_v0  ;;  %v3644_v62 = vld [vmem:[#allocation18 + $0x1a8] sm:$0xff]  ;;  %v3709_v0 = vld [vmem:[#allocation18 + $0x3b0] sm:$0xff] }
 0x584   :  { %3876 = vmatpush1.msra.mxu0 %v3605_v3  ;;  %3946 = vmatprep.subr.mxu1 %v3670_v4  ;;  %v3643_v3 = vld [vmem:[#allocation18 + $0x1a0] sm:$0xff]  ;;  %v3708_v4 = vld [vmem:[#allocation18 + $0x3a8] sm:$0xff] }
 0x585   :  { %3877 = vmatprep.subr.mxu0 %v3604_v12  ;;  %3947 = vmatpush1.msra.mxu1 %v3669_v5  ;;  %v3642_v12 = vld [vmem:[#allocation18 + $0x198] sm:$0xff]  ;;  %v3707_v5 = vld [vmem:[#allocation18 + $0x3a0] sm:$0xff] }
 0x586   :  { %3878 = vmatpush1.msra.mxu0 %v3603_v8  ;;  %3948 = vmatprep.subr.mxu1 %v3668_v15  ;;  %v3641_v8 = vld [vmem:[#allocation18 + $0x190] sm:$0xff]  ;;  %v3706_v15 = vld [vmem:[#allocation18 + $0x398] sm:$0xff] }
 0x587   :  { %3879 = vmatprep.subr.mxu0 %v3602_v1  ;;  %3949 = vmatpush1.msra.mxu1 %v3667_v21  ;;  %v3640_v1 = vld [vmem:[#allocation18 + $0x188] sm:$0xff]  ;;  %v3705_v21 = vld [vmem:[#allocation18 + $0x390] sm:$0xff] }
 0x588   :  { %3880 = vmatpush1.msra.mxu0 %v3601_v52  ;;  %3950 = vmatprep.subr.mxu1 %v3666_v22  ;;  %v3639_v52 = vld [vmem:[#allocation18 + $0x180] sm:$0xff]  ;;  %v3704_v22 = vld [vmem:[#allocation18 + $0x388] sm:$0xff] }
 0x589   :  { %3881 = vmatprep.subr.mxu0 %v3600_v29  ;;  %3951 = vmatpush1.msra.mxu1 %v3665_v30  ;;  %v3638_v29 = vld [vmem:[#allocation18 + $0x178] sm:$0xff]  ;;  %v3703_v30 = vld [vmem:[#allocation18 + $0x380] sm:$0xff] }
 0x58a   :  { %3882 = vmatpush1.msra.mxu0 %v3599_v19  ;;  %3952 = vmatprep.subr.mxu1 %v3664_v25  ;;  %v3637_v19 = vld [vmem:[#allocation18 + $0x170] sm:$0xff]  ;;  %v3702_v25 = vld [vmem:[#allocation18 + $0x378] sm:$0xff] }
 0x58b   :  { %3883 = vmatprep.subr.mxu0 %v3598_v31  ;;  %3953 = vmatpush1.msra.mxu1 %v3663_v32  ;;  %v3636_v31 = vld [vmem:[#allocation18 + $0x168] sm:$0xff]  ;;  %v3701_v32 = vld [vmem:[#allocation18 + $0x370] sm:$0xff] }
 0x58c   :  { %3884 = vmatpush1.msra.mxu0 %v3597_v6  ;;  %3954 = vmatprep.subr.mxu1 %v3662_v33  ;;  %v3635_v6 = vld [vmem:[#allocation18 + $0x160] sm:$0xff]  ;;  %v3700_v33 = vld [vmem:[#allocation18 + $0x368] sm:$0xff] }
 0x58d   :  { %3885 = vmatprep.subr.mxu0 %v3596_v34  ;;  %3955 = vmatpush1.msra.mxu1 %v3661_v7  ;;  %v3634_v34 = vld [vmem:[#allocation18 + $0x158] sm:$0xff]  ;;  %v3699_v7 = vld [vmem:[#allocation18 + $0x360] sm:$0xff] }
 0x58e   :  { %3886 = vmatpush1.msra.mxu0 %v3595_v17  ;;  %3956 = vmatprep.subr.mxu1 %v3660_v35  ;;  %v2978_v17 = vrot.slane %v4695_v16, %v4567_v11  ;;  %v3633_v35 = vld [vmem:[#allocation18 + $0x150] sm:$0xff] }
 0x58f   :  { %3887 = vmatprep.subr.mxu0 %v3594_v36  ;;  %3957 = vmatpush1.msra.mxu1 %v3659_v63  ;;  %v3698_v36 = vld [vmem:[#allocation18 + $0x358] sm:$0xff]  ;;  %v3632_v63 = vld [vmem:[#allocation18 + $0x148] sm:$0xff] }
 0x590   :  { %3888 = vmatpush1.msra.mxu0 %v3593_v38  ;;  %3958 = vmatprep.subr.mxu1 %v3658_v39  ;;  %v3697_v38 = vld [vmem:[#allocation18 + $0x350] sm:$0xff]  ;;  %v3631_v39 = vld [vmem:[#allocation18 + $0x140] sm:$0xff] }
 0x591   :  { %3889 = vmatprep.subr.mxu0 %v3592_v41  ;;  %3959 = vmatpush1.msra.mxu1 %v3657_v23  ;;  %v3696_v41 = vld [vmem:[#allocation18 + $0x348] sm:$0xff]  ;;  %v3630_v23 = vld [vmem:[#allocation18 + $0x138] sm:$0xff] }
 0x592   :  { %3890 = vmatpush1.msra.mxu0 %v3591_v26  ;;  %3960 = vmatprep.subr.mxu1 %v3656_v42  ;;  %v3695_v26 = vld [vmem:[#allocation18 + $0x340] sm:$0xff]  ;;  %v3082_v42 = vadd.f32 %v4699_v20, %v2978_v17 }
 0x593   :  { %3891 = vmatprep.subr.mxu0 %v3654_v45  ;;  %3961 = vmatpush1.msra.mxu1 %v3655_v53  ;;  %v3629_v45 = vld [vmem:[#allocation18 + $0x130] sm:$0xff]  ;;  %v3694_v53 = vld [vmem:[#allocation18 + $0x338] sm:$0xff]  ;;  %v3739_v17 = vld [vmem:[#allocation18 + $0x4a0] sm:$0xff] }
 0x594   :  { %3892 = vmatpush2.msra.mxu0 %v3653_v54  ;;  %3962 = vmatprep.subr.mxu1 %v3718_v24  ;;  %v3628_v54 = vld [vmem:[#allocation18 + $0x128] sm:$0xff]  ;;  %v3693_v24 = vld [vmem:[#allocation18 + $0x330] sm:$0xff]  ;;  %v3153_v20 = vadd.f32 %v4701_v28, %v3082_v42  ;;  %v3803_v42 = vld [vmem:[#allocation18 + $0x6a0] sm:$0xff] }
 0x595   :  { %3893 = vmatprep.subr.mxu0 %v3652_v27  ;;  %3963 = vmatpush2.msra.mxu1 %v3717_v46  ;;  %v3627_v27 = vld [vmem:[#allocation18 + $0x120] sm:$0xff]  ;;  %v2986_v46 = vrot.slane %v4695_v16, %v4564_v10  ;;  %v3689_v10 = vld [vmem:[#allocation18 + $0x310] sm:$0xff] }
 0x596   :  { %3894 = vmatpush2.msra.mxu0 %v3651_v47  ;;  %3964 = vmatprep.subr.mxu1 %v3716_v48  ;;  %v3692_v47 = vld [vmem:[#allocation18 + $0x328] sm:$0xff]  ;;  %v3626_v48 = vld [vmem:[#allocation18 + $0x118] sm:$0xff] }
 0x597   :  { %3895 = vmatprep.subr.mxu0 %v3650_v49  ;;  %3965 = vmatpush2.msra.mxu1 %v3715_v50  ;;  %v3691_v49 = vld [vmem:[#allocation18 + $0x320] sm:$0xff]  ;;  %v3625_v50 = vld [vmem:[#allocation18 + $0x110] sm:$0xff] }
 0x598   :  { %3896 = vmatpush2.msra.mxu0 %v3649_v51  ;;  %3966 = vmatprep.subr.mxu1 %v3714_v2  ;;  %v2990_v51 = vrot.slane %v4695_v16, %v4575_v14  ;;  %v3690_v2 = vld [vmem:[#allocation18 + $0x318] sm:$0xff] }
 0x599   :  { %3897 = vmatprep.subr.mxu0 %v3648_v18  ;;  %3967 = vmatpush2.msra.mxu1 %v3713_v61  ;;  %v3624_v18 = vld [vmem:[#allocation18 + $0x108] sm:$0xff]  ;;  %v3750_v16 = vld [vmem:[#allocation18 + $0x4f8] sm:$0xff] }
 0x59a   :  { %3898 = vmatpush2.msra.mxu0 %v3647_v55  ;;  %3968 = vmatprep.subr.mxu1 %v3712_v56  ;;  %v3623_v56 = vld [vmem:[#allocation18 + $0x100] sm:$0xff] }
 0x59b   :  { %3899 = vmatprep.subr.mxu0 %v3646_v57  ;;  %3969 = vmatpush2.msra.mxu1 %v3711_v58  ;;  %v3688_v58 = vld [vmem:[#allocation18 + $0x308] sm:$0xff] }
 0x59c   :  { %3900 = vmatpush2.msra.mxu0 %v3645_v59  ;;  %3970 = vmatprep.subr.mxu1 %v3710_v60  ;;  %v3687_v59 = vld [vmem:[#allocation18 + $0x300] sm:$0xff]  ;;  %v3583_v60 = vmax.f32 %v3153_v20, 0.0  ;;  %v3798_v20 = vld [vmem:[#allocation18 + $0x678] sm:$0xff] }
 0x59d   :  { %3901 = vmatprep.subr.mxu0 %v3644_v62  ;;  %3971 = vmatpush2.msra.mxu1 %v3709_v0  ;;  %v3814_v62 = vld [vmem:[#allocation18 + $0x6f8] sm:$0xff] }
 0x59e   :  { %3902 = vmatpush2.msra.mxu0 %v3643_v3  ;;  %3972 = vmatprep.subr.mxu1 %v3708_v4  ;;  %v3749_v4 = vld [vmem:[#allocation18 + $0x4f0] sm:$0xff] }
 0x59f   :  { %3903 = vmatprep.subr.mxu0 %v3642_v12  ;;  %3973 = vmatpush2.msra.mxu1 %v3707_v5  ;;  %v3748_v5 = vld [vmem:[#allocation18 + $0x4e8] sm:$0xff] }
 0x5a0   :  { %3904 = vmatpush2.msra.mxu0 %v3641_v8  ;;  %3974 = vmatprep.subr.mxu1 %v3706_v15  ;;  %v3747_v8 = vld [vmem:[#allocation18 + $0x4e0] sm:$0xff] }
 0x5a1   :  { %3905 = vmatprep.subr.mxu0 %v3640_v1  ;;  %3975 = vmatpush2.msra.mxu1 %v3705_v21  ;;  %v3746_v1 = vld [vmem:[#allocation18 + $0x4d8] sm:$0xff] }
 0x5a2   :  { %3906 = vmatpush2.msra.mxu0 %v3639_v52  ;;  %3976 = vmatprep.subr.mxu1 %v3704_v22  ;;  %v3745_v52 = vld [vmem:[#allocation18 + $0x4d0] sm:$0xff] }
 0x5a3   :  { %3907 = vmatprep.subr.mxu0 %v3638_v29  ;;  %3977 = vmatpush2.msra.mxu1 %v3703_v30  ;;  %v3813_v22 = vld [vmem:[#allocation18 + $0x6f0] sm:$0xff]  ;;  %v3744_v29 = vld [vmem:[#allocation18 + $0x4c8] sm:$0xff] }
 0x5a4   :  { %3908 = vmatpush2.msra.mxu0 %v3637_v19  ;;  %3978 = vmatprep.subr.mxu1 %v3702_v25  ;;  %v3812_v30 = vld [vmem:[#allocation18 + $0x6e8] sm:$0xff]  ;;  %v3743_v19 = vld [vmem:[#allocation18 + $0x4c0] sm:$0xff] }
 0x5a5   :  { %3909 = vmatprep.subr.mxu0 %v3636_v31  ;;  %3979 = vmatpush2.msra.mxu1 %v3701_v32  ;;  %v3811_v25 = vld [vmem:[#allocation18 + $0x6e0] sm:$0xff]  ;;  %v3742_v31 = vld [vmem:[#allocation18 + $0x4b8] sm:$0xff] }
 0x5a6   :  { %3910 = vmatpush2.msra.mxu0 %v3635_v6  ;;  %3980 = vmatprep.subr.mxu1 %v3700_v33  ;;  %v3810_v32 = vld [vmem:[#allocation18 + $0x6d8] sm:$0xff]  ;;  %v3741_v6 = vld [vmem:[#allocation18 + $0x4b0] sm:$0xff] }
 0x5a7   :  { %3911 = vmatprep.subr.mxu0 %v3634_v34  ;;  %3981 = vmatpush2.msra.mxu1 %v3699_v7  ;;  %v3809_v33 = vld [vmem:[#allocation18 + $0x6d0] sm:$0xff]  ;;  %v3740_v34 = vld [vmem:[#allocation18 + $0x4a8] sm:$0xff] }
 0x5a8   :  { %3912 = vmatpush2.msra.mxu0 %v3633_v35  ;;  %3982 = vmatprep.subr.mxu1 %v3698_v36  ;;  %v3808_v7 = vld [vmem:[#allocation18 + $0x6c8] sm:$0xff]  ;;  %v3807_v35 = vld [vmem:[#allocation18 + $0x6c0] sm:$0xff]  ;;  %v3738_v36 = vld [vmem:[#allocation18 + $0x498] sm:$0xff] }
 0x5a9   :  { %3913 = vmatprep.subr.mxu0 %v3632_v63  ;;  %3983 = vmatpush2.msra.mxu1 %v3697_v38  ;;  %v3806_v63 = vld [vmem:[#allocation18 + $0x6b8] sm:$0xff]  ;;  %v3737_v38 = vld [vmem:[#allocation18 + $0x490] sm:$0xff] }
 0x5aa   :  { %3914 = vmatpush2.msra.mxu0 %v3631_v39  ;;  %3984 = vmatprep.subr.mxu1 %v3696_v41  ;;  %v3805_v39 = vld [vmem:[#allocation18 + $0x6b0] sm:$0xff]  ;;  %v3736_v41 = vld [vmem:[#allocation18 + $0x488] sm:$0xff] }
 0x5ab   :  { %3915 = vmatprep.subr.mxu0 %v3630_v23  ;;  %3985 = vmatpush2.msra.mxu1 %v3695_v26  ;;  %v3804_v23 = vld [vmem:[#allocation18 + $0x6a8] sm:$0xff]  ;;  %v3735_v26 = vld [vmem:[#allocation18 + $0x480] sm:$0xff] }
 0x5ac   :  { %3916 = vmatpush2.msra.mxu0 %v3629_v45  ;;  %3986 = vmatprep.subr.mxu1 %v3694_v53  ;;  %v3734_v45 = vld [vmem:[#allocation18 + $0x478] sm:$0xff] }
 0x5ad   :  { %3917 = vmatprep.subr.mxu0 %v3628_v54  ;;  %3987 = vmatpush2.msra.mxu1 %v3693_v24  ;;  %v3802_v53 = vld [vmem:[#allocation18 + $0x698] sm:$0xff]  ;;  %v3733_v54 = vld [vmem:[#allocation18 + $0x470] sm:$0xff] }
 0x5ae   :  { %3918 = vmatpush2.msra.mxu0 %v3627_v27  ;;  %v3223_v61 = vpop.f32.mrf.mxu0  ;;  %v3294_v55 = vpop.f32.mrf.mxu1  ;;  %3988 = vmatprep.subr.mxu1 %v3692_v47  ;;  %v3801_v24 = vld [vmem:[#allocation18 + $0x690] sm:$0xff]  ;;  %v3732_v27 = vld [vmem:[#allocation18 + $0x468] sm:$0xff]  ;;  %v3731_v47 = vld [vmem:[#allocation18 + $0x460] sm:$0xff] }
 0x5af   :  { %3919 = vmatprep.subr.mxu0 %v3626_v48  ;;  %v3224_v57 = vadd.f32 %v3223_v61, %v2986_v46  ;;  %3989 = vmatpush2.msra.mxu1 %v3691_v49  ;;  %v3800_v46 = vld [vmem:[#allocation18 + $0x688] sm:$0xff]  ;;  %v3799_v48 = vld [vmem:[#allocation18 + $0x680] sm:$0xff]  ;;  %v3730_v49 = vld [vmem:[#allocation18 + $0x458] sm:$0xff] }
 0x5b0   :  { %3920 = vmatpush2.msra.mxu0 %v3625_v50  ;;  %v3225_v28 = vpop.f32.mrf.mxu0  ;;  %3990 = vmatprep.subr.mxu1 %v3690_v2  ;;  %v3296_v3 = vpop.f32.mrf.mxu1  ;;  %v3729_v50 = vld [vmem:[#allocation18 + $0x450] sm:$0xff]  ;;  %v3728_v2 = vld [vmem:[#allocation18 + $0x448] sm:$0xff]  ;;  %v3727_v61 = vld [vmem:[#allocation18 + $0x440] sm:$0xff] }
 0x5b1   :  { %3921 = vmatprep.subr.mxu0 %v3624_v18  ;;  %v3226_v14 = vadd.f32 %v3225_v28, %v2990_v51  ;;  %3991 = vmatpush2.msra.mxu1 %v3689_v10  ;;  %v3295_v0 = vadd.f32 %v3294_v55, %v3224_v57  ;;  %v3797_v51 = vld [vmem:[#allocation18 + $0x670] sm:$0xff]  ;;  %v3796_v18 = vld [vmem:[#allocation18 + $0x668] sm:$0xff]  ;;  %v3795_v55 = vld [vmem:[#allocation18 + $0x660] sm:$0xff] }
 0x5b2   :  { %3922 = vmatpush2.msra.mxu0 %v3623_v56  ;;  %3992 = vmatprep.subr.mxu1 %v3688_v58  ;;  %v3726_v10 = vld [vmem:[#allocation18 + $0x438] sm:$0xff]  ;;  %v3725_v57 = vld [vmem:[#allocation18 + $0x430] sm:$0xff]  ;;  %v3724_v28 = vld [vmem:[#allocation18 + $0x428] sm:$0xff] }
 0x5b3   :  { %3924 = vmatmul.mubr.f32.vlgmr.msra.gmra.mxu0 %v3583_v60  ;;  %v3297_v12 = vadd.f32 %v3296_v3, %v3226_v14  ;;  %3993 = vmatpush2.msra.mxu1 %v3687_v59  ;;  %v3585_v21 = vmax.f32 %v3295_v0, 0.0  ;;  %v3794_v56 = vld [vmem:[#allocation18 + $0x658] sm:$0xff]  ;;  %v3793_v58 = vld [vmem:[#allocation18 + $0x650] sm:$0xff]  ;;  %v3792_v59 = vld [vmem:[#allocation18 + $0x648] sm:$0xff] }
 0x5b4   :  { %4001 = vmatprep.subr.mxu0 %v3750_v16  ;;  %4072 = vmatprep.subr.mxu1 %v3814_v62  ;;  %v3723_v60 = vld [vmem:[#allocation18 + $0x420] sm:$0xff]  ;;  %v3722_v16 = vld [vmem:[#allocation18 + $0x418] sm:$0xff]  ;;  %v3721_v0 = vld [vmem:[#allocation18 + $0x410] sm:$0xff] }
 0x5b5   :  { %v3586_v15 = vmax.f32 %v3297_v12, 0.0  ;;  %4002 = vmatpush1.msra.mxu0 %v3749_v4  ;;  %v3791_v14 = vld [vmem:[#allocation18 + $0x640] sm:$0xff]  ;;  %v3790_v62 = vld [vmem:[#allocation18 + $0x638] sm:$0xff]  ;;  %v3789_v3 = vld [vmem:[#allocation18 + $0x630] sm:$0xff] }
 0x5b6   :  { %4003 = vmatprep.subr.mxu0 %v3748_v5  ;;  %v3720_v4 = vld [vmem:[#allocation18 + $0x408] sm:$0xff]  ;;  %v3719_v5 = vld [vmem:[#allocation18 + $0x400] sm:$0xff] }
 0x5b7   :  { %3994 = vmatprep.mubr.f32.mxu1 %v3586_v15  ;;  %4004 = vmatpush1.msra.mxu0 %v3747_v8  ;;  %v3788_v12 = vld [vmem:[#allocation18 + $0x628] sm:$0xff]  ;;  %v3787_v8 = vld [vmem:[#allocation18 + $0x620] sm:$0xff]  ;;  %v3782_v15 = vld [vmem:[#allocation18 + $0x5f8] sm:$0xff] }
 0x5b8   :  { %3995 = vmatmul.mubr.f32.vlgmr.msra.gmra.mxu1 %v3585_v21  ;;  %4005 = vmatprep.subr.mxu0 %v3746_v1  ;;  %v3786_v1 = vld [vmem:[#allocation18 + $0x618] sm:$0xff]  ;;  %v3781_v21 = vld [vmem:[#allocation18 + $0x5f0] sm:$0xff] }
 0x5b9   :  { %4006 = vmatpush1.msra.mxu0 %v3745_v52  ;;  %4073 = vmatpush1.msra.mxu1 %v3813_v22  ;;  %v3785_v52 = vld [vmem:[#allocation18 + $0x610] sm:$0xff]  ;;  %v3780_v22 = vld [vmem:[#allocation18 + $0x5e8] sm:$0xff] }
 0x5ba   :  { %4007 = vmatprep.subr.mxu0 %v3744_v29  ;;  %4074 = vmatprep.subr.mxu1 %v3812_v30  ;;  %v3784_v29 = vld [vmem:[#allocation18 + $0x608] sm:$0xff]  ;;  %v3779_v30 = vld [vmem:[#allocation18 + $0x5e0] sm:$0xff] }
 0x5bb   :  { %4008 = vmatpush1.msra.mxu0 %v3743_v19  ;;  %4075 = vmatpush1.msra.mxu1 %v3811_v25  ;;  %v3783_v19 = vld [vmem:[#allocation18 + $0x600] sm:$0xff]  ;;  %v3778_v25 = vld [vmem:[#allocation18 + $0x5d8] sm:$0xff] }
 0x5bc   :  { %4009 = vmatprep.subr.mxu0 %v3742_v31  ;;  %4076 = vmatprep.subr.mxu1 %v3810_v32  ;;  %v3846_v31 = vld [vmem:[#allocation18 + $0x7f8] sm:$0xff]  ;;  %v3777_v32 = vld [vmem:[#allocation18 + $0x5d0] sm:$0xff] }
 0x5bd   :  { %4010 = vmatpush1.msra.mxu0 %v3741_v6  ;;  %4077 = vmatpush1.msra.mxu1 %v3809_v33  ;;  %v3845_v6 = vld [vmem:[#allocation18 + $0x7f0] sm:$0xff]  ;;  %v3776_v33 = vld [vmem:[#allocation18 + $0x5c8] sm:$0xff] }
 0x5be   :  { %4011 = vmatprep.subr.mxu0 %v3740_v34  ;;  %4078 = vmatprep.subr.mxu1 %v3808_v7  ;;  %v3844_v34 = vld [vmem:[#allocation18 + $0x7e8] sm:$0xff]  ;;  %v3775_v7 = vld [vmem:[#allocation18 + $0x5c0] sm:$0xff] }
 0x5bf   :  { %4012 = vmatpush1.msra.mxu0 %v3739_v17  ;;  %4079 = vmatpush1.msra.mxu1 %v3807_v35  ;;  %v3843_v17 = vld [vmem:[#allocation18 + $0x7e0] sm:$0xff]  ;;  %v3774_v35 = vld [vmem:[#allocation18 + $0x5b8] sm:$0xff] }
 0x5c0   :  { %4013 = vmatprep.subr.mxu0 %v3738_v36  ;;  %4080 = vmatprep.subr.mxu1 %v3806_v63  ;;  %v3842_v36 = vld [vmem:[#allocation18 + $0x7d8] sm:$0xff]  ;;  %v3773_v63 = vld [vmem:[#allocation18 + $0x5b0] sm:$0xff] }
 0x5c1   :  { %4014 = vmatpush1.msra.mxu0 %v3737_v38  ;;  %4081 = vmatpush1.msra.mxu1 %v3805_v39  ;;  %v3841_v38 = vld [vmem:[#allocation18 + $0x7d0] sm:$0xff]  ;;  %v3772_v39 = vld [vmem:[#allocation18 + $0x5a8] sm:$0xff] }
 0x5c2   :  { %4015 = vmatprep.subr.mxu0 %v3736_v41  ;;  %4082 = vmatprep.subr.mxu1 %v3804_v23  ;;  %v3840_v41 = vld [vmem:[#allocation18 + $0x7c8] sm:$0xff]  ;;  %v3771_v23 = vld [vmem:[#allocation18 + $0x5a0] sm:$0xff] }
 0x5c3   :  { %4016 = vmatpush1.msra.mxu0 %v3735_v26  ;;  %4083 = vmatpush1.msra.mxu1 %v3803_v42  ;;  %v3839_v26 = vld [vmem:[#allocation18 + $0x7c0] sm:$0xff]  ;;  %v3770_v42 = vld [vmem:[#allocation18 + $0x598] sm:$0xff] }
 0x5c4   :  { %4017 = vmatprep.subr.mxu0 %v3734_v45  ;;  %4084 = vmatprep.subr.mxu1 %v3802_v53  ;;  %v3838_v45 = vld [vmem:[#allocation18 + $0x7b8] sm:$0xff]  ;;  %v3769_v53 = vld [vmem:[#allocation18 + $0x590] sm:$0xff] }
 0x5c5   :  { %4018 = vmatpush1.msra.mxu0 %v3733_v54  ;;  %4085 = vmatpush1.msra.mxu1 %v3801_v24  ;;  %v3837_v54 = vld [vmem:[#allocation18 + $0x7b0] sm:$0xff]  ;;  %v3768_v24 = vld [vmem:[#allocation18 + $0x588] sm:$0xff] }
 0x5c6   :  { %4019 = vmatprep.subr.mxu0 %v3732_v27  ;;  %4086 = vmatprep.subr.mxu1 %v3800_v46  ;;  %v3836_v27 = vld [vmem:[#allocation18 + $0x7a8] sm:$0xff]  ;;  %v3767_v46 = vld [vmem:[#allocation18 + $0x580] sm:$0xff] }
 0x5c7   :  { %4020 = vmatpush1.msra.mxu0 %v3731_v47  ;;  %4087 = vmatpush1.msra.mxu1 %v3799_v48  ;;  %v3835_v47 = vld [vmem:[#allocation18 + $0x7a0] sm:$0xff]  ;;  %v3766_v48 = vld [vmem:[#allocation18 + $0x578] sm:$0xff] }
 0x5c8   :  { %4021 = vmatprep.subr.mxu0 %v3730_v49  ;;  %4088 = vmatprep.subr.mxu1 %v3798_v20  ;;  %v3834_v49 = vld [vmem:[#allocation18 + $0x798] sm:$0xff]  ;;  %v3765_v20 = vld [vmem:[#allocation18 + $0x570] sm:$0xff] }
 0x5c9   :  { %4022 = vmatpush1.msra.mxu0 %v3729_v50  ;;  %4089 = vmatpush1.msra.mxu1 %v3797_v51  ;;  %v3833_v50 = vld [vmem:[#allocation18 + $0x790] sm:$0xff]  ;;  %v3764_v51 = vld [vmem:[#allocation18 + $0x568] sm:$0xff] }
 0x5ca   :  { %4023 = vmatprep.subr.mxu0 %v3728_v2  ;;  %4090 = vmatprep.subr.mxu1 %v3796_v18  ;;  %v3832_v2 = vld [vmem:[#allocation18 + $0x788] sm:$0xff]  ;;  %v3763_v18 = vld [vmem:[#allocation18 + $0x560] sm:$0xff] }
 0x5cb   :  { %4024 = vmatpush1.msra.mxu0 %v3727_v61  ;;  %4091 = vmatpush1.msra.mxu1 %v3795_v55  ;;  %v3831_v61 = vld [vmem:[#allocation18 + $0x780] sm:$0xff]  ;;  %v3762_v55 = vld [vmem:[#allocation18 + $0x558] sm:$0xff] }
 0x5cc   :  { %4025 = vmatprep.subr.mxu0 %v3726_v10  ;;  %4092 = vmatprep.subr.mxu1 %v3794_v56  ;;  %v3830_v10 = vld [vmem:[#allocation18 + $0x778] sm:$0xff]  ;;  %v3761_v56 = vld [vmem:[#allocation18 + $0x550] sm:$0xff] }
 0x5cd   :  { %4026 = vmatpush1.msra.mxu0 %v3725_v57  ;;  %4093 = vmatpush1.msra.mxu1 %v3793_v58  ;;  %v3829_v57 = vld [vmem:[#allocation18 + $0x770] sm:$0xff]  ;;  %v3760_v58 = vld [vmem:[#allocation18 + $0x548] sm:$0xff] }
 0x5ce   :  { %4027 = vmatprep.subr.mxu0 %v3724_v28  ;;  %4094 = vmatprep.subr.mxu1 %v3792_v59  ;;  %v3828_v28 = vld [vmem:[#allocation18 + $0x768] sm:$0xff]  ;;  %v3759_v59 = vld [vmem:[#allocation18 + $0x540] sm:$0xff] }
 0x5cf   :  { %4028 = vmatpush1.msra.mxu0 %v3723_v60  ;;  %4095 = vmatpush1.msra.mxu1 %v3791_v14  ;;  %v3827_v60 = vld [vmem:[#allocation18 + $0x760] sm:$0xff]  ;;  %v3758_v14 = vld [vmem:[#allocation18 + $0x538] sm:$0xff] }
 0x5d0   :  { %4029 = vmatprep.subr.mxu0 %v3722_v16  ;;  %4096 = vmatprep.subr.mxu1 %v3790_v62  ;;  %v3826_v16 = vld [vmem:[#allocation18 + $0x758] sm:$0xff]  ;;  %v3757_v62 = vld [vmem:[#allocation18 + $0x530] sm:$0xff] }
 0x5d1   :  { %4030 = vmatpush1.msra.mxu0 %v3721_v0  ;;  %4097 = vmatpush1.msra.mxu1 %v3789_v3  ;;  %v3825_v0 = vld [vmem:[#allocation18 + $0x750] sm:$0xff]  ;;  %v3756_v3 = vld [vmem:[#allocation18 + $0x528] sm:$0xff] }
 0x5d2   :  { %4031 = vmatprep.subr.mxu0 %v3720_v4  ;;  %4098 = vmatprep.subr.mxu1 %v3788_v12  ;;  %v3824_v4 = vld [vmem:[#allocation18 + $0x748] sm:$0xff]  ;;  %v3755_v12 = vld [vmem:[#allocation18 + $0x520] sm:$0xff] }
 0x5d3   :  { %4032 = vmatpush1.msra.mxu0 %v3719_v5  ;;  %4099 = vmatpush1.msra.mxu1 %v3787_v8  ;;  %v3823_v5 = vld [vmem:[#allocation18 + $0x740] sm:$0xff]  ;;  %v4172_v8 = vld [vmem:[#allocation16] sm:$0xff] }
 0x5d4   :  { %4033 = vmatprep.subr.mxu0 %v3782_v15  ;;  %4100 = vmatprep.subr.mxu1 %v3786_v1  ;;  %v2994_v15 = vrot.slane %v4172_v8, %v461_v40  ;;  %v3754_v1 = vld [vmem:[#allocation18 + $0x518] sm:$0xff]  ;;  %v3819_v40 = vld [vmem:[#allocation18 + $0x720] sm:$0xff] }
 0x5d5   :  { %4034 = vmatpush2.msra.mxu0 %v3781_v21  ;;  %4101 = vmatpush1.msra.mxu1 %v3785_v52  ;;  %v3822_v21 = vld [vmem:[#allocation18 + $0x738] sm:$0xff]  ;;  %v3753_v52 = vld [vmem:[#allocation18 + $0x510] sm:$0xff] }
 0x5d6   :  { %4035 = vmatprep.subr.mxu0 %v3780_v22  ;;  %4102 = vmatprep.subr.mxu1 %v3784_v29  ;;  %v3821_v22 = vld [vmem:[#allocation18 + $0x730] sm:$0xff]  ;;  %v2998_v29 = vrot.slane %v4172_v8, %v465_v43  ;;  %v3816_v43 = vld [vmem:[#allocation18 + $0x708] sm:$0xff] }
 0x5d7   :  { %4036 = vmatpush2.msra.mxu0 %v3779_v30  ;;  %4103 = vmatpush1.msra.mxu1 %v3783_v19  ;;  %v3752_v30 = vld [vmem:[#allocation18 + $0x508] sm:$0xff] }
 0x5d8   :  { %4037 = vmatprep.subr.mxu0 %v3778_v25  ;;  %4104 = vmatprep.subr.mxu1 %v3846_v31  ;;  %v3820_v19 = vld [vmem:[#allocation18 + $0x728] sm:$0xff] }
 0x5d9   :  { %4038 = vmatpush2.msra.mxu0 %v3777_v32  ;;  %4105 = vmatpush2.msra.mxu1 %v3845_v6  ;;  %v3751_v32 = vld [vmem:[#allocation18 + $0x500] sm:$0xff] }
 0x5da   :  { %4039 = vmatprep.subr.mxu0 %v3776_v33  ;;  %4106 = vmatprep.subr.mxu1 %v3844_v34  ;;  %v3818_v33 = vld [vmem:[#allocation18 + $0x718] sm:$0xff] }
 0x5db   :  { %4040 = vmatpush2.msra.mxu0 %v3775_v7  ;;  %4107 = vmatpush2.msra.mxu1 %v3843_v17  ;;  %v3817_v7 = vld [vmem:[#allocation18 + $0x710] sm:$0xff] }
 0x5dc   :  { %4041 = vmatprep.subr.mxu0 %v3774_v35  ;;  %4108 = vmatprep.subr.mxu1 %v3842_v36 }
 0x5dd   :  { %4042 = vmatpush2.msra.mxu0 %v3773_v63  ;;  %4109 = vmatpush2.msra.mxu1 %v3841_v38  ;;  %v3815_v63 = vld [vmem:[#allocation18 + $0x700] sm:$0xff] }
 0x5de   :  { %4043 = vmatprep.subr.mxu0 %v3772_v39  ;;  %4110 = vmatprep.subr.mxu1 %v3840_v41 }
 0x5df   :  { %4044 = vmatpush2.msra.mxu0 %v3771_v23  ;;  %4111 = vmatpush2.msra.mxu1 %v3839_v26  ;;  %v3002_v23 = vrot.slane %v4172_v8, %v469_v37  ;;  %v3006_v26 = vrot.slane %v4172_v8, %v473_v44 }
 0x5e0   :  { %4045 = vmatprep.subr.mxu0 %v3770_v42  ;;  %4112 = vmatprep.subr.mxu1 %v3838_v45 }
 0x5e1   :  { %4046 = vmatpush2.msra.mxu0 %v3769_v53  ;;  %4113 = vmatpush2.msra.mxu1 %v3837_v54 }
 0x5e2   :  { %4047 = vmatprep.subr.mxu0 %v3768_v24  ;;  %4114 = vmatprep.subr.mxu1 %v3836_v27 }
 0x5e3   :  { %4048 = vmatpush2.msra.mxu0 %v3767_v46  ;;  %4115 = vmatpush2.msra.mxu1 %v3835_v47 }
 0x5e4   :  { %4049 = vmatprep.subr.mxu0 %v3766_v48  ;;  %4116 = vmatprep.subr.mxu1 %v3834_v49 }
 0x5e5   :  { %4050 = vmatpush2.msra.mxu0 %v3765_v20  ;;  %4117 = vmatpush2.msra.mxu1 %v3833_v50  ;;  %v3847_v20 = vld [vmem:[%s4744_s12] sm:$0x3] }
 0x5e6   :  { %4051 = vmatprep.subr.mxu0 %v3764_v51  ;;  %4118 = vmatprep.subr.mxu1 %v3832_v2  ;;  %v3852_v9 = vrot.slane %v3847_v20, %v4567_v11  ;;  %v3856_v51 = vrot.slane %v3847_v20, %v4572_v13 }
 0x5e7   :  { %4052 = vmatpush2.msra.mxu0 %v3763_v18  ;;  %4119 = vmatpush2.msra.mxu1 %v3831_v61 }
 0x5e8   :  { %4053 = vmatprep.subr.mxu0 %v3762_v55  ;;  %4120 = vmatprep.subr.mxu1 %v3830_v10 }
 0x5e9   :  { %4054 = vmatpush2.msra.mxu0 %v3761_v56  ;;  %4121 = vmatpush2.msra.mxu1 %v3829_v57 }
 0x5ea   :  { %4055 = vmatprep.subr.mxu0 %v3760_v58  ;;  %4122 = vmatprep.subr.mxu1 %v3828_v28 }
 0x5eb   :  { %4056 = vmatpush2.msra.mxu0 %v3759_v59  ;;  %4123 = vmatpush2.msra.mxu1 %v3827_v60 }
 0x5ec   :  { %4057 = vmatprep.subr.mxu0 %v3758_v14  ;;  %4124 = vmatprep.subr.mxu1 %v3826_v16 }
 0x5ed   :  { %4058 = vmatpush2.msra.mxu0 %v3757_v62  ;;  %4125 = vmatpush2.msra.mxu1 %v3825_v0 }
 0x5ee   :  { %4059 = vmatprep.subr.mxu0 %v3756_v3  ;;  %4126 = vmatprep.subr.mxu1 %v3824_v4 }
 0x5ef   :  { %4060 = vmatpush2.msra.mxu0 %v3755_v12  ;;  %4127 = vmatpush2.msra.mxu1 %v3823_v5 }
 0x5f0   :  { %v3365_v25 = vpop.f32.mrf.mxu0  ;;  %v3436_v31 = vpop.f32.mrf.mxu1  ;;  %4061 = vmatprep.subr.mxu0 %v3754_v1  ;;  %4128 = vmatprep.subr.mxu1 %v3822_v21 }
 0x5f1   :  { %v3366_v6 = vadd.f32 %v3365_v25, %v2994_v15  ;;  %4062 = vmatpush2.msra.mxu0 %v3753_v52  ;;  %4129 = vmatpush2.msra.mxu1 %v3821_v22 }
 0x5f2   :  { %v3367_v34 = vpop.f32.mrf.mxu0  ;;  %4063 = vmatprep.subr.mxu0 %v3752_v30  ;;  %4130 = vmatprep.subr.mxu1 %v3820_v19  ;;  %v3438_v36 = vpop.f32.mrf.mxu1 }
 0x5f3   :  { %v3368_v17 = vadd.f32 %v3367_v34, %v2998_v29  ;;  %4064 = vmatpush2.msra.mxu0 %v3751_v32  ;;  %4131 = vmatpush2.msra.mxu1 %v3819_v40  ;;  %v3437_v35 = vadd.f32 %v3436_v31, %v3366_v6 }
 0x5f4   :  { %4132 = vmatprep.subr.mxu1 %v3818_v33 }
 0x5f5   :  { %v3439_v38 = vadd.f32 %v3438_v36, %v3368_v17  ;;  %4133 = vmatpush2.msra.mxu1 %v3817_v7  ;;  %v3587_v41 = vmax.f32 %v3437_v35, 0.0 }
 0x5f6   :  { %4134 = vmatprep.subr.mxu1 %v3816_v43 }
 0x5f7   :  { %v3588_v39 = vmax.f32 %v3439_v38, 0.0  ;;  %4135 = vmatpush2.msra.mxu1 %v3815_v63 }
 0x5f9   :  { %4065 = vmatprep.mubr.f32.mxu0 %v3588_v39 }
 0x5fa   :  { %4066 = vmatmul.mubr.f32.vlgmr.msra.gmra.mxu0 %v3587_v41 }
 0x632   :  { %v3507_v42 = vpop.f32.mrf.mxu0  ;;  %v3578_v45 = vpop.f32.mrf.mxu1 }
 0x633   :  { %v3508_v53 = vadd.f32 %v3507_v42, %v3002_v23 }
 0x634   :  { %v3509_v54 = vpop.f32.mrf.mxu0  ;;  %v3580_v46 = vpop.f32.mrf.mxu1 }
 0x635   :  { %v3510_v24 = vadd.f32 %v3509_v54, %v3006_v26  ;;  %v3579_v27 = vadd.f32 %v3578_v45, %v3508_v53 }
 0x637   :  { %v3581_v47 = vadd.f32 %v3580_v46, %v3510_v24  ;;  %v3589_v49 = vmax.f32 %v3579_v27, 0.0 }
 0x639   :  { %v3590_v48 = vmax.f32 %v3581_v47, 0.0 }
 0x63b   :  { %4136 = vmatprep.mubr.f32.mxu1 %v3590_v48 }
 0x63c   :  { %4137 = vmatmul.mubr.f32.vlgmr.msra.gmra.mxu1 %v3589_v49 }
 0x673   :  { %v3925_v37 = vpop.f32.mrf.mxu0 }
 0x674   :  { %v3926_v18 = vadd.f32 %v3925_v37, %v3852_v9 }
 0x675   :  { %v3927_v44 = vpop.f32.mrf.mxu0 }
 0x676   :  { %v3928_v55 = vadd.f32 %v3927_v44, %v3856_v51 }
 0x678   :  { %v3996_v50 = vpop.f32.mrf.mxu1 }
 0x679   :  { %v3997_v10 = vadd.f32 %v3996_v50, %v3926_v18 }
 0x67a   :  { %v3998_v61 = vpop.f32.mrf.mxu1 }
 0x67b   :  { %v3999_v57 = vadd.f32 %v3998_v61, %v3928_v55 }
 0x6ba   :  { %v4067_v2 = vpop.f32.mrf.mxu0 }
 0x6bb   :  { %v4068_v58 = vadd.f32 %v4067_v2, %v3997_v10 }
 0x6bc   :  { %v4069_v56 = vpop.f32.mrf.mxu0 }
 0x6bd   :  { %v4070_v59 = vadd.f32 %v4069_v56, %v3999_v57 }
 0x6fc   :  { %v4138_v28 = vpop.f32.mrf.mxu1 }
 0x6fd   :  { %v4139_v60 = vadd.f32 %v4138_v28, %v4068_v58 }
 0x6fe   :  { %v4140_v14 = vpop.f32.mrf.mxu1 }
 0x6ff   :  { %4143 = vst [vmem:[%s4745_s13] sm:$0xff] %v4139_v60  ;;  %v4141_v11 = vadd.f32 %v4140_v14, %v4070_v59 }
 0x701   :  { %4144 = vst [vmem:[%s4745_s13 + $0x8] sm:$0xff] %v4141_v11 }
 0x702   :  { %4149 = vsyncpa [#allocation3], 1 }
 0x703   :  { %4150 = vsyncpa [#allocation5], 1 }
 0x704   :  { %4151 = vsyncpa [#allocation8], 1 }
 0x705   :  { %4152 = vsyncpa [#allocation11], 1 }
 0x706   :  { %4153 = vsyncpa [#allocation14], 1 }
 0x707   :  { %4154 = vsyncpa [#allocation17], 1 }

</bundles_post_ra>
